<compile_context>
chip_gen: v6e
topology: v6e:2x2x1
jax: 0.10.0
libtpu: 0.0.40
codegen_flags: <defaults>
</compile_context>

<pallas_src>
import functools

import numpy as np
import jax
import jax.numpy as jnp
from jax.experimental import pallas as pl
from jax.experimental.pallas import tpu as pltpu


# ----------------------------------------------------------------------------
# Host-side geometry helpers (numpy, computed once)
# ----------------------------------------------------------------------------
def bilinear_index_weights(out_size, in_size):
    """PyTorch F.interpolate(bilinear, align_corners=False) index/weight math."""
    d = np.arange(out_size, dtype=np.float64)
    src = (d + 0.5) * (in_size / out_size) - 0.5
    src = np.maximum(src, 0.0)
    i0 = np.minimum(np.floor(src).astype(np.int64), in_size - 1)
    i1 = np.minimum(i0 + 1, in_size - 1)
    w1 = (src - i0).astype(np.float32)
    w0 = (1.0 - w1).astype(np.float32)
    return i0, i1, w0, w1


def build_geometry(H, W):
    """Masks / selection / interpolation matrices for the fused kernel."""
    Hp, Wp = H + 2, W + 2
    S, Sp = H * W, Hp * Wp
    H2, W2 = (H - 3) // 2 + 1, (W - 3) // 2 + 1          # ESA conv2 (3x3,s2,p0)
    S2 = H2 * W2
    Hm, Wm = (H2 - 7) // 3 + 1, (W2 - 7) // 3 + 1        # max_pool2d(7, 3)
    Hmp, Wmp = Hm + 2, Wm + 2
    Smp = Hmp * Wmp

    ii, jj = np.meshgrid(np.arange(H), np.arange(W), indexing="ij")
    interior = ((ii + 1) * Wp + (jj + 1)).reshape(-1)
    dst_hw = (ii * W + jj).reshape(-1)

    # 1 on the HxW interior of the padded (Hp,Wp) grid, 0 on the padding ring.
    mask = np.zeros((1, Sp), np.float32)
    mask[0, interior] = 1.0

    # select interior columns of the padded grid -> HxW grid
    isel = np.zeros((Sp, S), np.float32)
    isel[interior, dst_hw] = 1.0

    # stride-2 sampling of the same-conv output (positions (2oi+1, 2oj+1))
    oi, oj = np.meshgrid(np.arange(H2), np.arange(W2), indexing="ij")
    d2 = np.zeros((S, S2), np.float32)
    d2[((2 * oi + 1) * W + (2 * oj + 1)).reshape(-1),
       (oi * W2 + oj).reshape(-1)] = 1.0

    # keep stride-3 pool positions and scatter them into a zero-padded Hm grid
    pi, pj = np.meshgrid(np.arange(Hm), np.arange(Wm), indexing="ij")
    pe = np.zeros((S2, Smp), np.float32)
    pe[(3 * pi * W2 + 3 * pj).reshape(-1),
       ((pi + 1) * Wmp + (pj + 1)).reshape(-1)] = 1.0

    # bilinear upsample (align_corners=False): padded Hm x Wm grid -> H x W
    y0, y1, wy0, wy1 = bilinear_index_weights(H, Hm)
    x0, x1, wx0, wx1 = bilinear_index_weights(W, Wm)
    up = np.zeros((Smp, S), np.float32)
    for yi, wyv in ((y0, wy0), (y1, wy1)):
        for xi, wxv in ((x0, wx0), (x1, wx1)):
            src = ((yi[:, None] + 1) * Wmp + (xi[None, :] + 1)).reshape(-1)
            wgt = (wyv[:, None] * wxv[None, :]).reshape(-1)
            np.add.at(up, (src, dst_hw), wgt)

    g_need = max(Wp + 1, W + 1, Wmp + 1, 6, 6 * W2)      # max |lane shift|
    G = int(np.ceil(g_need / 128.0)) * 128

    return dict(H=H, W=W, Hp=Hp, Wp=Wp, S=S, Sp=Sp, H2=H2, W2=W2, Hm=Hm,
                Wm=Wm, Wmp=Wmp, Smp=Smp, G=G,
                mask=jnp.asarray(mask), isel=jnp.asarray(isel),
                d2=jnp.asarray(d2), pe=jnp.asarray(pe), up=jnp.asarray(up))


def pack_params(params):
    """Pack PyTorch-layout conv weights once, outside the forward."""
    def w3x3(w):                      # (O, I, 3, 3) -> (9, O, I), k = dy*3+dx
        return jnp.transpose(w, (2, 3, 0, 1)).reshape(9, w.shape[0], w.shape[1])

    def w1x1(w):                      # (O, I, 1, 1) -> (O, I)
        return w.reshape(w.shape[0], w.shape[1])

    def col(b):                       # (O,) -> (O, 1) broadcast over lanes
        return b.reshape(-1, 1)

    return [
        w3x3(params["conv1_r_w"]), col(params["conv1_r_b"]),
        w3x3(params["conv2_r_w"]), col(params["conv2_r_b"]),
        w1x1(params["c5_w"]), col(params["c5_b"]),
        w1x1(params["esa_conv1_w"]), col(params["esa_conv1_b"]),
        w3x3(params["esa_conv2_w"]), col(params["esa_conv2_b"]),
        w3x3(params["esa_conv3_w"]), col(params["esa_conv3_b"]),
        w1x1(params["esa_conv_f_w"]), col(params["esa_conv_f_b"]),
        w1x1(params["esa_conv4_w"]), col(params["esa_conv4_b"]),
    ]


# ----------------------------------------------------------------------------
# Fused Pallas kernel (one batch element per grid step)
# ----------------------------------------------------------------------------
def _rlfb_kernel(x_ref, mask_ref, isel_ref, d2_ref, pe_ref, up_ref,
                 w1_ref, b1_ref, w2_ref, b2_ref, w5_ref, b5_ref,
                 we1_ref, be1_ref, we2_ref, be2_ref, we3_ref, be3_ref,
                 wef_ref, bef_ref, we4_ref, be4_ref,
                 o_ref, scr_ref, *, W, Wp, W2, Wmp, G):
    f32 = jnp.float32

    # Zero the shift scratch so guard-band reads are always finite.
    scr_ref[...] = jnp.zeros(scr_ref.shape, f32)

    def shifted_reads(inp, deltas):
        """Write `inp` once into the guard-banded scratch; return lane-shifted
        copies out[:, p] = inp[:, p + d].  Out-of-range columns pick up finite
        guard values that only land in masked / never-selected positions."""
        C, n = inp.shape
        scr_ref[0:C, G:G + n] = inp
        return [scr_ref[0:C, G + d:G + d + n] for d in deltas]

    def conv3x3(inp, w_ref, b_ref, row_w):
        """3x3 'same' conv on a flat (C, rows*row_w) grid: 9 shifted MXU dots."""
        deltas = [(dy - 1) * row_w + (dx - 1) for dy in range(3) for dx in range(3)]
        taps = shifted_reads(inp, deltas)
        acc = None
        for k, xs in enumerate(taps):
            t = jnp.dot(w_ref[k], xs, preferred_element_type=f32)
            acc = t if acc is None else acc + t
        return acc + b_ref[...]

    def leaky(v):
        return jnp.where(v >= 0.0, v, 0.05 * v)

    x = x_ref[0]                                  # (Cin, Sp) zero-padded, flat
    mask = mask_ref[...]                          # (1, Sp)

    # conv1_r + LeakyReLU; mask re-creates the zero padding ring for conv2_r.
    out_p = leaky(conv3x3(x, w1_ref, b1_ref, Wp)) * mask
    # conv2_r + LeakyReLU (its border columns are never used downstream).
    out1_p = leaky(conv3x3(out_p, w2_ref, b2_ref, Wp))

    # residual out1 + x + out, then keep only the H*W interior columns.
    res = jnp.dot(out1_p + x + out_p, isel_ref[...], preferred_element_type=f32)

    # c5 (1x1) and ESA conv1 (1x1).
    z = jnp.dot(w5_ref[...], res, preferred_element_type=f32) + b5_ref[...]
    c1 = jnp.dot(we1_ref[...], z, preferred_element_type=f32) + be1_ref[...]

    # ESA conv2 (3x3, stride 2, pad 0) == same-conv on HxW then stride-2 pick.
    c2s = conv3x3(c1, we2_ref, be2_ref, W)
    c2 = jnp.dot(c2s, d2_ref[...], preferred_element_type=f32)        # (f, S2)

    # max_pool2d(kernel=7, stride=3): separable shifted max on the H2xW2 grid.
    rmax = c2
    for xs in shifted_reads(c2, list(range(1, 7))):
        rmax = jnp.maximum(rmax, xs)
    vmax = rmax
    for xs in shifted_reads(rmax, [dy * W2 for dy in range(1, 7)]):
        vmax = jnp.maximum(vmax, xs)
    vpad = jnp.dot(vmax, pe_ref[...], preferred_element_type=f32)     # (f, Smp)

    # ESA conv3 (3x3, pad 1) on the pooled (zero-padded) grid.
    c3 = conv3x3(vpad, we3_ref, be3_ref, Wmp)

    # bilinear upsample (align_corners=False) as one MXU matmul + conv_f skip.
    c3u = jnp.dot(c3, up_ref[...], preferred_element_type=f32)        # (f, S)
    cf = jnp.dot(wef_ref[...], c1, preferred_element_type=f32) + bef_ref[...]

    # conv4 (1x1) + sigmoid gate modulating z.  Lane-dense (Cout, S) store.
    logits = jnp.dot(we4_ref[...], c3u + cf, preferred_element_type=f32) + be4_ref[...]
    o_ref[0] = (z * jax.nn.sigmoid(logits)).astype(o_ref.dtype)


def rlfb_forward_pallas(x_nchw, packed, geom):
    N, Cin, H, W = x_nchw.shape
    Sp, S, G = geom["Sp"], geom["S"], geom["G"]
    Cmid = packed[0].shape[1]
    Cout = packed[4].shape[0]
    f = packed[6].shape[0]
    c_scr = max(Cin, Cmid, f)

    x_pad = jnp.pad(x_nchw.astype(jnp.float32), ((0, 0), (0, 0), (1, 1), (1, 1)))
    x_flat = x_pad.reshape(N, Cin, Sp)

    consts = (geom["mask"], geom["isel"], geom["d2"], geom["pe"], geom["up"])

    def _full(arr):
        nd = arr.ndim
        return pl.BlockSpec(arr.shape, lambda b, _nd=nd: (0,) * _nd)

    kernel = functools.partial(_rlfb_kernel, W=W, Wp=geom["Wp"], W2=geom["W2"],
                               Wmp=geom["Wmp"], G=G)

    y_flat = pl.pallas_call(
        kernel,
        grid=(N,),
        in_specs=([pl.BlockSpec((1, Cin, Sp), lambda b: (b, 0, 0))]
                  + [_full(a) for a in consts]
                  + [_full(a) for a in packed]),
        out_specs=pl.BlockSpec((1, Cout, S), lambda b: (b, 0, 0)),
        out_shape=jax.ShapeDtypeStruct((N, Cout, S), jnp.float32),
        scratch_shapes=[pltpu.VMEM((c_scr, G + Sp + G), jnp.float32)],
        compiler_params=pltpu.CompilerParams(
            dimension_semantics=("parallel",)),
    )(x_flat, *consts, *packed)

    return y_flat.reshape(N, Cout, H, W)


# ----------------------------------------------------------------------------
# Pure-JAX reference (independent math path, for validation)
# ----------------------------------------------------------------------------
def rlfb_reference(x, params):
    hi = jax.lax.Precision.HIGHEST

    def conv(v, w, b, stride=1, padding=0):
        y = jax.lax.conv_general_dilated(
            v, w, (stride, stride), [(padding, padding), (padding, padding)],
            dimension_numbers=("NCHW", "OIHW", "NCHW"), precision=hi)
        return y + b.reshape(1, -1, 1, 1)

    leaky = lambda v: jnp.where(v >= 0.0, v, 0.05 * v)

    out = leaky(conv(x, params["conv1_r_w"], params["conv1_r_b"], padding=1))
    out1 = leaky(conv(out, params["conv2_r_w"], params["conv2_r_b"], padding=1))
    res = out1 + x + out
    z = conv(res, params["c5_w"], params["c5_b"])

    c1_ = conv(z, params["esa_conv1_w"], params["esa_conv1_b"])
    c1 = conv(c1_, params["esa_conv2_w"], params["esa_conv2_b"], stride=2)
    v_max = jax.lax.reduce_window(c1, -jnp.inf, jax.lax.max,
                                  (1, 1, 7, 7), (1, 1, 3, 3), "VALID")
    c3 = conv(v_max, params["esa_conv3_w"], params["esa_conv3_b"], padding=1)

    H, W = x.shape[2], x.shape[3]
    Hm, Wm = c3.shape[2], c3.shape[3]
    y0, y1, wy0, wy1 = bilinear_index_weights(H, Hm)
    x0, x1, wx0, wx1 = bilinear_index_weights(W, Wm)
    g = lambda r, c: c3[:, :, r, :][:, :, :, c]
    wy0 = jnp.asarray(wy0)[None, None, :, None]
    wy1 = jnp.asarray(wy1)[None, None, :, None]
    wx0 = jnp.asarray(wx0)[None, None, None, :]
    wx1 = jnp.asarray(wx1)[None, None, None, :]
    c3u = (g(y0, x0) * wy0 * wx0 + g(y0, x1) * wy0 * wx1
           + g(y1, x0) * wy1 * wx0 + g(y1, x1) * wy1 * wx1)

    cf = conv(c1_, params["esa_conv_f_w"], params["esa_conv_f_b"])
    c4 = conv(c3u + cf, params["esa_conv4_w"], params["esa_conv4_b"])
    return z * jax.nn.sigmoid(c4)


# ----------------------------------------------------------------------------
# Deterministic parameter init (PyTorch-default-style uniform bounds)
# ----------------------------------------------------------------------------
def init_conv(key, out_c, in_c, kh, kw):
    k1, k2 = jax.random.split(key)
    fan_in = in_c * kh * kw
    bound = 1.0 / np.sqrt(fan_in)
    w = jax.random.uniform(k1, (out_c, in_c, kh, kw), jnp.float32, -bound, bound)
    b = jax.random.uniform(k2, (out_c,), jnp.float32, -bound, bound)
    return w, b


if __name__ == "__main__":
    key = jax.random.PRNGKey(0)
    kx, kp = jax.random.split(key)

    N, Cin, H, W = 2, 4, 16, 16            # RLFB: mid = out = in channels
    mid, Cout, f = Cin, Cin, 16

    x = jax.random.normal(kx, (N, Cin, H, W), jnp.float32)

    pkeys = jax.random.split(kp, 8)
    params = {}
    params["conv1_r_w"], params["conv1_r_b"] = init_conv(pkeys[0], mid, Cin, 3, 3)
    params["conv2_r_w"], params["conv2_r_b"] = init_conv(pkeys[1], mid, mid, 3, 3)
    params["c5_w"], params["c5_b"] = init_conv(pkeys[2], Cout, Cin, 1, 1)
    params["esa_conv1_w"], params["esa_conv1_b"] = init_conv(pkeys[3], f, Cout, 1, 1)
    params["esa_conv_f_w"], params["esa_conv_f_b"] = init_conv(pkeys[4], f, f, 1, 1)
    params["esa_conv2_w"], params["esa_conv2_b"] = init_conv(pkeys[5], f, f, 3, 3)
    params["esa_conv3_w"], params["esa_conv3_b"] = init_conv(pkeys[6], f, f, 3, 3)
    params["esa_conv4_w"], params["esa_conv4_b"] = init_conv(pkeys[7], Cout, f, 1, 1)
    # NOTE: RLFB.conv_out is defined in __init__ but never used in forward -> omitted.

    packed = pack_params(params)           # weight packing done once, outside forward
    geom = build_geometry(H, W)            # selection / upsample matrices, once

    fwd = jax.jit(lambda xx: rlfb_forward_pallas(xx, packed, geom))
    out = jax.block_until_ready(fwd(x))

    ref = jax.block_until_ready(rlfb_reference(x, params))
    assert out.shape == (N, Cout, H, W)
    np.testing.assert_allclose(np.asarray(out), np.asarray(ref),
                               rtol=2e-3, atol=2e-3)

    print("KERNEL_OK")
</pallas_src>

<mosaic_0001>
module attributes {stable_mosaic.version = 11 : i64} {
  func.func @_rlfb_kernel(%arg0: i32, %arg1: memref<1x4x324xf32, #tpu.memory_space<vmem>>, %arg2: memref<1x324xf32, #tpu.memory_space<vmem>>, %arg3: memref<324x256xf32, #tpu.memory_space<vmem>>, %arg4: memref<256x49xf32, #tpu.memory_space<vmem>>, %arg5: memref<49x9xf32, #tpu.memory_space<vmem>>, %arg6: memref<9x256xf32, #tpu.memory_space<vmem>>, %arg7: memref<9x4x4xf32, #tpu.memory_space<vmem>>, %arg8: memref<4x1xf32, #tpu.memory_space<vmem>>, %arg9: memref<9x4x4xf32, #tpu.memory_space<vmem>>, %arg10: memref<4x1xf32, #tpu.memory_space<vmem>>, %arg11: memref<4x4xf32, #tpu.memory_space<vmem>>, %arg12: memref<4x1xf32, #tpu.memory_space<vmem>>, %arg13: memref<16x4xf32, #tpu.memory_space<vmem>>, %arg14: memref<16x1xf32, #tpu.memory_space<vmem>>, %arg15: memref<9x16x16xf32, #tpu.memory_space<vmem>>, %arg16: memref<16x1xf32, #tpu.memory_space<vmem>>, %arg17: memref<9x16x16xf32, #tpu.memory_space<vmem>>, %arg18: memref<16x1xf32, #tpu.memory_space<vmem>>, %arg19: memref<16x16xf32, #tpu.memory_space<vmem>>, %arg20: memref<16x1xf32, #tpu.memory_space<vmem>>, %arg21: memref<4x16xf32, #tpu.memory_space<vmem>>, %arg22: memref<4x1xf32, #tpu.memory_space<vmem>>, %arg23: memref<1x4x256xf32, #tpu.memory_space<vmem>>, %arg24: memref<16x580xf32, #tpu.memory_space<vmem>>) attributes {dimension_semantics = [#tpu.dimension_semantics<parallel>], iteration_bounds = array<i64: 2>, scalar_prefetch = 0 : i64, scratch_operands = 1 : i64, tpu.core_type = #tpu.core_type<tc>, window_params = [{transform_indices = @transform_0, window_bounds = array<i64: 1, 4, 324>}, {pipeline_mode = #tpu.pipeline_mode<synchronous>, transform_indices = @transform_1, window_bounds = array<i64: 1, 324>}, {pipeline_mode = #tpu.pipeline_mode<synchronous>, transform_indices = @transform_2, window_bounds = array<i64: 324, 256>}, {pipeline_mode = #tpu.pipeline_mode<synchronous>, transform_indices = @transform_3, window_bounds = array<i64: 256, 49>}, {pipeline_mode = #tpu.pipeline_mode<synchronous>, transform_indices = @transform_4, window_bounds = array<i64: 49, 9>}, {pipeline_mode = #tpu.pipeline_mode<synchronous>, transform_indices = @transform_5, window_bounds = array<i64: 9, 256>}, {pipeline_mode = #tpu.pipeline_mode<synchronous>, transform_indices = @transform_6, window_bounds = array<i64: 9, 4, 4>}, {pipeline_mode = #tpu.pipeline_mode<synchronous>, transform_indices = @transform_7, window_bounds = array<i64: 4, 1>}, {pipeline_mode = #tpu.pipeline_mode<synchronous>, transform_indices = @transform_8, window_bounds = array<i64: 9, 4, 4>}, {pipeline_mode = #tpu.pipeline_mode<synchronous>, transform_indices = @transform_9, window_bounds = array<i64: 4, 1>}, {pipeline_mode = #tpu.pipeline_mode<synchronous>, transform_indices = @transform_10, window_bounds = array<i64: 4, 4>}, {pipeline_mode = #tpu.pipeline_mode<synchronous>, transform_indices = @transform_11, window_bounds = array<i64: 4, 1>}, {pipeline_mode = #tpu.pipeline_mode<synchronous>, transform_indices = @transform_12, window_bounds = array<i64: 16, 4>}, {pipeline_mode = #tpu.pipeline_mode<synchronous>, transform_indices = @transform_13, window_bounds = array<i64: 16, 1>}, {pipeline_mode = #tpu.pipeline_mode<synchronous>, transform_indices = @transform_14, window_bounds = array<i64: 9, 16, 16>}, {pipeline_mode = #tpu.pipeline_mode<synchronous>, transform_indices = @transform_15, window_bounds = array<i64: 16, 1>}, {pipeline_mode = #tpu.pipeline_mode<synchronous>, transform_indices = @transform_16, window_bounds = array<i64: 9, 16, 16>}, {pipeline_mode = #tpu.pipeline_mode<synchronous>, transform_indices = @transform_17, window_bounds = array<i64: 16, 1>}, {pipeline_mode = #tpu.pipeline_mode<synchronous>, transform_indices = @transform_18, window_bounds = array<i64: 16, 16>}, {pipeline_mode = #tpu.pipeline_mode<synchronous>, transform_indices = @transform_19, window_bounds = array<i64: 16, 1>}, {pipeline_mode = #tpu.pipeline_mode<synchronous>, transform_indices = @transform_20, window_bounds = array<i64: 4, 16>}, {pipeline_mode = #tpu.pipeline_mode<synchronous>, transform_indices = @transform_21, window_bounds = array<i64: 4, 1>}, {transform_indices = @transform_22, window_bounds = array<i64: 1, 4, 256>}]} {
    %cst = arith.constant 0.000000e+00 : f32
    %0 = vector.broadcast %cst : f32 to vector<16x580xf32>
    %c0 = arith.constant 0 : index
    %c0_0 = arith.constant 0 : index
    %1 = vector.load %arg24[%c0, %c0_0] : memref<16x580xf32, #tpu.memory_space<vmem>>, vector<16x580xf32>
    tpu.vector_store %arg24[%c0, %c0_0], %0 {strides = array<i32>} : memref<16x580xf32, #tpu.memory_space<vmem>>, vector<16x580xf32>,
    %c0_1 = arith.constant 0 : index
    %c0_2 = arith.constant 0 : index
    %c0_3 = arith.constant 0 : index
    %2 = vector.load %arg1[%c0_1, %c0_2, %c0_3] : memref<1x4x324xf32, #tpu.memory_space<vmem>>, vector<1x4x324xf32>
    %3 = vector.shape_cast %2 : vector<1x4x324xf32> to vector<4x324xf32>
    %c0_4 = arith.constant 0 : index
    %c0_5 = arith.constant 0 : index
    %4 = vector.load %arg2[%c0_4, %c0_5] : memref<1x324xf32, #tpu.memory_space<vmem>>, vector<1x324xf32>
    %c0_6 = arith.constant 0 : index
    %c128 = arith.constant 128 : index
    %5 = vector.load %arg24[%c0_6, %c128] : memref<16x580xf32, #tpu.memory_space<vmem>>, vector<4x324xf32>
    tpu.vector_store %arg24[%c0_6, %c128], %3 {strides = array<i32>} : memref<16x580xf32, #tpu.memory_space<vmem>>, vector<4x324xf32>,
    %c0_7 = arith.constant 0 : index
    %c109 = arith.constant 109 : index
    %6 = vector.load %arg24[%c0_7, %c109] : memref<16x580xf32, #tpu.memory_space<vmem>>, vector<4x324xf32>
    %c0_8 = arith.constant 0 : index
    %c110 = arith.constant 110 : index
    %7 = vector.load %arg24[%c0_8, %c110] : memref<16x580xf32, #tpu.memory_space<vmem>>, vector<4x324xf32>
    %c0_9 = arith.constant 0 : index
    %c111 = arith.constant 111 : index
    %8 = vector.load %arg24[%c0_9, %c111] : memref<16x580xf32, #tpu.memory_space<vmem>>, vector<4x324xf32>
    %c0_10 = arith.constant 0 : index
    %c127 = arith.constant 127 : index
    %9 = vector.load %arg24[%c0_10, %c127] : memref<16x580xf32, #tpu.memory_space<vmem>>, vector<4x324xf32>
    %c0_11 = arith.constant 0 : index
    %c128_12 = arith.constant 128 : index
    %10 = vector.load %arg24[%c0_11, %c128_12] : memref<16x580xf32, #tpu.memory_space<vmem>>, vector<4x324xf32>
    %c0_13 = arith.constant 0 : index
    %c129 = arith.constant 129 : index
    %11 = vector.load %arg24[%c0_13, %c129] : memref<16x580xf32, #tpu.memory_space<vmem>>, vector<4x324xf32>
    %c0_14 = arith.constant 0 : index
    %c145 = arith.constant 145 : index
    %12 = vector.load %arg24[%c0_14, %c145] : memref<16x580xf32, #tpu.memory_space<vmem>>, vector<4x324xf32>
    %c0_15 = arith.constant 0 : index
    %c146 = arith.constant 146 : index
    %13 = vector.load %arg24[%c0_15, %c146] : memref<16x580xf32, #tpu.memory_space<vmem>>, vector<4x324xf32>
    %c0_16 = arith.constant 0 : index
    %c147 = arith.constant 147 : index
    %14 = vector.load %arg24[%c0_16, %c147] : memref<16x580xf32, #tpu.memory_space<vmem>>, vector<4x324xf32>
    %c0_17 = arith.constant 0 : index
    %c0_18 = arith.constant 0 : index
    %c0_19 = arith.constant 0 : index
    %15 = vector.load %arg7[%c0_17, %c0_18, %c0_19] : memref<9x4x4xf32, #tpu.memory_space<vmem>>, vector<1x4x4xf32>
    %16 = vector.shape_cast %15 : vector<1x4x4xf32> to vector<4x4xf32>
    %cst_20 = arith.constant dense<0.000000e+00> : vector<4x324xf32>
    %17 = tpu.matmul %16, %6, %cst_20 {dimension_numbers = #tpu.dot_dimension_numbers<[1], [0], [0], [1], [0, 0, 1, 1], [], []>} : vector<4x4xf32>, vector<4x324xf32>, vector<4x324xf32> -> vector<4x324xf32>
    %c1 = arith.constant 1 : index
    %c0_21 = arith.constant 0 : index
    %c0_22 = arith.constant 0 : index
    %18 = vector.load %arg7[%c1, %c0_21, %c0_22] : memref<9x4x4xf32, #tpu.memory_space<vmem>>, vector<1x4x4xf32>
    %19 = vector.shape_cast %18 : vector<1x4x4xf32> to vector<4x4xf32>
    %cst_23 = arith.constant dense<0.000000e+00> : vector<4x324xf32>
    %20 = tpu.matmul %19, %7, %cst_23 {dimension_numbers = #tpu.dot_dimension_numbers<[1], [0], [0], [1], [0, 0, 1, 1], [], []>} : vector<4x4xf32>, vector<4x324xf32>, vector<4x324xf32> -> vector<4x324xf32>
    %21 = arith.addf %17, %20 : vector<4x324xf32>
    %c2 = arith.constant 2 : index
    %c0_24 = arith.constant 0 : index
    %c0_25 = arith.constant 0 : index
    %22 = vector.load %arg7[%c2, %c0_24, %c0_25] : memref<9x4x4xf32, #tpu.memory_space<vmem>>, vector<1x4x4xf32>
    %23 = vector.shape_cast %22 : vector<1x4x4xf32> to vector<4x4xf32>
    %cst_26 = arith.constant dense<0.000000e+00> : vector<4x324xf32>
    %24 = tpu.matmul %23, %8, %cst_26 {dimension_numbers = #tpu.dot_dimension_numbers<[1], [0], [0], [1], [0, 0, 1, 1], [], []>} : vector<4x4xf32>, vector<4x324xf32>, vector<4x324xf32> -> vector<4x324xf32>
    %25 = arith.addf %21, %24 : vector<4x324xf32>
    %c3 = arith.constant 3 : index
    %c0_27 = arith.constant 0 : index
    %c0_28 = arith.constant 0 : index
    %26 = vector.load %arg7[%c3, %c0_27, %c0_28] : memref<9x4x4xf32, #tpu.memory_space<vmem>>, vector<1x4x4xf32>
    %27 = vector.shape_cast %26 : vector<1x4x4xf32> to vector<4x4xf32>
    %cst_29 = arith.constant dense<0.000000e+00> : vector<4x324xf32>
    %28 = tpu.matmul %27, %9, %cst_29 {dimension_numbers = #tpu.dot_dimension_numbers<[1], [0], [0], [1], [0, 0, 1, 1], [], []>} : vector<4x4xf32>, vector<4x324xf32>, vector<4x324xf32> -> vector<4x324xf32>
    %29 = arith.addf %25, %28 : vector<4x324xf32>
    %c4 = arith.constant 4 : index
    %c0_30 = arith.constant 0 : index
    %c0_31 = arith.constant 0 : index
    %30 = vector.load %arg7[%c4, %c0_30, %c0_31] : memref<9x4x4xf32, #tpu.memory_space<vmem>>, vector<1x4x4xf32>
    %31 = vector.shape_cast %30 : vector<1x4x4xf32> to vector<4x4xf32>
    %cst_32 = arith.constant dense<0.000000e+00> : vector<4x324xf32>
    %32 = tpu.matmul %31, %10, %cst_32 {dimension_numbers = #tpu.dot_dimension_numbers<[1], [0], [0], [1], [0, 0, 1, 1], [], []>} : vector<4x4xf32>, vector<4x324xf32>, vector<4x324xf32> -> vector<4x324xf32>
    %33 = arith.addf %29, %32 : vector<4x324xf32>
    %c5 = arith.constant 5 : index
    %c0_33 = arith.constant 0 : index
    %c0_34 = arith.constant 0 : index
    %34 = vector.load %arg7[%c5, %c0_33, %c0_34] : memref<9x4x4xf32, #tpu.memory_space<vmem>>, vector<1x4x4xf32>
    %35 = vector.shape_cast %34 : vector<1x4x4xf32> to vector<4x4xf32>
    %cst_35 = arith.constant dense<0.000000e+00> : vector<4x324xf32>
    %36 = tpu.matmul %35, %11, %cst_35 {dimension_numbers = #tpu.dot_dimension_numbers<[1], [0], [0], [1], [0, 0, 1, 1], [], []>} : vector<4x4xf32>, vector<4x324xf32>, vector<4x324xf32> -> vector<4x324xf32>
    %37 = arith.addf %33, %36 : vector<4x324xf32>
    %c6 = arith.constant 6 : index
    %c0_36 = arith.constant 0 : index
    %c0_37 = arith.constant 0 : index
    %38 = vector.load %arg7[%c6, %c0_36, %c0_37] : memref<9x4x4xf32, #tpu.memory_space<vmem>>, vector<1x4x4xf32>
    %39 = vector.shape_cast %38 : vector<1x4x4xf32> to vector<4x4xf32>
    %cst_38 = arith.constant dense<0.000000e+00> : vector<4x324xf32>
    %40 = tpu.matmul %39, %12, %cst_38 {dimension_numbers = #tpu.dot_dimension_numbers<[1], [0], [0], [1], [0, 0, 1, 1], [], []>} : vector<4x4xf32>, vector<4x324xf32>, vector<4x324xf32> -> vector<4x324xf32>
    %41 = arith.addf %37, %40 : vector<4x324xf32>
    %c7 = arith.constant 7 : index
    %c0_39 = arith.constant 0 : index
    %c0_40 = arith.constant 0 : index
    %42 = vector.load %arg7[%c7, %c0_39, %c0_40] : memref<9x4x4xf32, #tpu.memory_space<vmem>>, vector<1x4x4xf32>
    %43 = vector.shape_cast %42 : vector<1x4x4xf32> to vector<4x4xf32>
    %cst_41 = arith.constant dense<0.000000e+00> : vector<4x324xf32>
    %44 = tpu.matmul %43, %13, %cst_41 {dimension_numbers = #tpu.dot_dimension_numbers<[1], [0], [0], [1], [0, 0, 1, 1], [], []>} : vector<4x4xf32>, vector<4x324xf32>, vector<4x324xf32> -> vector<4x324xf32>
    %45 = arith.addf %41, %44 : vector<4x324xf32>
    %c8 = arith.constant 8 : index
    %c0_42 = arith.constant 0 : index
    %c0_43 = arith.constant 0 : index
    %46 = vector.load %arg7[%c8, %c0_42, %c0_43] : memref<9x4x4xf32, #tpu.memory_space<vmem>>, vector<1x4x4xf32>
    %47 = vector.shape_cast %46 : vector<1x4x4xf32> to vector<4x4xf32>
    %cst_44 = arith.constant dense<0.000000e+00> : vector<4x324xf32>
    %48 = tpu.matmul %47, %14, %cst_44 {dimension_numbers = #tpu.dot_dimension_numbers<[1], [0], [0], [1], [0, 0, 1, 1], [], []>} : vector<4x4xf32>, vector<4x324xf32>, vector<4x324xf32> -> vector<4x324xf32>
    %49 = arith.addf %45, %48 : vector<4x324xf32>
    %c0_45 = arith.constant 0 : index
    %c0_46 = arith.constant 0 : index
    %50 = vector.load %arg8[%c0_45, %c0_46] : memref<4x1xf32, #tpu.memory_space<vmem>>, vector<4x1xf32>
    %51 = vector.broadcast %50 : vector<4x1xf32> to vector<4x324xf32>
    %52 = arith.addf %49, %51 : vector<4x324xf32>
    %cst_47 = arith.constant 0.000000e+00 : f32
    %53 = vector.broadcast %cst_47 : f32 to vector<4x324xf32>
    %54 = arith.cmpf oge, %52, %53 : vector<4x324xf32>
    %cst_48 = arith.constant 5.000000e-02 : f32
    %55 = vector.broadcast %cst_48 : f32 to vector<4x324xf32>
    %56 = arith.mulf %55, %52 : vector<4x324xf32>
    %57 = arith.select %54, %52, %56 : vector<4x324xi1>, vector<4x324xf32>
    %58 = vector.broadcast %4 : vector<1x324xf32> to vector<4x324xf32>
    %59 = arith.mulf %57, %58 : vector<4x324xf32>
    %c0_49 = arith.constant 0 : index
    %c128_50 = arith.constant 128 : index
    %60 = vector.load %arg24[%c0_49, %c128_50] : memref<16x580xf32, #tpu.memory_space<vmem>>, vector<4x324xf32>
    tpu.vector_store %arg24[%c0_49, %c128_50], %59 {strides = array<i32>} : memref<16x580xf32, #tpu.memory_space<vmem>>, vector<4x324xf32>,
    %c0_51 = arith.constant 0 : index
    %c109_52 = arith.constant 109 : index
    %61 = vector.load %arg24[%c0_51, %c109_52] : memref<16x580xf32, #tpu.memory_space<vmem>>, vector<4x324xf32>
    %c0_53 = arith.constant 0 : index
    %c110_54 = arith.constant 110 : index
    %62 = vector.load %arg24[%c0_53, %c110_54] : memref<16x580xf32, #tpu.memory_space<vmem>>, vector<4x324xf32>
    %c0_55 = arith.constant 0 : index
    %c111_56 = arith.constant 111 : index
    %63 = vector.load %arg24[%c0_55, %c111_56] : memref<16x580xf32, #tpu.memory_space<vmem>>, vector<4x324xf32>
    %c0_57 = arith.constant 0 : index
    %c127_58 = arith.constant 127 : index
    %64 = vector.load %arg24[%c0_57, %c127_58] : memref<16x580xf32, #tpu.memory_space<vmem>>, vector<4x324xf32>
    %c0_59 = arith.constant 0 : index
    %c128_60 = arith.constant 128 : index
    %65 = vector.load %arg24[%c0_59, %c128_60] : memref<16x580xf32, #tpu.memory_space<vmem>>, vector<4x324xf32>
    %c0_61 = arith.constant 0 : index
    %c129_62 = arith.constant 129 : index
    %66 = vector.load %arg24[%c0_61, %c129_62] : memref<16x580xf32, #tpu.memory_space<vmem>>, vector<4x324xf32>
    %c0_63 = arith.constant 0 : index
    %c145_64 = arith.constant 145 : index
    %67 = vector.load %arg24[%c0_63, %c145_64] : memref<16x580xf32, #tpu.memory_space<vmem>>, vector<4x324xf32>
    %c0_65 = arith.constant 0 : index
    %c146_66 = arith.constant 146 : index
    %68 = vector.load %arg24[%c0_65, %c146_66] : memref<16x580xf32, #tpu.memory_space<vmem>>, vector<4x324xf32>
    %c0_67 = arith.constant 0 : index
    %c147_68 = arith.constant 147 : index
    %69 = vector.load %arg24[%c0_67, %c147_68] : memref<16x580xf32, #tpu.memory_space<vmem>>, vector<4x324xf32>
    %c0_69 = arith.constant 0 : index
    %c0_70 = arith.constant 0 : index
    %c0_71 = arith.constant 0 : index
    %70 = vector.load %arg9[%c0_69, %c0_70, %c0_71] : memref<9x4x4xf32, #tpu.memory_space<vmem>>, vector<1x4x4xf32>
    %71 = vector.shape_cast %70 : vector<1x4x4xf32> to vector<4x4xf32>
    %cst_72 = arith.constant dense<0.000000e+00> : vector<4x324xf32>
    %72 = tpu.matmul %71, %61, %cst_72 {dimension_numbers = #tpu.dot_dimension_numbers<[1], [0], [0], [1], [0, 0, 1, 1], [], []>} : vector<4x4xf32>, vector<4x324xf32>, vector<4x324xf32> -> vector<4x324xf32>
    %c1_73 = arith.constant 1 : index
    %c0_74 = arith.constant 0 : index
    %c0_75 = arith.constant 0 : index
    %73 = vector.load %arg9[%c1_73, %c0_74, %c0_75] : memref<9x4x4xf32, #tpu.memory_space<vmem>>, vector<1x4x4xf32>
    %74 = vector.shape_cast %73 : vector<1x4x4xf32> to vector<4x4xf32>
    %cst_76 = arith.constant dense<0.000000e+00> : vector<4x324xf32>
    %75 = tpu.matmul %74, %62, %cst_76 {dimension_numbers = #tpu.dot_dimension_numbers<[1], [0], [0], [1], [0, 0, 1, 1], [], []>} : vector<4x4xf32>, vector<4x324xf32>, vector<4x324xf32> -> vector<4x324xf32>
    %76 = arith.addf %72, %75 : vector<4x324xf32>
    %c2_77 = arith.constant 2 : index
    %c0_78 = arith.constant 0 : index
    %c0_79 = arith.constant 0 : index
    %77 = vector.load %arg9[%c2_77, %c0_78, %c0_79] : memref<9x4x4xf32, #tpu.memory_space<vmem>>, vector<1x4x4xf32>
    %78 = vector.shape_cast %77 : vector<1x4x4xf32> to vector<4x4xf32>
    %cst_80 = arith.constant dense<0.000000e+00> : vector<4x324xf32>
    %79 = tpu.matmul %78, %63, %cst_80 {dimension_numbers = #tpu.dot_dimension_numbers<[1], [0], [0], [1], [0, 0, 1, 1], [], []>} : vector<4x4xf32>, vector<4x324xf32>, vector<4x324xf32> -> vector<4x324xf32>
    %80 = arith.addf %76, %79 : vector<4x324xf32>
    %c3_81 = arith.constant 3 : index
    %c0_82 = arith.constant 0 : index
    %c0_83 = arith.constant 0 : index
    %81 = vector.load %arg9[%c3_81, %c0_82, %c0_83] : memref<9x4x4xf32, #tpu.memory_space<vmem>>, vector<1x4x4xf32>
    %82 = vector.shape_cast %81 : vector<1x4x4xf32> to vector<4x4xf32>
    %cst_84 = arith.constant dense<0.000000e+00> : vector<4x324xf32>
    %83 = tpu.matmul %82, %64, %cst_84 {dimension_numbers = #tpu.dot_dimension_numbers<[1], [0], [0], [1], [0, 0, 1, 1], [], []>} : vector<4x4xf32>, vector<4x324xf32>, vector<4x324xf32> -> vector<4x324xf32>
    %84 = arith.addf %80, %83 : vector<4x324xf32>
    %c4_85 = arith.constant 4 : index
    %c0_86 = arith.constant 0 : index
    %c0_87 = arith.constant 0 : index
    %85 = vector.load %arg9[%c4_85, %c0_86, %c0_87] : memref<9x4x4xf32, #tpu.memory_space<vmem>>, vector<1x4x4xf32>
    %86 = vector.shape_cast %85 : vector<1x4x4xf32> to vector<4x4xf32>
    %cst_88 = arith.constant dense<0.000000e+00> : vector<4x324xf32>
    %87 = tpu.matmul %86, %65, %cst_88 {dimension_numbers = #tpu.dot_dimension_numbers<[1], [0], [0], [1], [0, 0, 1, 1], [], []>} : vector<4x4xf32>, vector<4x324xf32>, vector<4x324xf32> -> vector<4x324xf32>
    %88 = arith.addf %84, %87 : vector<4x324xf32>
    %c5_89 = arith.constant 5 : index
    %c0_90 = arith.constant 0 : index
    %c0_91 = arith.constant 0 : index
    %89 = vector.load %arg9[%c5_89, %c0_90, %c0_91] : memref<9x4x4xf32, #tpu.memory_space<vmem>>, vector<1x4x4xf32>
    %90 = vector.shape_cast %89 : vector<1x4x4xf32> to vector<4x4xf32>
    %cst_92 = arith.constant dense<0.000000e+00> : vector<4x324xf32>
    %91 = tpu.matmul %90, %66, %cst_92 {dimension_numbers = #tpu.dot_dimension_numbers<[1], [0], [0], [1], [0, 0, 1, 1], [], []>} : vector<4x4xf32>, vector<4x324xf32>, vector<4x324xf32> -> vector<4x324xf32>
    %92 = arith.addf %88, %91 : vector<4x324xf32>
    %c6_93 = arith.constant 6 : index
    %c0_94 = arith.constant 0 : index
    %c0_95 = arith.constant 0 : index
    %93 = vector.load %arg9[%c6_93, %c0_94, %c0_95] : memref<9x4x4xf32, #tpu.memory_space<vmem>>, vector<1x4x4xf32>
    %94 = vector.shape_cast %93 : vector<1x4x4xf32> to vector<4x4xf32>
    %cst_96 = arith.constant dense<0.000000e+00> : vector<4x324xf32>
    %95 = tpu.matmul %94, %67, %cst_96 {dimension_numbers = #tpu.dot_dimension_numbers<[1], [0], [0], [1], [0, 0, 1, 1], [], []>} : vector<4x4xf32>, vector<4x324xf32>, vector<4x324xf32> -> vector<4x324xf32>
    %96 = arith.addf %92, %95 : vector<4x324xf32>
    %c7_97 = arith.constant 7 : index
    %c0_98 = arith.constant 0 : index
    %c0_99 = arith.constant 0 : index
    %97 = vector.load %arg9[%c7_97, %c0_98, %c0_99] : memref<9x4x4xf32, #tpu.memory_space<vmem>>, vector<1x4x4xf32>
    %98 = vector.shape_cast %97 : vector<1x4x4xf32> to vector<4x4xf32>
    %cst_100 = arith.constant dense<0.000000e+00> : vector<4x324xf32>
    %99 = tpu.matmul %98, %68, %cst_100 {dimension_numbers = #tpu.dot_dimension_numbers<[1], [0], [0], [1], [0, 0, 1, 1], [], []>} : vector<4x4xf32>, vector<4x324xf32>, vector<4x324xf32> -> vector<4x324xf32>
    %100 = arith.addf %96, %99 : vector<4x324xf32>
    %c8_101 = arith.constant 8 : index
    %c0_102 = arith.constant 0 : index
    %c0_103 = arith.constant 0 : index
    %101 = vector.load %arg9[%c8_101, %c0_102, %c0_103] : memref<9x4x4xf32, #tpu.memory_space<vmem>>, vector<1x4x4xf32>
    %102 = vector.shape_cast %101 : vector<1x4x4xf32> to vector<4x4xf32>
    %cst_104 = arith.constant dense<0.000000e+00> : vector<4x324xf32>
    %103 = tpu.matmul %102, %69, %cst_104 {dimension_numbers = #tpu.dot_dimension_numbers<[1], [0], [0], [1], [0, 0, 1, 1], [], []>} : vector<4x4xf32>, vector<4x324xf32>, vector<4x324xf32> -> vector<4x324xf32>
    %104 = arith.addf %100, %103 : vector<4x324xf32>
    %c0_105 = arith.constant 0 : index
    %c0_106 = arith.constant 0 : index
    %105 = vector.load %arg10[%c0_105, %c0_106] : memref<4x1xf32, #tpu.memory_space<vmem>>, vector<4x1xf32>
    %106 = vector.broadcast %105 : vector<4x1xf32> to vector<4x324xf32>
    %107 = arith.addf %104, %106 : vector<4x324xf32>
    %cst_107 = arith.constant 0.000000e+00 : f32
    %108 = vector.broadcast %cst_107 : f32 to vector<4x324xf32>
    %109 = arith.cmpf oge, %107, %108 : vector<4x324xf32>
    %cst_108 = arith.constant 5.000000e-02 : f32
    %110 = vector.broadcast %cst_108 : f32 to vector<4x324xf32>
    %111 = arith.mulf %110, %107 : vector<4x324xf32>
    %112 = arith.select %109, %107, %111 : vector<4x324xi1>, vector<4x324xf32>
    %113 = arith.addf %112, %3 : vector<4x324xf32>
    %114 = arith.addf %113, %59 : vector<4x324xf32>
    %c0_109 = arith.constant 0 : index
    %c0_110 = arith.constant 0 : index
    %115 = vector.load %arg3[%c0_109, %c0_110] : memref<324x256xf32, #tpu.memory_space<vmem>>, vector<324x256xf32>
    %cst_111 = arith.constant dense<0.000000e+00> : vector<4x256xf32>
    %116 = tpu.matmul %114, %115, %cst_111 {dimension_numbers = #tpu.dot_dimension_numbers<[1], [0], [0], [1], [0, 0, 1, 1], [], []>} : vector<4x324xf32>, vector<324x256xf32>, vector<4x256xf32> -> vector<4x256xf32>
    %c0_112 = arith.constant 0 : index
    %c0_113 = arith.constant 0 : index
    %117 = vector.load %arg11[%c0_112, %c0_113] : memref<4x4xf32, #tpu.memory_space<vmem>>, vector<4x4xf32>
    %cst_114 = arith.constant dense<0.000000e+00> : vector<4x256xf32>
    %118 = tpu.matmul %117, %116, %cst_114 {dimension_numbers = #tpu.dot_dimension_numbers<[1], [0], [0], [1], [0, 0, 1, 1], [], []>} : vector<4x4xf32>, vector<4x256xf32>, vector<4x256xf32> -> vector<4x256xf32>
    %c0_115 = arith.constant 0 : index
    %c0_116 = arith.constant 0 : index
    %119 = vector.load %arg12[%c0_115, %c0_116] : memref<4x1xf32, #tpu.memory_space<vmem>>, vector<4x1xf32>
    %120 = vector.broadcast %119 : vector<4x1xf32> to vector<4x256xf32>
    %121 = arith.addf %118, %120 : vector<4x256xf32>
    %c0_117 = arith.constant 0 : index
    %c0_118 = arith.constant 0 : index
    %122 = vector.load %arg13[%c0_117, %c0_118] : memref<16x4xf32, #tpu.memory_space<vmem>>, vector<16x4xf32>
    %cst_119 = arith.constant dense<0.000000e+00> : vector<16x256xf32>
    %123 = tpu.matmul %122, %121, %cst_119 {dimension_numbers = #tpu.dot_dimension_numbers<[1], [0], [0], [1], [0, 0, 1, 1], [], []>} : vector<16x4xf32>, vector<4x256xf32>, vector<16x256xf32> -> vector<16x256xf32>
    %c0_120 = arith.constant 0 : index
    %c0_121 = arith.constant 0 : index
    %124 = vector.load %arg14[%c0_120, %c0_121] : memref<16x1xf32, #tpu.memory_space<vmem>>, vector<16x1xf32>
    %125 = vector.broadcast %124 : vector<16x1xf32> to vector<16x256xf32>
    %126 = arith.addf %123, %125 : vector<16x256xf32>
    %c0_122 = arith.constant 0 : index
    %c128_123 = arith.constant 128 : index
    %127 = vector.load %arg24[%c0_122, %c128_123] : memref<16x580xf32, #tpu.memory_space<vmem>>, vector<16x256xf32>
    tpu.vector_store %arg24[%c0_122, %c128_123], %126 {strides = array<i32>} : memref<16x580xf32, #tpu.memory_space<vmem>>, vector<16x256xf32>,
    %c0_124 = arith.constant 0 : index
    %c111_125 = arith.constant 111 : index
    %128 = vector.load %arg24[%c0_124, %c111_125] : memref<16x580xf32, #tpu.memory_space<vmem>>, vector<16x256xf32>
    %c0_126 = arith.constant 0 : index
    %c112 = arith.constant 112 : index
    %129 = vector.load %arg24[%c0_126, %c112] : memref<16x580xf32, #tpu.memory_space<vmem>>, vector<16x256xf32>
    %c0_127 = arith.constant 0 : index
    %c113 = arith.constant 113 : index
    %130 = vector.load %arg24[%c0_127, %c113] : memref<16x580xf32, #tpu.memory_space<vmem>>, vector<16x256xf32>
    %c0_128 = arith.constant 0 : index
    %c127_129 = arith.constant 127 : index
    %131 = vector.load %arg24[%c0_128, %c127_129] : memref<16x580xf32, #tpu.memory_space<vmem>>, vector<16x256xf32>
    %c0_130 = arith.constant 0 : index
    %c128_131 = arith.constant 128 : index
    %132 = vector.load %arg24[%c0_130, %c128_131] : memref<16x580xf32, #tpu.memory_space<vmem>>, vector<16x256xf32>
    %c0_132 = arith.constant 0 : index
    %c129_133 = arith.constant 129 : index
    %133 = vector.load %arg24[%c0_132, %c129_133] : memref<16x580xf32, #tpu.memory_space<vmem>>, vector<16x256xf32>
    %c0_134 = arith.constant 0 : index
    %c143 = arith.constant 143 : index
    %134 = vector.load %arg24[%c0_134, %c143] : memref<16x580xf32, #tpu.memory_space<vmem>>, vector<16x256xf32>
    %c0_135 = arith.constant 0 : index
    %c144 = arith.constant 144 : index
    %135 = vector.load %arg24[%c0_135, %c144] : memref<16x580xf32, #tpu.memory_space<vmem>>, vector<16x256xf32>
    %c0_136 = arith.constant 0 : index
    %c145_137 = arith.constant 145 : index
    %136 = vector.load %arg24[%c0_136, %c145_137] : memref<16x580xf32, #tpu.memory_space<vmem>>, vector<16x256xf32>
    %c0_138 = arith.constant 0 : index
    %c0_139 = arith.constant 0 : index
    %c0_140 = arith.constant 0 : index
    %137 = vector.load %arg15[%c0_138, %c0_139, %c0_140] : memref<9x16x16xf32, #tpu.memory_space<vmem>>, vector<1x16x16xf32>
    %138 = vector.shape_cast %137 : vector<1x16x16xf32> to vector<16x16xf32>
    %cst_141 = arith.constant dense<0.000000e+00> : vector<16x256xf32>
    %139 = tpu.matmul %138, %128, %cst_141 {dimension_numbers = #tpu.dot_dimension_numbers<[1], [0], [0], [1], [0, 0, 1, 1], [], []>} : vector<16x16xf32>, vector<16x256xf32>, vector<16x256xf32> -> vector<16x256xf32>
    %c1_142 = arith.constant 1 : index
    %c0_143 = arith.constant 0 : index
    %c0_144 = arith.constant 0 : index
    %140 = vector.load %arg15[%c1_142, %c0_143, %c0_144] : memref<9x16x16xf32, #tpu.memory_space<vmem>>, vector<1x16x16xf32>
    %141 = vector.shape_cast %140 : vector<1x16x16xf32> to vector<16x16xf32>
    %cst_145 = arith.constant dense<0.000000e+00> : vector<16x256xf32>
    %142 = tpu.matmul %141, %129, %cst_145 {dimension_numbers = #tpu.dot_dimension_numbers<[1], [0], [0], [1], [0, 0, 1, 1], [], []>} : vector<16x16xf32>, vector<16x256xf32>, vector<16x256xf32> -> vector<16x256xf32>
    %143 = arith.addf %139, %142 : vector<16x256xf32>
    %c2_146 = arith.constant 2 : index
    %c0_147 = arith.constant 0 : index
    %c0_148 = arith.constant 0 : index
    %144 = vector.load %arg15[%c2_146, %c0_147, %c0_148] : memref<9x16x16xf32, #tpu.memory_space<vmem>>, vector<1x16x16xf32>
    %145 = vector.shape_cast %144 : vector<1x16x16xf32> to vector<16x16xf32>
    %cst_149 = arith.constant dense<0.000000e+00> : vector<16x256xf32>
    %146 = tpu.matmul %145, %130, %cst_149 {dimension_numbers = #tpu.dot_dimension_numbers<[1], [0], [0], [1], [0, 0, 1, 1], [], []>} : vector<16x16xf32>, vector<16x256xf32>, vector<16x256xf32> -> vector<16x256xf32>
    %147 = arith.addf %143, %146 : vector<16x256xf32>
    %c3_150 = arith.constant 3 : index
    %c0_151 = arith.constant 0 : index
    %c0_152 = arith.constant 0 : index
    %148 = vector.load %arg15[%c3_150, %c0_151, %c0_152] : memref<9x16x16xf32, #tpu.memory_space<vmem>>, vector<1x16x16xf32>
    %149 = vector.shape_cast %148 : vector<1x16x16xf32> to vector<16x16xf32>
    %cst_153 = arith.constant dense<0.000000e+00> : vector<16x256xf32>
    %150 = tpu.matmul %149, %131, %cst_153 {dimension_numbers = #tpu.dot_dimension_numbers<[1], [0], [0], [1], [0, 0, 1, 1], [], []>} : vector<16x16xf32>, vector<16x256xf32>, vector<16x256xf32> -> vector<16x256xf32>
    %151 = arith.addf %147, %150 : vector<16x256xf32>
    %c4_154 = arith.constant 4 : index
    %c0_155 = arith.constant 0 : index
    %c0_156 = arith.constant 0 : index
    %152 = vector.load %arg15[%c4_154, %c0_155, %c0_156] : memref<9x16x16xf32, #tpu.memory_space<vmem>>, vector<1x16x16xf32>
    %153 = vector.shape_cast %152 : vector<1x16x16xf32> to vector<16x16xf32>
    %cst_157 = arith.constant dense<0.000000e+00> : vector<16x256xf32>
    %154 = tpu.matmul %153, %132, %cst_157 {dimension_numbers = #tpu.dot_dimension_numbers<[1], [0], [0], [1], [0, 0, 1, 1], [], []>} : vector<16x16xf32>, vector<16x256xf32>, vector<16x256xf32> -> vector<16x256xf32>
    %155 = arith.addf %151, %154 : vector<16x256xf32>
    %c5_158 = arith.constant 5 : index
    %c0_159 = arith.constant 0 : index
    %c0_160 = arith.constant 0 : index
    %156 = vector.load %arg15[%c5_158, %c0_159, %c0_160] : memref<9x16x16xf32, #tpu.memory_space<vmem>>, vector<1x16x16xf32>
    %157 = vector.shape_cast %156 : vector<1x16x16xf32> to vector<16x16xf32>
    %cst_161 = arith.constant dense<0.000000e+00> : vector<16x256xf32>
    %158 = tpu.matmul %157, %133, %cst_161 {dimension_numbers = #tpu.dot_dimension_numbers<[1], [0], [0], [1], [0, 0, 1, 1], [], []>} : vector<16x16xf32>, vector<16x256xf32>, vector<16x256xf32> -> vector<16x256xf32>
    %159 = arith.addf %155, %158 : vector<16x256xf32>
    %c6_162 = arith.constant 6 : index
    %c0_163 = arith.constant 0 : index
    %c0_164 = arith.constant 0 : index
    %160 = vector.load %arg15[%c6_162, %c0_163, %c0_164] : memref<9x16x16xf32, #tpu.memory_space<vmem>>, vector<1x16x16xf32>
    %161 = vector.shape_cast %160 : vector<1x16x16xf32> to vector<16x16xf32>
    %cst_165 = arith.constant dense<0.000000e+00> : vector<16x256xf32>
    %162 = tpu.matmul %161, %134, %cst_165 {dimension_numbers = #tpu.dot_dimension_numbers<[1], [0], [0], [1], [0, 0, 1, 1], [], []>} : vector<16x16xf32>, vector<16x256xf32>, vector<16x256xf32> -> vector<16x256xf32>
    %163 = arith.addf %159, %162 : vector<16x256xf32>
    %c7_166 = arith.constant 7 : index
    %c0_167 = arith.constant 0 : index
    %c0_168 = arith.constant 0 : index
    %164 = vector.load %arg15[%c7_166, %c0_167, %c0_168] : memref<9x16x16xf32, #tpu.memory_space<vmem>>, vector<1x16x16xf32>
    %165 = vector.shape_cast %164 : vector<1x16x16xf32> to vector<16x16xf32>
    %cst_169 = arith.constant dense<0.000000e+00> : vector<16x256xf32>
    %166 = tpu.matmul %165, %135, %cst_169 {dimension_numbers = #tpu.dot_dimension_numbers<[1], [0], [0], [1], [0, 0, 1, 1], [], []>} : vector<16x16xf32>, vector<16x256xf32>, vector<16x256xf32> -> vector<16x256xf32>
    %167 = arith.addf %163, %166 : vector<16x256xf32>
    %c8_170 = arith.constant 8 : index
    %c0_171 = arith.constant 0 : index
    %c0_172 = arith.constant 0 : index
    %168 = vector.load %arg15[%c8_170, %c0_171, %c0_172] : memref<9x16x16xf32, #tpu.memory_space<vmem>>, vector<1x16x16xf32>
    %169 = vector.shape_cast %168 : vector<1x16x16xf32> to vector<16x16xf32>
    %cst_173 = arith.constant dense<0.000000e+00> : vector<16x256xf32>
    %170 = tpu.matmul %169, %136, %cst_173 {dimension_numbers = #tpu.dot_dimension_numbers<[1], [0], [0], [1], [0, 0, 1, 1], [], []>} : vector<16x16xf32>, vector<16x256xf32>, vector<16x256xf32> -> vector<16x256xf32>
    %171 = arith.addf %167, %170 : vector<16x256xf32>
    %c0_174 = arith.constant 0 : index
    %c0_175 = arith.constant 0 : index
    %172 = vector.load %arg16[%c0_174, %c0_175] : memref<16x1xf32, #tpu.memory_space<vmem>>, vector<16x1xf32>
    %173 = vector.broadcast %172 : vector<16x1xf32> to vector<16x256xf32>
    %174 = arith.addf %171, %173 : vector<16x256xf32>
    %c0_176 = arith.constant 0 : index
    %c0_177 = arith.constant 0 : index
    %175 = vector.load %arg4[%c0_176, %c0_177] : memref<256x49xf32, #tpu.memory_space<vmem>>, vector<256x49xf32>
    %cst_178 = arith.constant dense<0.000000e+00> : vector<16x49xf32>
    %176 = tpu.matmul %174, %175, %cst_178 {dimension_numbers = #tpu.dot_dimension_numbers<[1], [0], [0], [1], [0, 0, 1, 1], [], []>} : vector<16x256xf32>, vector<256x49xf32>, vector<16x49xf32> -> vector<16x49xf32>
    %c0_179 = arith.constant 0 : index
    %c128_180 = arith.constant 128 : index
    %177 = vector.load %arg24[%c0_179, %c128_180] : memref<16x580xf32, #tpu.memory_space<vmem>>, vector<16x49xf32>
    tpu.vector_store %arg24[%c0_179, %c128_180], %176 {strides = array<i32>} : memref<16x580xf32, #tpu.memory_space<vmem>>, vector<16x49xf32>,
    %c0_181 = arith.constant 0 : index
    %c129_182 = arith.constant 129 : index
    %178 = vector.load %arg24[%c0_181, %c129_182] : memref<16x580xf32, #tpu.memory_space<vmem>>, vector<16x49xf32>
    %c0_183 = arith.constant 0 : index
    %c130 = arith.constant 130 : index
    %179 = vector.load %arg24[%c0_183, %c130] : memref<16x580xf32, #tpu.memory_space<vmem>>, vector<16x49xf32>
    %c0_184 = arith.constant 0 : index
    %c131 = arith.constant 131 : index
    %180 = vector.load %arg24[%c0_184, %c131] : memref<16x580xf32, #tpu.memory_space<vmem>>, vector<16x49xf32>
    %c0_185 = arith.constant 0 : index
    %c132 = arith.constant 132 : index
    %181 = vector.load %arg24[%c0_185, %c132] : memref<16x580xf32, #tpu.memory_space<vmem>>, vector<16x49xf32>
    %c0_186 = arith.constant 0 : index
    %c133 = arith.constant 133 : index
    %182 = vector.load %arg24[%c0_186, %c133] : memref<16x580xf32, #tpu.memory_space<vmem>>, vector<16x49xf32>
    %c0_187 = arith.constant 0 : index
    %c134 = arith.constant 134 : index
    %183 = vector.load %arg24[%c0_187, %c134] : memref<16x580xf32, #tpu.memory_space<vmem>>, vector<16x49xf32>
    %184 = arith.maximumf %176, %178 : vector<16x49xf32>
    %185 = arith.maximumf %184, %179 : vector<16x49xf32>
    %186 = arith.maximumf %185, %180 : vector<16x49xf32>
    %187 = arith.maximumf %186, %181 : vector<16x49xf32>
    %188 = arith.maximumf %187, %182 : vector<16x49xf32>
    %189 = arith.maximumf %188, %183 : vector<16x49xf32>
    %c0_188 = arith.constant 0 : index
    %c128_189 = arith.constant 128 : index
    %190 = vector.load %arg24[%c0_188, %c128_189] : memref<16x580xf32, #tpu.memory_space<vmem>>, vector<16x49xf32>
    tpu.vector_store %arg24[%c0_188, %c128_189], %189 {strides = array<i32>} : memref<16x580xf32, #tpu.memory_space<vmem>>, vector<16x49xf32>,
    %c0_190 = arith.constant 0 : index
    %c135 = arith.constant 135 : index
    %191 = vector.load %arg24[%c0_190, %c135] : memref<16x580xf32, #tpu.memory_space<vmem>>, vector<16x49xf32>
    %c0_191 = arith.constant 0 : index
    %c142 = arith.constant 142 : index
    %192 = vector.load %arg24[%c0_191, %c142] : memref<16x580xf32, #tpu.memory_space<vmem>>, vector<16x49xf32>
    %c0_192 = arith.constant 0 : index
    %c149 = arith.constant 149 : index
    %193 = vector.load %arg24[%c0_192, %c149] : memref<16x580xf32, #tpu.memory_space<vmem>>, vector<16x49xf32>
    %c0_193 = arith.constant 0 : index
    %c156 = arith.constant 156 : index
    %194 = vector.load %arg24[%c0_193, %c156] : memref<16x580xf32, #tpu.memory_space<vmem>>, vector<16x49xf32>
    %c0_194 = arith.constant 0 : index
    %c163 = arith.constant 163 : index
    %195 = vector.load %arg24[%c0_194, %c163] : memref<16x580xf32, #tpu.memory_space<vmem>>, vector<16x49xf32>
    %c0_195 = arith.constant 0 : index
    %c170 = arith.constant 170 : index
    %196 = vector.load %arg24[%c0_195, %c170] : memref<16x580xf32, #tpu.memory_space<vmem>>, vector<16x49xf32>
    %197 = arith.maximumf %189, %191 : vector<16x49xf32>
    %198 = arith.maximumf %197, %192 : vector<16x49xf32>
    %199 = arith.maximumf %198, %193 : vector<16x49xf32>
    %200 = arith.maximumf %199, %194 : vector<16x49xf32>
    %201 = arith.maximumf %200, %195 : vector<16x49xf32>
    %202 = arith.maximumf %201, %196 : vector<16x49xf32>
    %c0_196 = arith.constant 0 : index
    %c0_197 = arith.constant 0 : index
    %203 = vector.load %arg5[%c0_196, %c0_197] : memref<49x9xf32, #tpu.memory_space<vmem>>, vector<49x9xf32>
    %cst_198 = arith.constant dense<0.000000e+00> : vector<16x9xf32>
    %204 = tpu.matmul %202, %203, %cst_198 {dimension_numbers = #tpu.dot_dimension_numbers<[1], [0], [0], [1], [0, 0, 1, 1], [], []>} : vector<16x49xf32>, vector<49x9xf32>, vector<16x9xf32> -> vector<16x9xf32>
    %c0_199 = arith.constant 0 : index
    %c128_200 = arith.constant 128 : index
    %205 = vector.load %arg24[%c0_199, %c128_200] : memref<16x580xf32, #tpu.memory_space<vmem>>, vector<16x9xf32>
    tpu.vector_store %arg24[%c0_199, %c128_200], %204 {strides = array<i32>} : memref<16x580xf32, #tpu.memory_space<vmem>>, vector<16x9xf32>,
    %c0_201 = arith.constant 0 : index
    %c124 = arith.constant 124 : index
    %206 = vector.load %arg24[%c0_201, %c124] : memref<16x580xf32, #tpu.memory_space<vmem>>, vector<16x9xf32>
    %c0_202 = arith.constant 0 : index
    %c125 = arith.constant 125 : index
    %207 = vector.load %arg24[%c0_202, %c125] : memref<16x580xf32, #tpu.memory_space<vmem>>, vector<16x9xf32>
    %c0_203 = arith.constant 0 : index
    %c126 = arith.constant 126 : index
    %208 = vector.load %arg24[%c0_203, %c126] : memref<16x580xf32, #tpu.memory_space<vmem>>, vector<16x9xf32>
    %c0_204 = arith.constant 0 : index
    %c127_205 = arith.constant 127 : index
    %209 = vector.load %arg24[%c0_204, %c127_205] : memref<16x580xf32, #tpu.memory_space<vmem>>, vector<16x9xf32>
    %c0_206 = arith.constant 0 : index
    %c128_207 = arith.constant 128 : index
    %210 = vector.load %arg24[%c0_206, %c128_207] : memref<16x580xf32, #tpu.memory_space<vmem>>, vector<16x9xf32>
    %c0_208 = arith.constant 0 : index
    %c129_209 = arith.constant 129 : index
    %211 = vector.load %arg24[%c0_208, %c129_209] : memref<16x580xf32, #tpu.memory_space<vmem>>, vector<16x9xf32>
    %c0_210 = arith.constant 0 : index
    %c130_211 = arith.constant 130 : index
    %212 = vector.load %arg24[%c0_210, %c130_211] : memref<16x580xf32, #tpu.memory_space<vmem>>, vector<16x9xf32>
    %c0_212 = arith.constant 0 : index
    %c131_213 = arith.constant 131 : index
    %213 = vector.load %arg24[%c0_212, %c131_213] : memref<16x580xf32, #tpu.memory_space<vmem>>, vector<16x9xf32>
    %c0_214 = arith.constant 0 : index
    %c132_215 = arith.constant 132 : index
    %214 = vector.load %arg24[%c0_214, %c132_215] : memref<16x580xf32, #tpu.memory_space<vmem>>, vector<16x9xf32>
    %c0_216 = arith.constant 0 : index
    %c0_217 = arith.constant 0 : index
    %c0_218 = arith.constant 0 : index
    %215 = vector.load %arg17[%c0_216, %c0_217, %c0_218] : memref<9x16x16xf32, #tpu.memory_space<vmem>>, vector<1x16x16xf32>
    %216 = vector.shape_cast %215 : vector<1x16x16xf32> to vector<16x16xf32>
    %cst_219 = arith.constant dense<0.000000e+00> : vector<16x9xf32>
    %217 = tpu.matmul %216, %206, %cst_219 {dimension_numbers = #tpu.dot_dimension_numbers<[1], [0], [0], [1], [0, 0, 1, 1], [], []>} : vector<16x16xf32>, vector<16x9xf32>, vector<16x9xf32> -> vector<16x9xf32>
    %c1_220 = arith.constant 1 : index
    %c0_221 = arith.constant 0 : index
    %c0_222 = arith.constant 0 : index
    %218 = vector.load %arg17[%c1_220, %c0_221, %c0_222] : memref<9x16x16xf32, #tpu.memory_space<vmem>>, vector<1x16x16xf32>
    %219 = vector.shape_cast %218 : vector<1x16x16xf32> to vector<16x16xf32>
    %cst_223 = arith.constant dense<0.000000e+00> : vector<16x9xf32>
    %220 = tpu.matmul %219, %207, %cst_223 {dimension_numbers = #tpu.dot_dimension_numbers<[1], [0], [0], [1], [0, 0, 1, 1], [], []>} : vector<16x16xf32>, vector<16x9xf32>, vector<16x9xf32> -> vector<16x9xf32>
    %221 = arith.addf %217, %220 : vector<16x9xf32>
    %c2_224 = arith.constant 2 : index
    %c0_225 = arith.constant 0 : index
    %c0_226 = arith.constant 0 : index
    %222 = vector.load %arg17[%c2_224, %c0_225, %c0_226] : memref<9x16x16xf32, #tpu.memory_space<vmem>>, vector<1x16x16xf32>
    %223 = vector.shape_cast %222 : vector<1x16x16xf32> to vector<16x16xf32>
    %cst_227 = arith.constant dense<0.000000e+00> : vector<16x9xf32>
    %224 = tpu.matmul %223, %208, %cst_227 {dimension_numbers = #tpu.dot_dimension_numbers<[1], [0], [0], [1], [0, 0, 1, 1], [], []>} : vector<16x16xf32>, vector<16x9xf32>, vector<16x9xf32> -> vector<16x9xf32>
    %225 = arith.addf %221, %224 : vector<16x9xf32>
    %c3_228 = arith.constant 3 : index
    %c0_229 = arith.constant 0 : index
    %c0_230 = arith.constant 0 : index
    %226 = vector.load %arg17[%c3_228, %c0_229, %c0_230] : memref<9x16x16xf32, #tpu.memory_space<vmem>>, vector<1x16x16xf32>
    %227 = vector.shape_cast %226 : vector<1x16x16xf32> to vector<16x16xf32>
    %cst_231 = arith.constant dense<0.000000e+00> : vector<16x9xf32>
    %228 = tpu.matmul %227, %209, %cst_231 {dimension_numbers = #tpu.dot_dimension_numbers<[1], [0], [0], [1], [0, 0, 1, 1], [], []>} : vector<16x16xf32>, vector<16x9xf32>, vector<16x9xf32> -> vector<16x9xf32>
    %229 = arith.addf %225, %228 : vector<16x9xf32>
    %c4_232 = arith.constant 4 : index
    %c0_233 = arith.constant 0 : index
    %c0_234 = arith.constant 0 : index
    %230 = vector.load %arg17[%c4_232, %c0_233, %c0_234] : memref<9x16x16xf32, #tpu.memory_space<vmem>>, vector<1x16x16xf32>
    %231 = vector.shape_cast %230 : vector<1x16x16xf32> to vector<16x16xf32>
    %cst_235 = arith.constant dense<0.000000e+00> : vector<16x9xf32>
    %232 = tpu.matmul %231, %210, %cst_235 {dimension_numbers = #tpu.dot_dimension_numbers<[1], [0], [0], [1], [0, 0, 1, 1], [], []>} : vector<16x16xf32>, vector<16x9xf32>, vector<16x9xf32> -> vector<16x9xf32>
    %233 = arith.addf %229, %232 : vector<16x9xf32>
    %c5_236 = arith.constant 5 : index
    %c0_237 = arith.constant 0 : index
    %c0_238 = arith.constant 0 : index
    %234 = vector.load %arg17[%c5_236, %c0_237, %c0_238] : memref<9x16x16xf32, #tpu.memory_space<vmem>>, vector<1x16x16xf32>
    %235 = vector.shape_cast %234 : vector<1x16x16xf32> to vector<16x16xf32>
    %cst_239 = arith.constant dense<0.000000e+00> : vector<16x9xf32>
    %236 = tpu.matmul %235, %211, %cst_239 {dimension_numbers = #tpu.dot_dimension_numbers<[1], [0], [0], [1], [0, 0, 1, 1], [], []>} : vector<16x16xf32>, vector<16x9xf32>, vector<16x9xf32> -> vector<16x9xf32>
    %237 = arith.addf %233, %236 : vector<16x9xf32>
    %c6_240 = arith.constant 6 : index
    %c0_241 = arith.constant 0 : index
    %c0_242 = arith.constant 0 : index
    %238 = vector.load %arg17[%c6_240, %c0_241, %c0_242] : memref<9x16x16xf32, #tpu.memory_space<vmem>>, vector<1x16x16xf32>
    %239 = vector.shape_cast %238 : vector<1x16x16xf32> to vector<16x16xf32>
    %cst_243 = arith.constant dense<0.000000e+00> : vector<16x9xf32>
    %240 = tpu.matmul %239, %212, %cst_243 {dimension_numbers = #tpu.dot_dimension_numbers<[1], [0], [0], [1], [0, 0, 1, 1], [], []>} : vector<16x16xf32>, vector<16x9xf32>, vector<16x9xf32> -> vector<16x9xf32>
    %241 = arith.addf %237, %240 : vector<16x9xf32>
    %c7_244 = arith.constant 7 : index
    %c0_245 = arith.constant 0 : index
    %c0_246 = arith.constant 0 : index
    %242 = vector.load %arg17[%c7_244, %c0_245, %c0_246] : memref<9x16x16xf32, #tpu.memory_space<vmem>>, vector<1x16x16xf32>
    %243 = vector.shape_cast %242 : vector<1x16x16xf32> to vector<16x16xf32>
    %cst_247 = arith.constant dense<0.000000e+00> : vector<16x9xf32>
    %244 = tpu.matmul %243, %213, %cst_247 {dimension_numbers = #tpu.dot_dimension_numbers<[1], [0], [0], [1], [0, 0, 1, 1], [], []>} : vector<16x16xf32>, vector<16x9xf32>, vector<16x9xf32> -> vector<16x9xf32>
    %245 = arith.addf %241, %244 : vector<16x9xf32>
    %c8_248 = arith.constant 8 : index
    %c0_249 = arith.constant 0 : index
    %c0_250 = arith.constant 0 : index
    %246 = vector.load %arg17[%c8_248, %c0_249, %c0_250] : memref<9x16x16xf32, #tpu.memory_space<vmem>>, vector<1x16x16xf32>
    %247 = vector.shape_cast %246 : vector<1x16x16xf32> to vector<16x16xf32>
    %cst_251 = arith.constant dense<0.000000e+00> : vector<16x9xf32>
    %248 = tpu.matmul %247, %214, %cst_251 {dimension_numbers = #tpu.dot_dimension_numbers<[1], [0], [0], [1], [0, 0, 1, 1], [], []>} : vector<16x16xf32>, vector<16x9xf32>, vector<16x9xf32> -> vector<16x9xf32>
    %249 = arith.addf %245, %248 : vector<16x9xf32>
    %c0_252 = arith.constant 0 : index
    %c0_253 = arith.constant 0 : index
    %250 = vector.load %arg18[%c0_252, %c0_253] : memref<16x1xf32, #tpu.memory_space<vmem>>, vector<16x1xf32>
    %251 = vector.broadcast %250 : vector<16x1xf32> to vector<16x9xf32>
    %252 = arith.addf %249, %251 : vector<16x9xf32>
    %c0_254 = arith.constant 0 : index
    %c0_255 = arith.constant 0 : index
    %253 = vector.load %arg6[%c0_254, %c0_255] : memref<9x256xf32, #tpu.memory_space<vmem>>, vector<9x256xf32>
    %cst_256 = arith.constant dense<0.000000e+00> : vector<16x256xf32>
    %254 = tpu.matmul %252, %253, %cst_256 {dimension_numbers = #tpu.dot_dimension_numbers<[1], [0], [0], [1], [0, 0, 1, 1], [], []>} : vector<16x9xf32>, vector<9x256xf32>, vector<16x256xf32> -> vector<16x256xf32>
    %c0_257 = arith.constant 0 : index
    %c0_258 = arith.constant 0 : index
    %255 = vector.load %arg19[%c0_257, %c0_258] : memref<16x16xf32, #tpu.memory_space<vmem>>, vector<16x16xf32>
    %cst_259 = arith.constant dense<0.000000e+00> : vector<16x256xf32>
    %256 = tpu.matmul %255, %126, %cst_259 {dimension_numbers = #tpu.dot_dimension_numbers<[1], [0], [0], [1], [0, 0, 1, 1], [], []>} : vector<16x16xf32>, vector<16x256xf32>, vector<16x256xf32> -> vector<16x256xf32>
    %c0_260 = arith.constant 0 : index
    %c0_261 = arith.constant 0 : index
    %257 = vector.load %arg20[%c0_260, %c0_261] : memref<16x1xf32, #tpu.memory_space<vmem>>, vector<16x1xf32>
    %258 = vector.broadcast %257 : vector<16x1xf32> to vector<16x256xf32>
    %259 = arith.addf %256, %258 : vector<16x256xf32>
    %c0_262 = arith.constant 0 : index
    %c0_263 = arith.constant 0 : index
    %260 = vector.load %arg21[%c0_262, %c0_263] : memref<4x16xf32, #tpu.memory_space<vmem>>, vector<4x16xf32>
    %261 = arith.addf %254, %259 : vector<16x256xf32>
    %cst_264 = arith.constant dense<0.000000e+00> : vector<4x256xf32>
    %262 = tpu.matmul %260, %261, %cst_264 {dimension_numbers = #tpu.dot_dimension_numbers<[1], [0], [0], [1], [0, 0, 1, 1], [], []>} : vector<4x16xf32>, vector<16x256xf32>, vector<4x256xf32> -> vector<4x256xf32>
    %c0_265 = arith.constant 0 : index
    %c0_266 = arith.constant 0 : index
    %263 = vector.load %arg22[%c0_265, %c0_266] : memref<4x1xf32, #tpu.memory_space<vmem>>, vector<4x1xf32>
    %264 = vector.broadcast %263 : vector<4x1xf32> to vector<4x256xf32>
    %265 = arith.addf %262, %264 : vector<4x256xf32>
    %266 = arith.negf %265 : vector<4x256xf32>
    %267 = math.exp %266 : vector<4x256xf32>
    %cst_267 = arith.constant 1.000000e+00 : f32
    %268 = vector.broadcast %cst_267 : f32 to vector<4x256xf32>
    %269 = arith.addf %268, %267 : vector<4x256xf32>
    %270 = arith.divf %268, %269 : vector<4x256xf32>
    %271 = arith.mulf %121, %270 : vector<4x256xf32>
    %c0_268 = arith.constant 0 : index
    %c0_269 = arith.constant 0 : index
    %c0_270 = arith.constant 0 : index
    %272 = vector.load %arg23[%c0_268, %c0_269, %c0_270] : memref<1x4x256xf32, #tpu.memory_space<vmem>>, vector<1x4x256xf32>
    %273 = vector.shape_cast %272 : vector<1x4x256xf32> to vector<4x256xf32>
    %274 = vector.shape_cast %271 : vector<4x256xf32> to vector<1x4x256xf32>
    tpu.vector_store %arg23[%c0_268, %c0_269, %c0_270], %274 {strides = array<i32>} : memref<1x4x256xf32, #tpu.memory_space<vmem>>, vector<1x4x256xf32>,
    return
  }
  func.func @transform_0(%arg0: i32) -> (i32, i32, i32) {
    %c0_i32 = arith.constant 0 : i32
    %c0_i32_0 = arith.constant 0 : i32
    %c0_i32_1 = arith.constant 0 : i32
    return %arg0, %c0_i32, %c0_i32_0 : i32, i32, i32
  }
  func.func @transform_1(%arg0: i32) -> (i32, i32) {
    %c0_i32 = arith.constant 0 : i32
    %c0_i32_0 = arith.constant 0 : i32
    %c0_i32_1 = arith.constant 0 : i32
    return %c0_i32, %c0_i32_0 : i32, i32
  }
  func.func @transform_2(%arg0: i32) -> (i32, i32) {
    %c0_i32 = arith.constant 0 : i32
    %c0_i32_0 = arith.constant 0 : i32
    %c0_i32_1 = arith.constant 0 : i32
    return %c0_i32, %c0_i32_0 : i32, i32
  }
  func.func @transform_3(%arg0: i32) -> (i32, i32) {
    %c0_i32 = arith.constant 0 : i32
    %c0_i32_0 = arith.constant 0 : i32
    %c0_i32_1 = arith.constant 0 : i32
    return %c0_i32, %c0_i32_0 : i32, i32
  }
  func.func @transform_4(%arg0: i32) -> (i32, i32) {
    %c0_i32 = arith.constant 0 : i32
    %c0_i32_0 = arith.constant 0 : i32
    %c0_i32_1 = arith.constant 0 : i32
    return %c0_i32, %c0_i32_0 : i32, i32
  }
  func.func @transform_5(%arg0: i32) -> (i32, i32) {
    %c0_i32 = arith.constant 0 : i32
    %c0_i32_0 = arith.constant 0 : i32
    %c0_i32_1 = arith.constant 0 : i32
    return %c0_i32, %c0_i32_0 : i32, i32
  }
  func.func @transform_6(%arg0: i32) -> (i32, i32, i32) {
    %c0_i32 = arith.constant 0 : i32
    %c0_i32_0 = arith.constant 0 : i32
    %c0_i32_1 = arith.constant 0 : i32
    %c0_i32_2 = arith.constant 0 : i32
    return %c0_i32, %c0_i32_0, %c0_i32_1 : i32, i32, i32
  }
  func.func @transform_7(%arg0: i32) -> (i32, i32) {
    %c0_i32 = arith.constant 0 : i32
    %c0_i32_0 = arith.constant 0 : i32
    %c0_i32_1 = arith.constant 0 : i32
    return %c0_i32, %c0_i32_0 : i32, i32
  }
  func.func @transform_8(%arg0: i32) -> (i32, i32, i32) {
    %c0_i32 = arith.constant 0 : i32
    %c0_i32_0 = arith.constant 0 : i32
    %c0_i32_1 = arith.constant 0 : i32
    %c0_i32_2 = arith.constant 0 : i32
    return %c0_i32, %c0_i32_0, %c0_i32_1 : i32, i32, i32
  }
  func.func @transform_9(%arg0: i32) -> (i32, i32) {
    %c0_i32 = arith.constant 0 : i32
    %c0_i32_0 = arith.constant 0 : i32
    %c0_i32_1 = arith.constant 0 : i32
    return %c0_i32, %c0_i32_0 : i32, i32
  }
  func.func @transform_10(%arg0: i32) -> (i32, i32) {
    %c0_i32 = arith.constant 0 : i32
    %c0_i32_0 = arith.constant 0 : i32
    %c0_i32_1 = arith.constant 0 : i32
    return %c0_i32, %c0_i32_0 : i32, i32
  }
  func.func @transform_11(%arg0: i32) -> (i32, i32) {
    %c0_i32 = arith.constant 0 : i32
    %c0_i32_0 = arith.constant 0 : i32
    %c0_i32_1 = arith.constant 0 : i32
    return %c0_i32, %c0_i32_0 : i32, i32
  }
  func.func @transform_12(%arg0: i32) -> (i32, i32) {
    %c0_i32 = arith.constant 0 : i32
    %c0_i32_0 = arith.constant 0 : i32
    %c0_i32_1 = arith.constant 0 : i32
    return %c0_i32, %c0_i32_0 : i32, i32
  }
  func.func @transform_13(%arg0: i32) -> (i32, i32) {
    %c0_i32 = arith.constant 0 : i32
    %c0_i32_0 = arith.constant 0 : i32
    %c0_i32_1 = arith.constant 0 : i32
    return %c0_i32, %c0_i32_0 : i32, i32
  }
  func.func @transform_14(%arg0: i32) -> (i32, i32, i32) {
    %c0_i32 = arith.constant 0 : i32
    %c0_i32_0 = arith.constant 0 : i32
    %c0_i32_1 = arith.constant 0 : i32
    %c0_i32_2 = arith.constant 0 : i32
    return %c0_i32, %c0_i32_0, %c0_i32_1 : i32, i32, i32
  }
  func.func @transform_15(%arg0: i32) -> (i32, i32) {
    %c0_i32 = arith.constant 0 : i32
    %c0_i32_0 = arith.constant 0 : i32
    %c0_i32_1 = arith.constant 0 : i32
    return %c0_i32, %c0_i32_0 : i32, i32
  }
  func.func @transform_16(%arg0: i32) -> (i32, i32, i32) {
    %c0_i32 = arith.constant 0 : i32
    %c0_i32_0 = arith.constant 0 : i32
    %c0_i32_1 = arith.constant 0 : i32
    %c0_i32_2 = arith.constant 0 : i32
    return %c0_i32, %c0_i32_0, %c0_i32_1 : i32, i32, i32
  }
  func.func @transform_17(%arg0: i32) -> (i32, i32) {
    %c0_i32 = arith.constant 0 : i32
    %c0_i32_0 = arith.constant 0 : i32
    %c0_i32_1 = arith.constant 0 : i32
    return %c0_i32, %c0_i32_0 : i32, i32
  }
  func.func @transform_18(%arg0: i32) -> (i32, i32) {
    %c0_i32 = arith.constant 0 : i32
    %c0_i32_0 = arith.constant 0 : i32
    %c0_i32_1 = arith.constant 0 : i32
    return %c0_i32, %c0_i32_0 : i32, i32
  }
  func.func @transform_19(%arg0: i32) -> (i32, i32) {
    %c0_i32 = arith.constant 0 : i32
    %c0_i32_0 = arith.constant 0 : i32
    %c0_i32_1 = arith.constant 0 : i32
    return %c0_i32, %c0_i32_0 : i32, i32
  }
  func.func @transform_20(%arg0: i32) -> (i32, i32) {
    %c0_i32 = arith.constant 0 : i32
    %c0_i32_0 = arith.constant 0 : i32
    %c0_i32_1 = arith.constant 0 : i32
    return %c0_i32, %c0_i32_0 : i32, i32
  }
  func.func @transform_21(%arg0: i32) -> (i32, i32) {
    %c0_i32 = arith.constant 0 : i32
    %c0_i32_0 = arith.constant 0 : i32
    %c0_i32_1 = arith.constant 0 : i32
    return %c0_i32, %c0_i32_0 : i32, i32
  }
  func.func @transform_22(%arg0: i32) -> (i32, i32, i32) {
    %c0_i32 = arith.constant 0 : i32
    %c0_i32_0 = arith.constant 0 : i32
    %c0_i32_1 = arith.constant 0 : i32
    return %arg0, %c0_i32, %c0_i32_0 : i32, i32, i32
  }
}

</mosaic_0001>

<bundles_post_ra>
// kernel: _lambda_.1
= control target key start
LH: loop header
LB: loop body
LE: loop exit
PB: predicated region body
PF: predicated region fallthrough
CT: control target
= control target key end

     0   :  { %s9456_s0 = inlined_call_operand.vmem [shape: f32[2,4,324], index: 0, kind: input, shape index: {}]   ;;  %s9457_s1 = inlined_call_operand.hbm [shape: f32[1,324], index: 1, kind: input, shape index: {}]   ;;  %s9458_s2 = inlined_call_operand.hbm [shape: f32[324,256], index: 2, kind: input, shape index: {}]   ;;  %s9459_s3 = inlined_call_operand.vmem [shape: f32[256,49], index: 3, kind: input, shape index: {}]   ;;  %s9460_s4 = inlined_call_operand.hbm [shape: f32[49,9], index: 4, kind: input, shape index: {}]   ;;  %s9461_s5 = inlined_call_operand.hbm [shape: f32[9,256], index: 5, kind: input, shape index: {}]   ;;  %s9462_s6 = inlined_call_operand.hbm [shape: f32[9,4,4], index: 6, kind: input, shape index: {}]   ;;  %s9463_s7 = inlined_call_operand.hbm [shape: f32[4,1], index: 7, kind: input, shape index: {}]   ;;  %s9464_s8 = inlined_call_operand.hbm [shape: f32[9,4,4], index: 8, kind: input, shape index: {}]   ;;  %s9465_s9 = inlined_call_operand.hbm [shape: f32[4,1], index: 9, kind: input, shape index: {}]   ;;  %s9466_s10 = inlined_call_operand.hbm [shape: f32[4,4], index: 10, kind: input, shape index: {}]   ;;  %s9467_s11 = inlined_call_operand.hbm [shape: f32[4,1], index: 11, kind: input, shape index: {}]   ;;  %s9468_s12 = inlined_call_operand.hbm [shape: f32[16,4], index: 12, kind: input, shape index: {}]   ;;  %s9469_s13 = inlined_call_operand.hbm [shape: f32[16,1], index: 13, kind: input, shape index: {}]   ;;  %s9470_s14 = inlined_call_operand.vmem [shape: f32[9,16,16], index: 14, kind: input, shape index: {}]   ;;  %s9471_s15 = inlined_call_operand.hbm [shape: f32[16,1], index: 15, kind: input, shape index: {}]   ;;  %s9472_s16 = inlined_call_operand.vmem [shape: f32[9,16,16], index: 16, kind: input, shape index: {}]   ;;  %s9473_s17 = inlined_call_operand.hbm [shape: f32[16,1], index: 17, kind: input, shape index: {}]   ;;  %s9474_s18 = inlined_call_operand.hbm [shape: f32[16,16], index: 18, kind: input, shape index: {}]   ;;  %s9475_s19 = inlined_call_operand.vmem [shape: f32[16,1], index: 19, kind: input, shape index: {}]   ;;  %s9476_s20 = inlined_call_operand.vmem [shape: f32[4,16], index: 20, kind: input, shape index: {}]   ;;  %s9477_s21 = inlined_call_operand.vmem [shape: f32[4,1], index: 21, kind: input, shape index: {}]   ;;  %s9478_s22 = inlined_call_operand.vmem [shape: f32[2,4,256], index: 22, kind: output, shape index: {}]  }
   0x1   :  { %9485 = sst [smem:[#allocation35_spill]] %s9456_s0 }
   0x2   :  { %9486 = sst [smem:[#allocation36_spill]] %s9457_s1 }
   0x3   :  { %9487 = sst [smem:[#allocation37_spill]] %s9458_s2 }
   0x4   :  { %9488 = sst [smem:[#allocation38_spill]] %s9459_s3 }
   0x5   :  { %9489 = sst [smem:[#allocation39_spill]] %s9460_s4 }
   0x6   :  { %9490 = sst [smem:[#allocation40_spill]] %s9461_s5 }
   0x7   :  { %9491 = sst [smem:[#allocation41_spill]] %s9462_s6 }
   0x8   :  { %9492 = sst [smem:[#allocation42_spill]] %s9476_s20 }
   0x9   :  { %9493 = sst [smem:[#allocation43_spill]] %s9478_s22 }
   0xa   :  { %27 = vsyncpa [#allocation4], 0 }
   0xb   :  { %28 = vsyncpa [#allocation6], 0 }
   0xc   :  { %29 = vsyncpa [#allocation9], 0 }
   0xd   :  { %30 = vsyncpa [#allocation12], 0 }
   0xe   :  { %31 = vsyncpa [#allocation15], 0 }
   0xf   :  { %32 = vsyncpa [#allocation18], 0 }
  0x10   :  { %33 = vsyncpa [#allocation21], 0 }
  0x11   :  { %34 = vsyncpa [#allocation24], 0  ;;  %s8335_s3 = smov 0  }
  0x12 LB: > { %9494 = sst [smem:[#allocation34_spill]] %s8168_s3  ;;  %s8170_s28 = smov [#allocation5]   ;;  %s8168_s3 = sphi %s8335_s3, %s40_s3  }
  0x13   : > { %s561_s29 = sshll.u32 %s8170_s28, 4  ;;  %s8341_s30 = sadd.s32 4294967295, %s8168_s3   ;;  %s562_s29 = int_to_ptr.vmem [resolvable:$true] %s561_s29 }
  0x14   : > { %p7023_p0 = scmp.ge.s32.totalorder %s8168_s3, 1  ;;  %p538_p1 = scmp.lt.s32.totalorder %s8168_s3, 3 }
  0x15   : > { %p9481_p2 = scmp.eq.s32.totalorder %s8341_s30, 0  ;;  %s8171_s0 = smov [#allocation8]  }
  0x16   : > { %p8346_p3 = pnand %p7023_p0, %p538_p1  ;;  %s590_s23 = sshll.u32 %s8171_s0, 4  ;;  %s8352_s23 = int_to_ptr.vmem [resolvable:$true] %s590_s23 }
  0x17   : > { %s8172_s5 = smov [#allocation11]   ;;  %s8173_s6 = smov [#allocation14]  }
  0x18   : > { %s9495_s4 = scalar_select %p8346_p3, 1, 0 }
  0x19   : > { %p7592_p4 = pneg %p8346_p3  ;;  %s617_s24 = sshll.u32 %s8172_s5, 4  ;;  %s8360_s24 = int_to_ptr.vmem [resolvable:$true] %s617_s24 }
  0x1a   : > { %s8362_s25 = sshll.u32 %s8173_s6, 4  ;;  %s7751_s2 = scalar_lea.vmem %s562_s29, 10496  ;;  %s642_s25 = int_to_ptr.vmem [resolvable:$true] %s8362_s25 }
  0x1b   : > { %p8356_p5 = pnand %p9481_p2, %p7592_p4  ;;  %p7752_p7 = scmp.ne.s32.totalorder %s562_s29, %s7751_s2 }
  0x1c   : > { %p7759_p10 = scmp.lt.s32.totalorder %s562_s29, %s562_s29  ;;  %p7760_p11 = scmp.lt.s32.totalorder %s7751_s2, %s7751_s2 }
  0x1d   : > { %p8366_p6 = pneg %p8356_p5 }
  0x1e   : > { %p7761_p12 = por %p7760_p11, %p7759_p10 }
  0x1f   : > { %p7754_p8 = pnand %p7752_p7, %p8366_p6 }
  0x21   : > { %p7755_p9 = pneg %p7754_p8 }
  0x23   : > { %p7762_p13 = pnand %p7761_p12, %p7755_p9 }
  0x25   : > { %7765 = shalt.err (!%p7762_p13)
}
  0x26   : > { %s8174_s27 = smov 256   ;;  %s8175_s28 = smov 16  }
  0x27   : > { %s9498_s6 = sld [smem:[#allocation37_spill]]  ;;  %s7777_s3 = scalar_lea.vmem %s8352_s23, 512 }
  0x28   : > { %p7778_p0 = scmp.ne.s32.totalorder %s8352_s23, %s7777_s3  ;;  %p7785_p7 = scmp.lt.s32.totalorder %s8352_s23, %s8352_s23 }
  0x29   : > { %p7786_p8 = scmp.lt.s32.totalorder %s7777_s3, %s7777_s3 }
  0x2a   : > { %p7780_p1 = pnand %p7778_p0, %p8366_p6 }
  0x2b   : > { %p7787_p9 = por %p7786_p8, %p7785_p7 }
  0x2c   : > { %p7781_p4 = pneg %p7780_p1 }
  0x2d   : > { %7598 = dma.hbm_to_vmem [thread:$0]  (!%p8356_p5), %s9498_s6, 10496, %s562_s29, [#allocation6], %s8174_s27, %s8174_s27, %s8175_s28  }
  0x2e   : > { %p7788_p10 = pnand %p7787_p9, %p7781_p4 }
  0x30   : > { %7791 = shalt.err (!%p7788_p10)
}
  0x31   : > { %s9499_s20 = sld [smem:[#allocation40_spill]]  ;;  %s7803_s29 = scalar_lea.vmem %s8360_s24, 64 }
  0x32   : > { %p7804_p11 = scmp.ne.s32.totalorder %s8360_s24, %s7803_s29  ;;  %p7811_p0 = scmp.lt.s32.totalorder %s8360_s24, %s8360_s24 }
  0x33   : > { %p7812_p1 = scmp.lt.s32.totalorder %s7803_s29, %s7803_s29 }
  0x34   : > { %p7806_p12 = pnand %p7804_p11, %p8366_p6 }
  0x35   : > { %p7813_p4 = por %p7812_p1, %p7811_p0 }
  0x36   : > { %p7807_p13 = pneg %p7806_p12 }
  0x37   : > { %7604 = dma.hbm_to_vmem [thread:$0]  (!%p8356_p5), %s9499_s20, 512, %s8352_s23, [#allocation9], %s8174_s27, %s8174_s27, %s8175_s28  }
  0x38   : > { %p7814_p7 = pnand %p7813_p4, %p7807_p13 }
  0x3a   : > { %7817 = shalt.err (!%p7814_p7)
}
  0x3b   : > { %7610 = dma.hbm_to_vmem [thread:$0]  (!%p8356_p5), %s9463_s7, 64, %s8360_s24, [#allocation12]  }
  0x3c   : > { %s7829_s20 = scalar_lea.vmem %s642_s25, 64  ;;  %p7837_p11 = scmp.lt.s32.totalorder %s642_s25, %s642_s25 }
  0x3d   : > { %p7830_p8 = scmp.ne.s32.totalorder %s642_s25, %s7829_s20  ;;  %p7838_p12 = scmp.lt.s32.totalorder %s7829_s20, %s7829_s20 }
  0x3f   : > { %p7832_p9 = pnand %p7830_p8, %p8366_p6  ;;  %p7839_p0 = por %p7838_p12, %p7837_p11 }
  0x41   : > { %p7833_p10 = pneg %p7832_p9 }
  0x43   : > { %p7840_p13 = pnand %p7839_p0, %p7833_p10 }
  0x45   : > { %7843 = shalt.err (!%p7840_p13)
}
  0x46   : > { %7616 = dma.hbm_to_vmem [thread:$0]  (!%p8356_p5), %s9465_s9, 64, %s642_s25, [#allocation15]  }
  0x47   : > { %s8176_s28 = smov [#allocation17]  }
  0x48   : > { %s663_s24 = sshll.u32 %s8176_s28, 4  ;;  %s664_s24 = int_to_ptr.vmem [resolvable:$true] %s663_s24 }
  0x49   : > { %s7855_s0 = scalar_lea.vmem %s664_s24, 64  ;;  %p7863_p8 = scmp.lt.s32.totalorder %s664_s24, %s664_s24 }
  0x4a   : > { %p7856_p1 = scmp.ne.s32.totalorder %s664_s24, %s7855_s0  ;;  %p7864_p9 = scmp.lt.s32.totalorder %s7855_s0, %s7855_s0 }
  0x4c   : > { %p7858_p4 = pnand %p7856_p1, %p8366_p6  ;;  %p7865_p11 = por %p7864_p9, %p7863_p8 }
  0x4e   : > { %p7859_p7 = pneg %p7858_p4 }
  0x50   : > { %p7866_p10 = pnand %p7865_p11, %p7859_p7 }
  0x52   : > { %7869 = shalt.err (!%p7866_p10)
}
  0x53   : > { %7622 = dma.hbm_to_vmem [thread:$0]  (!%p8356_p5), %s9467_s11, 64, %s664_s24, [#allocation18]  }
  0x54   : > { %s8177_s25 = smov [#allocation20]   ;;  %s8178_s29 = smov [#allocation23]  }
  0x55   : > { %s686_s2 = sshll.u32 %s8177_s25, 4  ;;  %s718_s22 = sshll.u32 %s8178_s29, 4  ;;  %s687_s2 = int_to_ptr.vmem [resolvable:$true] %s686_s2  ;;  %s719_s22 = int_to_ptr.vmem [resolvable:$true] %s718_s22 }
  0x56   : > { %s7881_s3 = scalar_lea.vmem %s687_s2, 256  ;;  %p7889_p1 = scmp.lt.s32.totalorder %s687_s2, %s687_s2 }
  0x57   : > { %p7882_p12 = scmp.ne.s32.totalorder %s687_s2, %s7881_s3  ;;  %p7890_p4 = scmp.lt.s32.totalorder %s7881_s3, %s7881_s3 }
  0x59   : > { %p7884_p0 = pnand %p7882_p12, %p8366_p6  ;;  %p7891_p7 = por %p7890_p4, %p7889_p1 }
  0x5b   : > { %p7885_p13 = pneg %p7884_p0 }
  0x5d   : > { %p7892_p8 = pnand %p7891_p7, %p7885_p13 }
  0x5f   : > { %7895 = shalt.err (!%p7892_p8)
}
  0x60   : > { %s9483_s20 = smov 128   ;;  %s8180_s23 = smov 8  }
  0x61   : > { %7628 = dma.hbm_to_vmem [thread:$0]  (!%p8356_p5), %s9469_s13, 256, %s687_s2, [#allocation21], %s9483_s20, %s9483_s20, %s8180_s23  }
  0x62   : > { %s7907_s24 = scalar_lea.vmem %s719_s22, 256  ;;  %p7915_p12 = scmp.lt.s32.totalorder %s719_s22, %s719_s22 }
  0x63   : > { %p7908_p9 = scmp.ne.s32.totalorder %s719_s22, %s7907_s24  ;;  %p7916_p0 = scmp.lt.s32.totalorder %s7907_s24, %s7907_s24 }
  0x65   : > { %p7910_p11 = pnand %p7908_p9, %p8366_p6  ;;  %p7917_p13 = por %p7916_p0, %p7915_p12 }
  0x67   : > { %p7911_p10 = pneg %p7910_p11 }
  0x69   : > { %p7918_p1 = pnand %p7917_p13, %p7911_p10 }
  0x6b   : > { %7921 = shalt.err (!%p7918_p1)
}
  0x6c   : > { %7634 = dma.hbm_to_vmem [thread:$0]  (!%p8356_p5), %s9473_s17, 256, %s719_s22, [#allocation24], %s9483_s20, %s9483_s20, %s8180_s23  }
  0x6d   : > { %s8181_s6 = smov [#allocation3]   ;;  %s8182_s2 = smov [#allocation7]  }
  0x6e   : > { %s551_s25 = sshll.u32 %s8181_s6, 4  ;;  %s577_s29 = sshll.u32 %s8182_s2, 4  ;;  %s552_s25 = int_to_ptr.vmem [resolvable:$true] %s551_s25  ;;  %s578_s29 = int_to_ptr.vmem [resolvable:$true] %s577_s29 }
  0x6f   : > { %s7933_s3 = scalar_lea.vmem %s552_s25, 48  ;;  %s7940_s27 = scalar_lea.vmem %s552_s25, 64 }
  0x70   : > { %p7934_p4 = scmp.ne.s32.totalorder %s552_s25, %s7933_s3  ;;  %p7941_p9 = scmp.lt.s32.totalorder %s552_s25, %s552_s25 }
  0x71   : > { %p7942_p11 = scmp.lt.s32.totalorder %s7940_s27, %s7933_s3 }
  0x72   : > { %p7936_p7 = pnand %p7934_p4, %p8366_p6 }
  0x73   : > { %p7943_p10 = por %p7942_p11, %p7941_p9 }
  0x74   : > { %p7937_p8 = pneg %p7936_p7 }
  0x76   : > { %p7944_p12 = pnand %p7943_p10, %p7937_p8 }
  0x78   : > { %7947 = shalt.err (!%p7944_p12)
}
  0x79   : > { %s9500_s24 = sld [smem:[#allocation36_spill]]  ;;  %s7959_s0 = scalar_lea.vmem %s578_s29, 896 }
  0x7a   : > { %p7960_p0 = scmp.ne.s32.totalorder %s578_s29, %s7959_s0  ;;  %p7967_p4 = scmp.lt.s32.totalorder %s578_s29, %s578_s29 }
  0x7b   : > { %p7968_p7 = scmp.lt.s32.totalorder %s7959_s0, %s7959_s0 }
  0x7c   : > { %p7962_p13 = pnand %p7960_p0, %p8366_p6 }
  0x7d   : > { %p7969_p2 = por %p7968_p7, %p7967_p4 }
  0x7e   : > { %p7963_p1 = pneg %p7962_p13 }
  0x7f   : > { %7595 = dma.hbm_to_vmem [thread:$0]  (!%p8356_p5), %s9500_s24, 48, %s552_s25, [#allocation4]  }
  0x80   : > { %p7970_p3 = pnand %p7969_p2, %p7963_p1 }
  0x82   : > { %7973 = shalt.err (!%p7970_p3)
}
  0x83   : > { %s9501_s2 = sld [smem:[#allocation39_spill]]  ;;  %s8183_s25 = smov [#allocation10]  }
  0x84   : > { %s603_s3 = sshll.u32 %s8183_s25, 4  ;;  %s604_s3 = int_to_ptr.vmem [resolvable:$true] %s603_s3 }
  0x85   : > { %s7985_s27 = scalar_lea.vmem %s604_s3, 576  ;;  %p7993_p2 = scmp.lt.s32.totalorder %s604_s3, %s604_s3 }
  0x86   : > { %p7986_p8 = scmp.ne.s32.totalorder %s604_s3, %s7985_s27  ;;  %p7994_p3 = scmp.lt.s32.totalorder %s7985_s27, %s7985_s27 }
  0x88   : > { %p7988_p9 = pnand %p7986_p8, %p8366_p6  ;;  %p7995_p10 = por %p7994_p3, %p7993_p2 }
  0x89   : > { %7601 = dma.hbm_to_vmem [thread:$0]  (!%p8356_p5), %s9501_s2, 896, %s578_s29, [#allocation6], %s9483_s20, %s9483_s20, %s8180_s23  }
  0x8a   : > { %p7989_p11 = pneg %p7988_p9 }
  0x8c   : > { %p7996_p12 = pnand %p7995_p10, %p7989_p11 }
  0x8e   : > { %7999 = shalt.err (!%p7996_p12)
}
  0x8f   : > { %s8184_s22 = smov 64   ;;  %s8185_s28 = smov 4  }
  0x90   : > { %s9502_s0 = sld [smem:[#allocation41_spill]]  ;;  %s8186_s5 = smov [#allocation13]  }
  0x91   : > { %s627_s6 = sshll.u32 %s8186_s5, 4  ;;  %s8187_s2 = smov [#allocation16]   ;;  %s628_s6 = int_to_ptr.vmem [resolvable:$true] %s627_s6 }
  0x92   : > { %s652_s25 = sshll.u32 %s8187_s2, 4  ;;  %s8011_s20 = scalar_lea.vmem %s628_s6, 576  ;;  %s653_s25 = int_to_ptr.vmem [resolvable:$true] %s652_s25 }
  0x93   : > { %p8012_p0 = scmp.ne.s32.totalorder %s628_s6, %s8011_s20  ;;  %p8019_p4 = scmp.lt.s32.totalorder %s628_s6, %s628_s6 }
  0x94   : > { %p8020_p7 = scmp.lt.s32.totalorder %s8011_s20, %s8011_s20 }
  0x95   : > { %p8014_p13 = pnand %p8012_p0, %p8366_p6 }
  0x96   : > { %7607 = dma.hbm_to_vmem [thread:$0]  (!%p8356_p5), %s9502_s0, 576, %s604_s3, [#allocation9], %s8184_s22, %s8184_s22, %s8185_s28  }
  0x97   : > { %p8015_p1 = pneg %p8014_p13  ;;  %p8021_p8 = por %p8020_p7, %p8019_p4 }
  0x99   : > { %p8022_p9 = pnand %p8021_p8, %p8015_p1 }
  0x9b   : > { %8025 = shalt.err (!%p8022_p9)
}
  0x9c   : > { %7613 = dma.hbm_to_vmem [thread:$0]  (!%p8356_p5), %s9464_s8, 576, %s628_s6, [#allocation12], %s8184_s22, %s8184_s22, %s8185_s28  }
  0x9d   : > { %s8037_s3 = scalar_lea.vmem %s653_s25, 64  ;;  %p8045_p10 = scmp.lt.s32.totalorder %s653_s25, %s653_s25 }
  0x9e   : > { %p8038_p11 = scmp.ne.s32.totalorder %s653_s25, %s8037_s3  ;;  %p8046_p12 = scmp.lt.s32.totalorder %s8037_s3, %s8037_s3 }
  0xa0   : > { %p8040_p2 = pnand %p8038_p11, %p8366_p6  ;;  %p8047_p0 = por %p8046_p12, %p8045_p10 }
  0xa2   : > { %p8041_p3 = pneg %p8040_p2 }
  0xa4   : > { %p8048_p13 = pnand %p8047_p0, %p8041_p3 }
  0xa6   : > { %8051 = shalt.err (!%p8048_p13)
}
  0xa7   : > { %7619 = dma.hbm_to_vmem [thread:$0]  (!%p8356_p5), %s9466_s10, 64, %s653_s25, [#allocation15]  }
  0xa8   : > { %s8188_s0 = smov [#allocation19]   ;;  %s8189_s28 = smov [#allocation22]  }
  0xa9   : > { %s673_s22 = sshll.u32 %s8188_s0, 4  ;;  %s702_s5 = sshll.u32 %s8189_s28, 4  ;;  %s674_s22 = int_to_ptr.vmem [resolvable:$true] %s673_s22  ;;  %s703_s5 = int_to_ptr.vmem [resolvable:$true] %s702_s5 }
  0xaa   : > { %s8063_s6 = scalar_lea.vmem %s674_s22, 256  ;;  %p8071_p8 = scmp.lt.s32.totalorder %s674_s22, %s674_s22 }
  0xab   : > { %p8064_p1 = scmp.ne.s32.totalorder %s674_s22, %s8063_s6  ;;  %p8072_p9 = scmp.lt.s32.totalorder %s8063_s6, %s8063_s6 }
  0xad   : > { %p8066_p4 = pnand %p8064_p1, %p8366_p6  ;;  %p8073_p11 = por %p8072_p9, %p8071_p8 }
  0xaf   : > { %p8067_p7 = pneg %p8066_p4 }
  0xb1   : > { %p8074_p2 = pnand %p8073_p11, %p8067_p7 }
  0xb3   : > { %8077 = shalt.err (!%p8074_p2)
}
  0xb4   : > { %s9503_s2 = smov 128   ;;  %s8089_s24 = scalar_lea.vmem %s703_s5, 256 }
  0xb5   : > { %7625 = dma.hbm_to_vmem [thread:$0]  (!%p8356_p5), %s9468_s12, 256, %s674_s22, [#allocation18], %s9503_s2, %s9503_s2, %s8180_s23  }
  0xb6   : > { %p8090_p3 = scmp.ne.s32.totalorder %s703_s5, %s8089_s24  ;;  %p8097_p0 = scmp.lt.s32.totalorder %s703_s5, %s703_s5 }
  0xb7   : > { %p8098_p13 = scmp.lt.s32.totalorder %s8089_s24, %s8089_s24 }
  0xb8   : > { %p8092_p10 = pnand %p8090_p3, %p8366_p6 }
  0xb9   : > { %p8099_p1 = por %p8098_p13, %p8097_p0 }
  0xba   : > { %p8093_p12 = pneg %p8092_p10 }
  0xbc   : > { %p8100_p4 = pnand %p8099_p1, %p8093_p12 }
  0xbe   : > { %8103 = shalt.err (!%p8100_p4)
}
  0xbf   : > { %7631 = dma.hbm_to_vmem [thread:$0]  (!%p8356_p5), %s9471_s15, 256, %s703_s5, [#allocation21], %s9503_s2, %s9503_s2, %s8180_s23  }
  0xc0   : > { %s8190_s29 = smov [#allocation25]  }
  0xc1   : > { %s731_s0 = sshll.u32 %s8190_s29, 4  ;;  %s732_s0 = int_to_ptr.vmem [resolvable:$true] %s731_s0 }
  0xc2   : > { %s8115_s22 = scalar_lea.vmem %s732_s0, 256  ;;  %p8123_p11 = scmp.lt.s32.totalorder %s732_s0, %s732_s0 }
  0xc3   : > { %p8116_p7 = scmp.ne.s32.totalorder %s732_s0, %s8115_s22  ;;  %p8124_p2 = scmp.lt.s32.totalorder %s8115_s22, %s8115_s22 }
  0xc5   : > { %p8118_p8 = pnand %p8116_p7, %p8366_p6  ;;  %p8125_p3 = por %p8124_p2, %p8123_p11 }
  0xc7   : > { %p8119_p9 = pneg %p8118_p8 }
  0xc9   : > { %p8126_p10 = pnand %p8125_p3, %p8119_p9 }
  0xcb   : > { %8129 = shalt.err (!%p8126_p10)
}
  0xcc   : > { %7637 = dma.hbm_to_vmem [thread:$0]  (!%p8356_p5), %s9474_s18, 256, %s732_s0, [#allocation24], %s9503_s2, %s9503_s2, %s8180_s23  }
  0xcd   : > { %p9504_p12 = scmp.ne.s32.totalorder %s9495_s4, 0 }
  0xce   : > { %p9505_p6 = scmp.eq.s32.totalorder (!%p9504_p12), %s8341_s30, 0 }
  0xcf   : > { %764 = sbr.rel (%p9504_p12) target bundleno = 3484 (0xd9c), region = 108 }
  0xd4   : > { %8135 = dma.done.wait (%p9505_p6), [#allocation4], 48   ;;  %p9506_p0 = pmov %p9505_p6 }
  0xd6   : > { %8137 = vsyncadd (%p9506_p0), [#allocation4], 4294967248  ;;  %p9507_p13 = pmov %p9506_p0 }
  0xd7   : > { %p9508_p1 = pmov %p9506_p0 }
  0xd8   : > { %8139 = dma.done.wait (%p9507_p13), [#allocation6], 11392  }
  0xd9   : > { %8141 = vsyncadd (%p9508_p1), [#allocation6], 4294955904  ;;  %p9509_p4 = pmov %p9506_p0 }
  0xda   : > { %p9510_p5 = pmov %p9506_p0 }
  0xdb   : > { %8143 = dma.done.wait (%p9509_p4), [#allocation9], 1088  }
  0xdc   : > { %8145 = vsyncadd (%p9510_p5), [#allocation9], 4294966208  ;;  %p9511_p7 = pmov %p9506_p0 }
  0xdd   : > { %p9512_p8 = pmov %p9506_p0 }
  0xde   : > { %8147 = dma.done.wait (%p9511_p7), [#allocation12], 640  }
  0xdf   : > { %8149 = vsyncadd (%p9512_p8), [#allocation12], 4294966656  ;;  %p9513_p9 = pmov %p9506_p0 }
  0xe0   : > { %p9514_p11 = pmov %p9506_p0 }
  0xe1   : > { %8151 = dma.done.wait (%p9513_p9), [#allocation15], 128  }
  0xe2   : > { %8153 = vsyncadd (%p9514_p11), [#allocation15], 4294967168  ;;  %p9515_p2 = pmov %p9506_p0 }
  0xe3   : > { %p9516_p3 = pmov %p9506_p0 }
  0xe4   : > { %8155 = dma.done.wait (%p9515_p2), [#allocation18], 320  }
  0xe5   : > { %8157 = vsyncadd (%p9516_p3), [#allocation18], 4294966976  ;;  %p9517_p10 = pmov %p9506_p0 }
  0xe6   : > { %p9518_p12 = pmov %p9506_p0 }
  0xe7   : > { %8159 = dma.done.wait (%p9517_p10), [#allocation21], 512  }
  0xe8   : > { %8161 = vsyncadd (%p9518_p12), [#allocation21], 4294966784  ;;  %p9519_p6 = pmov %p9506_p0 }
  0xea   : > { %8163 = dma.done.wait (%p9519_p6), [#allocation24], 512  }
  0xeb   : > { %8165 = vsyncadd (%p9506_p0), [#allocation24], 4294966784  ;;  %p882_p13 = scmp.lt.s32.totalorder %s8341_s30, 1  ;;  %v8191_v0 = vmov 0.0   ;;  %vm911_vm0 = vcmask 551936   ;;  %s9520_s23 = sld [smem:[#allocation35_spill]] }
  0xec   : > { %892 = vst [vmem:[#allocation2] sm:$0xff] %v8191_v0  ;;  %893 = vst [vmem:[#allocation2 + $0x8] sm:$0xff] %v8191_v0  ;;  %7361 = vmatprep.subr.mxu1 %v8191_v0  ;;  %1011 = vmatprep.mubr.f32.mxu0 %v8191_v0  ;;  %s8192_s2 = smov 18   ;;  %s8193_s25 = smov 19   ;;  %vm8195_vm1 = vmmov 0   ;;  %v8201_v8 = vmov 0  }
  0xed   : > { %894 = vst [vmem:[#allocation2 + $0x10] sm:$0xff] %v8191_v0  ;;  %895 = vst [vmem:[#allocation2 + $0x18] sm:$0xff] %v8191_v0  ;;  %s9526_s30 = smov (!%p882_p13, %s8341_s30), 1  ;;  %s8194_s27 = smov 17   ;;  %7363 = vmatprep.mubr.msk.f32.mxu1 %vm8195_vm1, %v8191_v0  ;;  %7726 = vset.pattern.permute.xlu0 %v8201_v8  ;;  %v2395_v9 = vld [vmem:[#allocation11] sm:$0xf] }
  0xee   : > { %s7531_s4 = smul.u32 12, %s9526_s30  ;;  %s8196_s24 = smov 1   ;;  %7727 = vset.pattern.permute.xlu1 %v8201_v8  ;;  %vm932_vm2 = vcmask 146432   ;;  %vm940_vm3 = vcmask 1043456   ;;  %v919_v20 = vld [vmem:[#allocation10 + $0x4] sm:$0xf] }
  0xef   : > { %s8197_s3 = smov 127   ;;  %s8198_s20 = smov 111   ;;  %vm936_vm4 = vcmask 31744   ;;  %vm1096_vm5 = vcmask 154624   ;;  %v917_v25 = vld [vmem:[#allocation10] sm:$0xf] }
  0xf0   : > { %s8199_s29 = smov 110   ;;  %s8200_s0 = smov 109   ;;  %vm1260_vm6 = vcmask 138240   ;;  %v1251_v30 = vld [vmem:[#allocation10 + $0x8] sm:$0xf]  ;;  %vm1427_vm7 = vcmask 7168  }
  0xf1   : > { %s886_s6 = scalar_lea.vmem %s9520_s23, %s7531_s4  ;;  %v1418_v39 = vld [vmem:[#allocation10 + $0xc] sm:$0xf]  ;;  %vm1747_vm8 = vcmask 1039360   ;;  %v1585_v43 = vld [vmem:[#allocation10 + $0x10] sm:$0xf]  ;;  %vm1911_vm9 = vcmask 908288  }
  0xf2   : > { %v8552_v1 = vld [vmem:[%s886_s6] sm:$0xff]  ;;  %v8554_v2 = vld [vmem:[%s886_s6 + $0x8] sm:$0xf]  ;;  %v1740_v49 = vld [vmem:[#allocation10 + $0x14] sm:$0xf]  ;;  %vm2075_vm10 = vcmask 900096  }
  0xf3   : > { %v913_v3 = vld [vmem:[#allocation2] sm:$0xf]  ;;  %909 = vst [vmem:[#allocation2 + $0x8] sm:$0xf] %v8552_v1  ;;  %912 = vst.msk [vmem:[#allocation2 + $0x18] sm:$0xf] %vm911_vm0, %v8554_v2  ;;  %v8561_v4 = vcombine.high %v8552_v1, %v8552_v1 }
  0xf4   : > { %924 = vrot.lane.b32.xlu1 %v913_v3, %s8192_s2  ;;  %v1904_v55 = vld [vmem:[#allocation10 + $0x18] sm:$0xf]  ;;  %v2068_v60 = vld [vmem:[#allocation10 + $0x1c] sm:$0xf]  ;;  %vm2239_vm11 = vcmask 891904   ;;  %s8202_s22 = smov 16  }
  0xf5   : > { %910 = vst [vmem:[#allocation2 + $0x10] sm:$0xf] %v8561_v4  ;;  %s8203_s28 = smov 15   ;;  %vm896_vm15 = vcmask 556032   ;;  %s8204_s5 = smov 113  }
  0xf6   : > { %s8205_s4 = smov 112   ;;  %s8212_s1 = smov 114  }
  0xf7   : > { %s8213_s26 = smov 107   ;;  %s8214_s23 = smov 100  }
  0xf8   : > { %1088 = vrot.lane.b32.xlu1 %v913_v3, %s8193_s25  ;;  %s8215_s6 = smov 93  }
  0xfa   : > { %v8566_v5 = vld [vmem:[#allocation2 + $0x8] sm:$0xf]  ;;  %v8570_v6 = vld [vmem:[#allocation2 + $0x18] sm:$0xf] }
  0xfb   : > { %926 = vrot.lane.b32.xlu0 %v8566_v5, %s8192_s2 }
  0xfc   : > { %1252 = vrot.lane.b32.xlu1 %v913_v3, %s8194_s27  ;;  %v8577_v7 = vld [vmem:[#allocation2 + $0x10] sm:$0xf] }
  0xff   : > { %930 = vrot.lane.b32.xlu0 %v8570_v6, %s8192_s2 }
 0x100   : > { %1090 = vrot.lane.b32.xlu1 %v8566_v5, %s8193_s25 }
 0x103   : > { %928 = vrot.lane.b32.xlu0 %v8577_v7, %s8192_s2 }
 0x104   : > { %1254 = vrot.lane.b32.xlu1 %v8566_v5, %s8194_s27 }
 0x107   : > { %1092 = vrot.lane.b32.xlu0 %v8577_v7, %s8193_s25 }
 0x108   : > { %1421 = vrot.lane.b32.xlu1 %v8566_v5, %s8196_s24 }
 0x10b   : > { %1256 = vrot.lane.b32.xlu0 %v8577_v7, %s8194_s27 }
 0x10c   : > { %1419 = vrot.lane.b32.xlu1 %v913_v3, %s8196_s24 }
 0x10f   : > { %1094 = vrot.lane.b32.xlu0 %v8570_v6, %s8193_s25 }
 0x110   : > { %1425 = vrot.lane.b32.xlu1 %v8570_v6, %s8196_s24 }
 0x113   : > { %1423 = vrot.lane.b32.xlu0 %v8577_v7, %s8196_s24 }
 0x114   : > { %1745 = vrot.lane.b32.xlu1 %v8570_v6, %s8197_s3 }
 0x117   : > { %1258 = vrot.lane.b32.xlu0 %v8570_v6, %s8194_s27 }
 0x118   : > { %1907 = vrot.lane.b32.xlu1 %v8577_v7, %s8198_s20 }
 0x11b   : > { %1743 = vrot.lane.b32.xlu0 %v8577_v7, %s8197_s3 }
 0x11c   : > { %1905 = vrot.lane.b32.xlu1 %v8566_v5, %s8198_s20 }
 0x11f   : > { %1741 = vrot.lane.b32.xlu0 %v8566_v5, %s8197_s3 }
 0x120   : > { %2073 = vrot.lane.b32.xlu1 %v8570_v6, %s8199_s29 }
 0x123   : > { %1909 = vrot.lane.b32.xlu0 %v8570_v6, %s8198_s20 }
 0x124   : > { %2235 = vrot.lane.b32.xlu1 %v8577_v7, %s8200_s0 }
 0x127   : > { %2071 = vrot.lane.b32.xlu0 %v8577_v7, %s8199_s29 }
 0x128   : > { %2233 = vrot.lane.b32.xlu1 %v8566_v5, %s8200_s0 }
 0x12b   : > { %2069 = vrot.lane.b32.xlu0 %v8566_v5, %s8199_s29 }
 0x12f   : > { %2237 = vrot.lane.b32.xlu0 %v8570_v6, %s8200_s0 }
 0x133   : > { %2398 = vperm.xlu0 %7726, %v2395_v9  }
 0x166   : > { %v925_v10 = vpop.permute.xlu1 %924 }
 0x16a   : > { %v1089_v11 = vpop.permute.xlu1 %1088 }
 0x16d   : > { %v927_v12 = vpop.permute.xlu0 %926 }
 0x16e   : > { %v1253_v13 = vpop.permute.xlu1 %1252  ;;  %v933_v21 = vsel %vm932_vm2, %v925_v10, %v927_v12 }
 0x171   : > { %v931_v14 = vpop.permute.xlu0 %930 }
 0x172   : > { %v1091_v15 = vpop.permute.xlu1 %1090 }
 0x173   : > { %v1097_v26 = vsel %vm1096_vm5, %v1089_v11, %v1091_v15 }
 0x175   : > { %v929_v16 = vpop.permute.xlu0 %928 }
 0x176   : > { %v934_v17 = vsel %vm932_vm2, %v927_v12, %v929_v16  ;;  %v935_v18 = vsel %vm932_vm2, %v929_v16, %v931_v14  ;;  %v1255_v19 = vpop.permute.xlu1 %1254 }
 0x177   : > { %7059 = vmatprep.subr.msk.mxu0 %vm940_vm3, %v934_v17  ;;  %7362 = vmatpush3.msk.msra.mxu1 %vm940_vm3, %v935_v18  ;;  %v1261_v31 = vsel %vm1260_vm6, %v1253_v13, %v1255_v19 }
 0x178   : > { %7060 = vmatpush1.msk.msra.mxu0 %vm940_vm3, %v933_v21  ;;  %7364 = vmatmul.mubr.msk.f32.vlgmr.msra.gmra.mxu1 %vm936_vm4, %v919_v20 }
 0x179   : > { %v1093_v22 = vpop.permute.xlu0 %1092  ;;  %7061 = vmatmul.mubr.msk.f32.vlgmr.msra.gmra.mxu0 %vm936_vm4, %v919_v20  ;;  %7366 = vmatprep.subr.mxu1 %v8191_v0 }
 0x17a   : > { %v1098_v23 = vsel %vm1096_vm5, %v1091_v15, %v1093_v22  ;;  %v1422_v24 = vpop.permute.xlu1 %1421  ;;  %1173 = vmatprep.mubr.f32.mxu0 %v8191_v0  ;;  %7368 = vmatprep.mubr.msk.f32.mxu1 %vm8195_vm1, %v8191_v0 }
 0x17b   : > { %7064 = vmatprep.subr.msk.mxu0 %vm940_vm3, %v1098_v23 }
 0x17c   : > { %7065 = vmatpush1.msk.msra.mxu0 %vm940_vm3, %v1097_v26 }
 0x17d   : > { %v1257_v27 = vpop.permute.xlu0 %1256  ;;  %7066 = vmatmul.mubr.msk.f32.vlgmr.msra.gmra.mxu0 %vm936_vm4, %v917_v25 }
 0x17e   : > { %v1262_v28 = vsel %vm1260_vm6, %v1255_v19, %v1257_v27  ;;  %v1420_v29 = vpop.permute.xlu1 %1419  ;;  %1337 = vmatprep.mubr.f32.mxu0 %v8191_v0 }
 0x17f   : > { %7069 = vmatprep.subr.msk.mxu0 %vm940_vm3, %v1262_v28  ;;  %v1428_v35 = vsel %vm1427_vm7, %v1420_v29, %v1422_v24 }
 0x180   : > { %7070 = vmatpush1.msk.msra.mxu0 %vm940_vm3, %v1261_v31 }
 0x181   : > { %v1095_v32 = vpop.permute.xlu0 %1094  ;;  %7071 = vmatmul.mubr.msk.f32.vlgmr.msra.gmra.mxu0 %vm936_vm4, %v1251_v30 }
 0x182   : > { %v1099_v33 = vsel %vm1096_vm5, %v1093_v22, %v1095_v32  ;;  %v1426_v34 = vpop.permute.xlu1 %1425  ;;  %1504 = vmatprep.mubr.f32.mxu0 %v8191_v0 }
 0x183   : > { %7367 = vmatpush3.msk.msra.mxu1 %vm940_vm3, %v1099_v33 }
 0x184   : > { %7369 = vmatmul.mubr.msk.f32.vlgmr.msra.gmra.mxu1 %vm936_vm4, %v917_v25  ;;  %7371 = vmatprep.subr.mxu1 %v8191_v0 }
 0x185   : > { %v1424_v36 = vpop.permute.xlu0 %1423  ;;  %7373 = vmatprep.mubr.msk.f32.mxu1 %vm8195_vm1, %v8191_v0 }
 0x186   : > { %v1429_v37 = vsel %vm1427_vm7, %v1422_v24, %v1424_v36  ;;  %v1746_v38 = vpop.permute.xlu1 %1745  ;;  %v1430_v44 = vsel %vm1427_vm7, %v1424_v36, %v1426_v34 }
 0x187   : > { %7074 = vmatprep.subr.msk.mxu0 %vm940_vm3, %v1429_v37 }
 0x188   : > { %7075 = vmatpush1.msk.msra.mxu0 %vm940_vm3, %v1428_v35 }
 0x189   : > { %v1259_v40 = vpop.permute.xlu0 %1258  ;;  %7079 = vmatprep.subr.msk.mxu0 %vm940_vm3, %v8577_v7  ;;  %7076 = vmatmul.mubr.msk.f32.vlgmr.msra.gmra.mxu0 %vm936_vm4, %v1418_v39  ;;  %v2435_v7 = vld [vmem:[#allocation2] sm:$0xf] }
 0x18a   : > { %v1263_v41 = vsel %vm1260_vm6, %v1257_v27, %v1259_v40  ;;  %7080 = vmatpush1.msk.msra.mxu0 %vm940_vm3, %v8566_v5  ;;  %1659 = vmatprep.mubr.f32.mxu0 %v8191_v0  ;;  %v1908_v42 = vpop.permute.xlu1 %1907  ;;  %v2232_v5 = vld [vmem:[#allocation10 + $0x20] sm:$0xf] }
 0x18b   : > { %7372 = vmatpush3.msk.msra.mxu1 %vm940_vm3, %v1263_v41  ;;  %2446 = vrot.lane.b32.xlu0 %v2435_v7, %s8192_s2 }
 0x18c   : > { %7374 = vmatmul.mubr.msk.f32.vlgmr.msra.gmra.mxu1 %vm936_vm4, %v1251_v30  ;;  %7376 = vmatprep.subr.mxu1 %v8191_v0 }
 0x18d   : > { %v1744_v45 = vpop.permute.xlu0 %1743  ;;  %7377 = vmatpush3.msk.msra.mxu1 %vm940_vm3, %v1430_v44  ;;  %7378 = vmatprep.mubr.msk.f32.mxu1 %vm8195_vm1, %v8191_v0 }
 0x18e   : > { %v1749_v46 = vsel %vm1747_vm8, %v1744_v45, %v1746_v38  ;;  %7381 = vmatprep.subr.mxu1 %v8191_v0  ;;  %7081 = vmatmul.mubr.msk.f32.vlgmr.msra.gmra.mxu0 %vm936_vm4, %v1585_v43  ;;  %v1906_v47 = vpop.permute.xlu1 %1905 }
 0x18f   : > { %7084 = vmatprep.subr.msk.mxu0 %vm940_vm3, %v1749_v46  ;;  %1823 = vmatprep.mubr.f32.mxu0 %v8191_v0  ;;  %v1912_v53 = vsel %vm1911_vm9, %v1906_v47, %v1908_v42  ;;  %v2414_v47 = vlaneseq }
 0x190   : > { %7379 = vmatmul.mubr.msk.f32.vlgmr.msra.gmra.mxu1 %vm936_vm4, %v1418_v39  ;;  %2607 = vrot.lane.b32.xlu0 %v2435_v7, %s8193_s25 }
 0x191   : > { %v1742_v48 = vpop.permute.xlu0 %1741  ;;  %7382 = vmatpush3.msk.msra.mxu1 %vm940_vm3, %v8570_v6  ;;  %7383 = vmatprep.mubr.msk.f32.mxu1 %vm8195_vm1, %v8191_v0 }
 0x192   : > { %v1748_v50 = vsel %vm1747_vm8, %v1742_v48, %v1744_v45  ;;  %7386 = vmatprep.subr.mxu1 %v8191_v0  ;;  %v2074_v51 = vpop.permute.xlu1 %2073 }
 0x193   : > { %7085 = vmatpush1.msk.msra.mxu0 %vm940_vm3, %v1748_v50 }
 0x194   : > { %7384 = vmatmul.mubr.msk.f32.vlgmr.msra.gmra.mxu1 %vm936_vm4, %v1585_v43  ;;  %7086 = vmatmul.mubr.msk.f32.vlgmr.msra.gmra.mxu0 %vm936_vm4, %v1740_v49 }
 0x195   : > { %7387 = vmatpush3.msk.msra.mxu1 %vm940_vm3, %v1746_v38  ;;  %v1910_v52 = vpop.permute.xlu0 %1909  ;;  %7388 = vmatprep.mubr.msk.f32.mxu1 %vm8195_vm1, %v8191_v0 }
 0x196   : > { %v1913_v54 = vsel %vm1911_vm9, %v1908_v42, %v1910_v52  ;;  %7391 = vmatprep.subr.mxu1 %v8191_v0  ;;  %1987 = vmatprep.mubr.f32.mxu0 %v8191_v0  ;;  %v2236_v56 = vpop.permute.xlu1 %2235 }
 0x197   : > { %7089 = vmatprep.subr.msk.mxu0 %vm940_vm3, %v1913_v54  ;;  %2770 = vrot.lane.b32.xlu0 %v2435_v7, %s8194_s27 }
 0x198   : > { %7389 = vmatmul.mubr.msk.f32.vlgmr.msra.gmra.mxu1 %vm936_vm4, %v1740_v49  ;;  %7090 = vmatpush1.msk.msra.mxu0 %vm940_vm3, %v1912_v53 }
 0x199   : > { %7392 = vmatpush3.msk.msra.mxu1 %vm940_vm3, %v1910_v52  ;;  %v2072_v57 = vpop.permute.xlu0 %2071  ;;  %7393 = vmatprep.mubr.msk.f32.mxu1 %vm8195_vm1, %v8191_v0 }
 0x19a   : > { %7091 = vmatmul.mubr.msk.f32.vlgmr.msra.gmra.mxu0 %vm936_vm4, %v1904_v55  ;;  %v2077_v58 = vsel %vm2075_vm10, %v2072_v57, %v2074_v51  ;;  %7396 = vmatprep.subr.mxu1 %v8191_v0  ;;  %v2234_v62 = vpop.permute.xlu1 %2233 }
 0x19b   : > { %7094 = vmatprep.subr.msk.mxu0 %vm940_vm3, %v2077_v58  ;;  %2151 = vmatprep.mubr.f32.mxu0 %v8191_v0  ;;  %v2240_v3 = vsel %vm2239_vm11, %v2234_v62, %v2236_v56 }
 0x19c   : > { %7394 = vmatmul.mubr.msk.f32.vlgmr.msra.gmra.mxu1 %vm936_vm4, %v1904_v55  ;;  %2936 = vrot.lane.b32.xlu0 %v2435_v7, %s8196_s24  ;;  %v2415_v55 = vshrl.u32 %v2414_v47, 7  ;;  %v905_v7 = vld [vmem:[#allocation3] sm:$0x7] }
 0x19d   : > { %v2070_v59 = vpop.permute.xlu0 %2069  ;;  %7397 = vmatpush3.msk.msra.mxu1 %vm940_vm3, %v2074_v51  ;;  %7398 = vmatprep.mubr.msk.f32.mxu1 %vm8195_vm1, %v8191_v0 }
 0x19e   : > { %v2076_v61 = vsel %vm2075_vm10, %v2070_v59, %v2072_v57  ;;  %7401 = vmatprep.subr.mxu1 %v8191_v0 }
 0x19f   : > { %7095 = vmatpush1.msk.msra.mxu0 %vm940_vm3, %v2076_v61 }
 0x1a0   : > { %7096 = vmatmul.mubr.msk.f32.vlgmr.msra.gmra.mxu0 %vm936_vm4, %v2068_v60  ;;  %7399 = vmatmul.mubr.msk.f32.vlgmr.msra.gmra.mxu1 %vm936_vm4, %v2068_v60 }
 0x1a1   : > { %v2238_v63 = vpop.permute.xlu0 %2237  ;;  %7403 = vmatprep.mubr.msk.f32.mxu1 %vm8195_vm1, %v8191_v0  ;;  %2315 = vmatprep.mubr.f32.mxu0 %v8191_v0 }
 0x1a2   : > { %v2241_v6 = vsel %vm2239_vm11, %v2236_v56, %v2238_v63  ;;  %7402 = vmatpush3.msk.msra.mxu1 %vm940_vm3, %v2238_v63  ;;  %v2424_v63 = vsub.s32 2, %v2415_v55 }
 0x1a3   : > { %7099 = vmatprep.subr.msk.mxu0 %vm940_vm3, %v2241_v6  ;;  %7406 = vmatprep.subr.mxu1 %v8191_v0 }
 0x1a4   : > { %7100 = vmatpush1.msk.msra.mxu0 %vm940_vm3, %v2240_v3  ;;  %7404 = vmatmul.mubr.msk.f32.vlgmr.msra.gmra.mxu1 %vm936_vm4, %v2232_v5 }
 0x1a5   : > { %7101 = vmatmul.mubr.msk.f32.vlgmr.msra.gmra.mxu0 %vm936_vm4, %v2232_v5  ;;  %7408 = vmatprep.mubr.msk.f32.mxu1 %vm8195_vm1, %v8191_v0 }
 0x1a6   : > { %2530 = vmatprep.mubr.f32.mxu0 %v8191_v0 }
 0x1ae   : > { %v2399_v3 = vpop.permute.xlu0 %2398 }
 0x238   : > { %v1084_v8 = vpop.f32.mrf.mxu1 }
 0x239   : > { %v1013_v9 = vpop.f32.mrf.mxu0 }
 0x23a   : > { %v7365_v10 = vpop.f32.mrf.mxu1 }
 0x23b   : > { %v1015_v11 = vpop.f32.mrf.mxu0 }
 0x23d   : > { %v1175_v12 = vpop.f32.mrf.mxu0 }
 0x23e   : > { %v1176_v20 = vadd.f32 %v1175_v12, %v1013_v9 }
 0x23f   : > { %v1177_v13 = vpop.f32.mrf.mxu0 }
 0x240   : > { %v1178_v24 = vadd.f32 %v1177_v13, %v1015_v11 }
 0x241   : > { %v1339_v14 = vpop.f32.mrf.mxu0 }
 0x242   : > { %v1414_v25 = vadd.f32 %v1339_v14, %v1176_v20  ;;  %v2420_v14 = vsub.s32 1, %v2415_v55 }
 0x243   : > { %v1341_v16 = vpop.f32.mrf.mxu0 }
 0x244   : > { %v1246_v15 = vpop.f32.mrf.mxu1  ;;  %v1415_v29 = vadd.f32 %v1341_v16, %v1178_v24 }
 0x245   : > { %v1247_v35 = vadd.f32 %v1246_v15, %v1084_v8  ;;  %v2416_v8 = vsub.s32 0, %v2415_v55  ;;  %v2425_v15 = vrot.slane %v905_v7, %v2424_v63  ;;  %v2439_v55 = vld [vmem:[#allocation13] sm:$0xf] }
 0x246   : > { %v7370_v17 = vpop.f32.mrf.mxu1 }
 0x249   : > { %v1506_v18 = vpop.f32.mrf.mxu0 }
 0x24a   : > { %v1581_v30 = vadd.f32 %v1506_v18, %v1414_v25  ;;  %v2417_v18 = vrot.slane %v905_v7, %v2416_v8 }
 0x24b   : > { %v1508_v19 = vpop.f32.mrf.mxu0 }
 0x24c   : > { %v1410_v21 = vpop.f32.mrf.mxu1  ;;  %v1582_v36 = vadd.f32 %v1508_v19, %v1415_v29 }
 0x24d   : > { %v1416_v39 = vadd.f32 %v1410_v21, %v1247_v35 }
 0x24e   : > { %v7375_v22 = vpop.f32.mrf.mxu1  ;;  %v1661_v23 = vpop.f32.mrf.mxu0 }
 0x24f   : > { %v1736_v37 = vadd.f32 %v1661_v23, %v1581_v30  ;;  %v2421_v23 = vrot.slane %v905_v7, %v2420_v14 }
 0x250   : > { %v1577_v26 = vpop.f32.mrf.mxu1  ;;  %v1663_v27 = vpop.f32.mrf.mxu0 }
 0x251   : > { %v1583_v42 = vadd.f32 %v1577_v26, %v1416_v39  ;;  %v1737_v43 = vadd.f32 %v1663_v27, %v1582_v36  ;;  %v2447_v36 = vpop.permute.xlu0 %2446 }
 0x252   : > { %v7380_v28 = vpop.f32.mrf.mxu1 }
 0x254   : > { %v1732_v31 = vpop.f32.mrf.mxu1  ;;  %v1825_v32 = vpop.f32.mrf.mxu0 }
 0x255   : > { %v1900_v44 = vadd.f32 %v1825_v32, %v1736_v37  ;;  %v1738_v48 = vadd.f32 %v1732_v31, %v1583_v42  ;;  %v2608_v37 = vpop.permute.xlu0 %2607 }
 0x256   : > { %v7385_v33 = vpop.f32.mrf.mxu1  ;;  %v1827_v34 = vpop.f32.mrf.mxu0 }
 0x257   : > { %v1901_v51 = vadd.f32 %v1827_v34, %v1737_v43  ;;  %v3907_v33 = vld [vmem:[#allocation14] sm:$0xf]  ;;  %v4254_v34 = vld [vmem:[#allocation20 + $0x8] sm:$0xff] }
 0x258   : > { %v1896_v38 = vpop.f32.mrf.mxu1 }
 0x259   : > { %v1902_v50 = vadd.f32 %v1896_v38, %v1738_v48  ;;  %v2771_v38 = vpop.permute.xlu0 %2770 }
 0x25a   : > { %v7390_v40 = vpop.f32.mrf.mxu1  ;;  %v1989_v41 = vpop.f32.mrf.mxu0 }
 0x25b   : > { %v2064_v52 = vadd.f32 %v1989_v41, %v1900_v44 }
 0x25c   : > { %v2060_v45 = vpop.f32.mrf.mxu1  ;;  %v1991_v46 = vpop.f32.mrf.mxu0 }
 0x25d   : > { %v2066_v56 = vadd.f32 %v2060_v45, %v1902_v50  ;;  %v2065_v60 = vadd.f32 %v1991_v46, %v1901_v51  ;;  %v2937_v39 = vpop.permute.xlu0 %2936 }
 0x25e   : > { %v7395_v49 = vpop.f32.mrf.mxu1 }
 0x25f   : > { %v2441_v49 = vld [vmem:[#allocation13 + $0x4] sm:$0xf] }
 0x260   : > { %v2153_v53 = vpop.f32.mrf.mxu0  ;;  %v2224_v54 = vpop.f32.mrf.mxu1 }
 0x261   : > { %v2230_v59 = vadd.f32 %v2224_v54, %v2066_v56  ;;  %v2228_v61 = vadd.f32 %v2153_v53, %v2064_v52 }
 0x262   : > { %v2155_v57 = vpop.f32.mrf.mxu0  ;;  %v7400_v58 = vpop.f32.mrf.mxu1 }
 0x263   : > { %v2229_v9 = vadd.f32 %v2155_v57, %v2065_v60 }
 0x264   : > { %v2388_v62 = vpop.f32.mrf.mxu1 }
 0x265   : > { %v2394_v5 = vadd.f32 %v2388_v62, %v2230_v59  ;;  %v2317_v6 = vpop.f32.mrf.mxu0 }
 0x266   : > { %v2392_v10 = vadd.f32 %v2317_v6, %v2228_v61  ;;  %v7405_v11 = vpop.f32.mrf.mxu1  ;;  %v2769_v61 = vld [vmem:[#allocation13 + $0x8] sm:$0xf]  ;;  %v2935_v6 = vld [vmem:[#allocation13 + $0xc] sm:$0xf] }
 0x267   : > { %v2403_v12 = vadd.f32 %v2399_v3, %v2394_v5  ;;  %v2319_v13 = vpop.f32.mrf.mxu0 }
 0x268   : > { %v2401_v16 = vadd.f32 %v2399_v3, %v2392_v10  ;;  %v2393_v17 = vadd.f32 %v2319_v13, %v2229_v9  ;;  %v3101_v13 = vld [vmem:[#allocation13 + $0x10] sm:$0xf] }
 0x269   : > { %vm2406_vm12 = vcmp.ge.f32.partialorder %v2403_v12, 0.0  ;;  %v2409_v19 = vmul.f32 0.05, %v2403_v12 }
 0x26a   : > { %vm2404_vm13 = vcmp.ge.f32.partialorder %v2401_v16, 0.0  ;;  %v2407_v20 = vmul.f32 0.05, %v2401_v16  ;;  %v2402_v21 = vadd.f32 %v2399_v3, %v2393_v17  ;;  %v3256_v17 = vld [vmem:[#allocation13 + $0x14] sm:$0xf] }
 0x26b   : > { %v2412_v22 = vsel %vm2406_vm12, %v2403_v12, %v2409_v19  ;;  %vm5687_vm12 = vcmask 23552  }
 0x26c   : > { %v2410_v24 = vsel %vm2404_vm13, %v2401_v16, %v2407_v20  ;;  %v8732_v25 = vmul.f32 %v2425_v15, %v2412_v22  ;;  %vm2405_vm14 = vcmp.ge.f32.partialorder %v2402_v21, 0.0  ;;  %v2408_v26 = vmul.f32 0.05, %v2402_v21 }
 0x26d   : > { %v8734_v27 = vmul.f32 %v2417_v18, %v2410_v24  ;;  %vm5877_vm13 = vcmask 15360  }
 0x26e   : > { %2434 = vst.msk [vmem:[#allocation2 + $0x18] sm:$0xf] %vm911_vm0, %v8732_v25  ;;  %v2411_v28 = vsel %vm2405_vm14, %v2402_v21, %v2408_v26  ;;  %v3419_v21 = vld [vmem:[#allocation13 + $0x18] sm:$0xf]  ;;  %v3582_v26 = vld [vmem:[#allocation13 + $0x1c] sm:$0xf] }
 0x26f   : > { %2432 = vst [vmem:[#allocation2 + $0x8] sm:$0xf] %v8734_v27  ;;  %v8739_v29 = vmul.f32 %v2421_v23, %v2411_v28 }
 0x271   : > { %2433 = vst [vmem:[#allocation2 + $0x10] sm:$0xf] %v8739_v29 }
 0x275   : > { %v8742_v30 = vld [vmem:[#allocation2 + $0x18] sm:$0xf] }
 0x276   : > { %2452 = vrot.lane.b32.xlu1 %v8742_v30, %s8192_s2  ;;  %v8746_v31 = vld [vmem:[#allocation2 + $0x8] sm:$0xf]  ;;  %v8804_v35 = vld [vmem:[#allocation2 + $0x18] sm:$0xff] }
 0x277   : > { %2609 = vrot.lane.b32.xlu0 %v8746_v31, %s8193_s25 }
 0x278   : > { %v8766_v32 = vld [vmem:[#allocation2 + $0x10] sm:$0xf] }
 0x27a   : > { %2613 = vrot.lane.b32.xlu1 %v8742_v30, %s8193_s25 }
 0x27b   : > { %2772 = vrot.lane.b32.xlu0 %v8746_v31, %s8194_s27 }
 0x27e   : > { %2776 = vrot.lane.b32.xlu1 %v8742_v30, %s8194_s27 }
 0x27f   : > { %2938 = vrot.lane.b32.xlu0 %v8746_v31, %s8196_s24 }
 0x282   : > { %2942 = vrot.lane.b32.xlu1 %v8742_v30, %s8196_s24 }
 0x283   : > { %3257 = vrot.lane.b32.xlu0 %v8746_v31, %s8197_s3 }
 0x286   : > { %2448 = vrot.lane.b32.xlu1 %v8746_v31, %s8192_s2 }
 0x287   : > { %3424 = vrot.lane.b32.xlu0 %v8742_v30, %s8198_s20 }
 0x28a   : > { %2450 = vrot.lane.b32.xlu1 %v8766_v32, %s8192_s2  ;;  %s8216_s2 = smov 86  }
 0x28b   : > { %3259 = vrot.lane.b32.xlu0 %v8766_v32, %s8197_s3 }
 0x28e   : > { %2611 = vrot.lane.b32.xlu1 %v8766_v32, %s8193_s25  ;;  %s8217_s25 = smov 3  }
 0x28f   : > { %3583 = vrot.lane.b32.xlu0 %v8746_v31, %s8199_s29 }
 0x292   : > { %2774 = vrot.lane.b32.xlu1 %v8766_v32, %s8194_s27 }
 0x293   : > { %3585 = vrot.lane.b32.xlu0 %v8766_v32, %s8199_s29 }
 0x296   : > { %2940 = vrot.lane.b32.xlu1 %v8766_v32, %s8196_s24 }
 0x297   : > { %3750 = vrot.lane.b32.xlu0 %v8742_v30, %s8200_s0 }
 0x29a   : > { %3261 = vrot.lane.b32.xlu1 %v8742_v30, %s8197_s3 }
 0x29b   : > { %3910 = vperm.xlu0 %7726, %v3907_v33   ;;  %v3745_v33 = vld [vmem:[#allocation13 + $0x20] sm:$0xf] }
 0x29e   : > { %3420 = vrot.lane.b32.xlu1 %v8746_v31, %s8198_s20 }
 0x29f   : > { %4262 = vperm.xlu0 %7726, %v4254_v34  }
 0x2a2   : > { %3422 = vrot.lane.b32.xlu1 %v8766_v32, %s8198_s20 }
 0x2a3   : > { %4383 = vrot.lane.b32.xlu0 %v8191_v0, %s8202_s22 }
 0x2a6   : > { %3587 = vrot.lane.b32.xlu1 %v8742_v30, %s8199_s29  ;;  %s8207_s29 = smov 125  }
 0x2a7   : > { %4487 = vrot.lane.b32.xlu0 %v8191_v0, %s8194_s27 }
 0x2aa   : > { %3748 = vrot.lane.b32.xlu1 %v8766_v32, %s8200_s0 }
 0x2ab   : > { %4593 = vrot.lane.b32.xlu0 %v8191_v0, %s8203_s28 }
 0x2ae   : > { %3746 = vrot.lane.b32.xlu1 %v8746_v31, %s8200_s0  ;;  %s8208_s0 = smov 124  }
 0x2af   : > { %4704 = vrot.lane.b32.xlu0 %v8191_v0, %s8196_s24 }
 0x2b3   : > { %4904 = vrot.lane.b32.xlu0 %v8804_v35, %s8197_s3 }
 0x2e8   : > { %v2453_v40 = vpop.permute.xlu1 %2452 }
 0x2e9   : > { %v2610_v41 = vpop.permute.xlu0 %2609 }
 0x2ea   : > { %v2615_v58 = vsel %vm1096_vm5, %v2608_v37, %v2610_v41 }
 0x2ec   : > { %v2614_v42 = vpop.permute.xlu1 %2613 }
 0x2ed   : > { %v2773_v44 = vpop.permute.xlu0 %2772 }
 0x2ee   : > { %v2778_v3 = vsel %vm1260_vm6, %v2771_v38, %v2773_v44  ;;  %v3961_v38 = vld [vmem:[#allocation5 + $0xf0] sm:$0xff] }
 0x2f0   : > { %v2777_v43 = vpop.permute.xlu1 %2776 }
 0x2f1   : > { %v2939_v46 = vpop.permute.xlu0 %2938 }
 0x2f2   : > { %v2944_v9 = vsel %vm1427_vm7, %v2937_v39, %v2939_v46  ;;  %v3960_v39 = vld [vmem:[#allocation5 + $0xe8] sm:$0xff] }
 0x2f4   : > { %v2943_v45 = vpop.permute.xlu1 %2942 }
 0x2f5   : > { %v8810_v52 = vpop.permute.xlu0 %3257 }
 0x2f8   : > { %v2449_v47 = vpop.permute.xlu1 %2448 }
 0x2f9   : > { %v2454_v53 = vsel %vm932_vm2, %v2447_v36, %v2449_v47  ;;  %v3425_v59 = vpop.permute.xlu0 %3424  ;;  %v3962_v36 = vld [vmem:[#allocation5 + $0xf8] sm:$0xff] }
 0x2fc   : > { %v2451_v48 = vpop.permute.xlu1 %2450 }
 0x2fd   : > { %v2456_v50 = vsel %vm932_vm2, %v2451_v48, %v2453_v40  ;;  %v2455_v51 = vsel %vm932_vm2, %v2449_v47, %v2451_v48  ;;  %v3260_v10 = vpop.permute.xlu0 %3259  ;;  %v3959_v40 = vld [vmem:[#allocation5 + $0xe0] sm:$0xff]  ;;  %v3950_v48 = vld [vmem:[#allocation5 + $0x98] sm:$0xff] }
 0x2fe   : > { %7104 = vmatprep.subr.msk.mxu0 %vm940_vm3, %v2455_v51  ;;  %7407 = vmatpush3.msk.msra.mxu1 %vm940_vm3, %v2456_v50  ;;  %v3263_v16 = vsel %vm1747_vm8, %v8810_v52, %v3260_v10  ;;  %v3951_v47 = vld [vmem:[#allocation5 + $0xa0] sm:$0xff]  ;;  %v3948_v50 = vld [vmem:[#allocation5 + $0x88] sm:$0xff]  ;;  %v3946_v52 = vld [vmem:[#allocation5 + $0x78] sm:$0xff] }
 0x2ff   : > { %7105 = vmatpush1.msk.msra.mxu0 %vm940_vm3, %v2454_v53  ;;  %7409 = vmatmul.mubr.msk.f32.vlgmr.msra.gmra.mxu1 %vm936_vm4, %v2441_v49  ;;  %v3947_v51 = vld [vmem:[#allocation5 + $0x80] sm:$0xff]  ;;  %v3945_v53 = vld [vmem:[#allocation5 + $0x70] sm:$0xff] }
 0x300   : > { %7106 = vmatmul.mubr.msk.f32.vlgmr.msra.gmra.mxu0 %vm936_vm4, %v2441_v49  ;;  %v2612_v54 = vpop.permute.xlu1 %2611  ;;  %7411 = vmatprep.subr.mxu1 %v8191_v0  ;;  %v3949_v49 = vld [vmem:[#allocation5 + $0x90] sm:$0xff] }
 0x301   : > { %v2617_v56 = vsel %vm1096_vm5, %v2612_v54, %v2614_v42  ;;  %v2616_v57 = vsel %vm1096_vm5, %v2610_v41, %v2612_v54  ;;  %7413 = vmatprep.mubr.msk.f32.mxu1 %vm8195_vm1, %v8191_v0  ;;  %2691 = vmatprep.mubr.f32.mxu0 %v8191_v0  ;;  %v3584_v14 = vpop.permute.xlu0 %3583  ;;  %v3958_v41 = vld [vmem:[#allocation5 + $0xd8] sm:$0xff]  ;;  %v3957_v42 = vld [vmem:[#allocation5 + $0xd0] sm:$0xff]  ;;  %v3944_v54 = vld [vmem:[#allocation5 + $0x68] sm:$0xff]  ;;  %vm4599_vm5 = vcmask 121856  }
 0x302   : > { %7109 = vmatprep.subr.msk.mxu0 %vm940_vm3, %v2616_v57  ;;  %7412 = vmatpush3.msk.msra.mxu1 %vm940_vm3, %v2617_v56  ;;  %v3942_v56 = vld [vmem:[#allocation5 + $0x58] sm:$0xff]  ;;  %v3941_v57 = vld [vmem:[#allocation5 + $0x50] sm:$0xff] }
 0x303   : > { %7110 = vmatpush1.msk.msra.mxu0 %vm940_vm3, %v2615_v58  ;;  %7414 = vmatmul.mubr.msk.f32.vlgmr.msra.gmra.mxu1 %vm936_vm4, %v2439_v55  ;;  %v3940_v58 = vld [vmem:[#allocation5 + $0x48] sm:$0xff] }
 0x304   : > { %7111 = vmatmul.mubr.msk.f32.vlgmr.msra.gmra.mxu0 %vm936_vm4, %v2439_v55  ;;  %v2775_v60 = vpop.permute.xlu1 %2774  ;;  %7416 = vmatprep.subr.mxu1 %v8191_v0  ;;  %v3943_v55 = vld [vmem:[#allocation5 + $0x60] sm:$0xff] }
 0x305   : > { %v2780_v62 = vsel %vm1260_vm6, %v2775_v60, %v2777_v43  ;;  %v2779_v63 = vsel %vm1260_vm6, %v2773_v44, %v2775_v60  ;;  %7418 = vmatprep.mubr.msk.f32.mxu1 %vm8195_vm1, %v8191_v0  ;;  %2854 = vmatprep.mubr.f32.mxu0 %v8191_v0  ;;  %v3586_v22 = vpop.permute.xlu0 %3585  ;;  %v3956_v43 = vld [vmem:[#allocation5 + $0xc8] sm:$0xff]  ;;  %v3955_v44 = vld [vmem:[#allocation5 + $0xc0] sm:$0xff]  ;;  %v3938_v60 = vld [vmem:[#allocation5 + $0x38] sm:$0xff] }
 0x306   : > { %7114 = vmatprep.subr.msk.mxu0 %vm940_vm3, %v2779_v63  ;;  %7417 = vmatpush3.msk.msra.mxu1 %vm940_vm3, %v2780_v62  ;;  %v3589_v28 = vsel %vm2075_vm10, %v3584_v14, %v3586_v22  ;;  %v3936_v62 = vld [vmem:[#allocation5 + $0x28] sm:$0xff]  ;;  %v3935_v63 = vld [vmem:[#allocation5 + $0x20] sm:$0xff] }
 0x307   : > { %7115 = vmatpush1.msk.msra.mxu0 %vm940_vm3, %v2778_v3  ;;  %7419 = vmatmul.mubr.msk.f32.vlgmr.msra.gmra.mxu1 %vm936_vm4, %v2769_v61  ;;  %v3934_v3 = vld [vmem:[#allocation5 + $0x18] sm:$0xff]  ;;  %v3988_v14 = vld [vmem:[#allocation5 + $0x1c8] sm:$0xff] }
 0x308   : > { %7116 = vmatmul.mubr.msk.f32.vlgmr.msra.gmra.mxu0 %vm936_vm4, %v2769_v61  ;;  %v2941_v5 = vpop.permute.xlu1 %2940  ;;  %7421 = vmatprep.subr.mxu1 %v8191_v0  ;;  %v3937_v61 = vld [vmem:[#allocation5 + $0x30] sm:$0xff] }
 0x309   : > { %v2946_v7 = vsel %vm1427_vm7, %v2941_v5, %v2943_v45  ;;  %v2945_v8 = vsel %vm1427_vm7, %v2939_v46, %v2941_v5  ;;  %7423 = vmatprep.mubr.msk.f32.mxu1 %vm8195_vm1, %v8191_v0  ;;  %3020 = vmatprep.mubr.f32.mxu0 %v8191_v0  ;;  %v3954_v45 = vld [vmem:[#allocation5 + $0xb8] sm:$0xff]  ;;  %v3953_v46 = vld [vmem:[#allocation5 + $0xb0] sm:$0xff] }
 0x30a   : > { %7119 = vmatprep.subr.msk.mxu0 %vm940_vm3, %v2945_v8  ;;  %7422 = vmatpush3.msk.msra.mxu1 %vm940_vm3, %v2946_v7  ;;  %v3933_v5 = vld [vmem:[#allocation5 + $0x10] sm:$0xff]  ;;  %v3931_v7 = vld [vmem:[#allocation5] sm:$0xff]  ;;  %v3994_v8 = vld [vmem:[#allocation5 + $0x1f8] sm:$0xff] }
 0x30b   : > { %7120 = vmatpush1.msk.msra.mxu0 %vm940_vm3, %v2944_v9  ;;  %7424 = vmatmul.mubr.msk.f32.vlgmr.msra.gmra.mxu1 %vm936_vm4, %v2935_v6  ;;  %v3993_v9 = vld [vmem:[#allocation5 + $0x1f0] sm:$0xff] }
 0x30c   : > { %7426 = vmatprep.subr.mxu1 %v8191_v0  ;;  %7121 = vmatmul.mubr.msk.f32.vlgmr.msra.gmra.mxu0 %vm936_vm4, %v2935_v6  ;;  %v3262_v11 = vpop.permute.xlu1 %3261  ;;  %v3932_v6 = vld [vmem:[#allocation5 + $0x8] sm:$0xff] }
 0x30d   : > { %7124 = vmatprep.subr.msk.mxu0 %vm940_vm3, %v8766_v32  ;;  %7427 = vmatpush3.msk.msra.mxu1 %vm940_vm3, %v8742_v30  ;;  %v3264_v12 = vsel %vm1747_vm8, %v3260_v10, %v3262_v11  ;;  %v3751_v30 = vpop.permute.xlu0 %3750  ;;  %v3992_v10 = vld [vmem:[#allocation5 + $0x1e8] sm:$0xff] }
 0x30e   : > { %7125 = vmatpush1.msk.msra.mxu0 %vm940_vm3, %v8746_v31  ;;  %7428 = vmatprep.mubr.msk.f32.mxu1 %vm8195_vm1, %v8191_v0 }
 0x30f   : > { %7129 = vmatprep.subr.msk.mxu0 %vm940_vm3, %v3264_v12  ;;  %7431 = vmatprep.subr.mxu1 %v8191_v0  ;;  %v3990_v12 = vld [vmem:[#allocation5 + $0x1d8] sm:$0xff] }
 0x310   : > { %3175 = vmatprep.mubr.f32.mxu0 %v8191_v0  ;;  %7429 = vmatmul.mubr.msk.f32.vlgmr.msra.gmra.mxu1 %vm936_vm4, %v3101_v13  ;;  %v3421_v15 = vpop.permute.xlu1 %3420 }
 0x311   : > { %7432 = vmatpush3.msk.msra.mxu1 %vm940_vm3, %v3262_v11  ;;  %7126 = vmatmul.mubr.msk.f32.vlgmr.msra.gmra.mxu0 %vm936_vm4, %v3101_v13  ;;  %v3991_v11 = vld [vmem:[#allocation5 + $0x1e0] sm:$0xff]  ;;  %v3989_v13 = vld [vmem:[#allocation5 + $0x1d0] sm:$0xff] }
 0x312   : > { %7130 = vmatpush1.msk.msra.mxu0 %vm940_vm3, %v3263_v16  ;;  %7433 = vmatprep.mubr.msk.f32.mxu1 %vm8195_vm1, %v8191_v0  ;;  %v4012_v16 = vld [vmem:[#allocation5 + $0x288] sm:$0xf] }
 0x313   : > { %7436 = vmatprep.subr.mxu1 %v8191_v0  ;;  %3338 = vmatprep.mubr.f32.mxu0 %v8191_v0 }
 0x314   : > { %7434 = vmatmul.mubr.msk.f32.vlgmr.msra.gmra.mxu1 %vm936_vm4, %v3256_v17  ;;  %v3423_v18 = vpop.permute.xlu1 %3422 }
 0x315   : > { %7437 = vmatpush3.msk.msra.mxu1 %vm940_vm3, %v3425_v59  ;;  %7131 = vmatmul.mubr.msk.f32.vlgmr.msra.gmra.mxu0 %vm936_vm4, %v3256_v17  ;;  %v3426_v19 = vsel %vm1911_vm9, %v3421_v15, %v3423_v18  ;;  %v3427_v20 = vsel %vm1911_vm9, %v3423_v18, %v3425_v59  ;;  %v3939_v59 = vld [vmem:[#allocation5 + $0x40] sm:$0xff]  ;;  %v3986_v17 = vld [vmem:[#allocation5 + $0x1b8] sm:$0xff] }
 0x316   : > { %7134 = vmatprep.subr.msk.mxu0 %vm940_vm3, %v3427_v20  ;;  %7438 = vmatprep.mubr.msk.f32.mxu1 %vm8195_vm1, %v8191_v0  ;;  %v3987_v15 = vld [vmem:[#allocation5 + $0x1c0] sm:$0xff]  ;;  %v4010_v20 = vld [vmem:[#allocation5 + $0x278] sm:$0xff] }
 0x317   : > { %7135 = vmatpush1.msk.msra.mxu0 %vm940_vm3, %v3426_v19  ;;  %3501 = vmatprep.mubr.f32.mxu0 %v8191_v0  ;;  %v4011_v18 = vld [vmem:[#allocation5 + $0x280] sm:$0xf]  ;;  %v3985_v19 = vld [vmem:[#allocation5 + $0x1b0] sm:$0xff] }
 0x318   : > { %7439 = vmatmul.mubr.msk.f32.vlgmr.msra.gmra.mxu1 %vm936_vm4, %v3419_v21  ;;  %7441 = vmatprep.subr.mxu1 %v8191_v0  ;;  %v3588_v23 = vpop.permute.xlu1 %3587 }
 0x319   : > { %7136 = vmatmul.mubr.msk.f32.vlgmr.msra.gmra.mxu0 %vm936_vm4, %v3419_v21  ;;  %7442 = vmatpush3.msk.msra.mxu1 %vm940_vm3, %v3588_v23  ;;  %v3590_v24 = vsel %vm2075_vm10, %v3586_v22, %v3588_v23  ;;  %v3984_v21 = vld [vmem:[#allocation5 + $0x1a8] sm:$0xff]  ;;  %v4009_v22 = vld [vmem:[#allocation5 + $0x270] sm:$0xff]  ;;  %v3983_v23 = vld [vmem:[#allocation5 + $0x1a0] sm:$0xff]  ;;  %vm5584_vm10 = vcmask 1040384  }
 0x31a   : > { %7139 = vmatprep.subr.msk.mxu0 %vm940_vm3, %v3590_v24  ;;  %7443 = vmatprep.mubr.msk.f32.mxu1 %vm8195_vm1, %v8191_v0  ;;  %v4008_v24 = vld [vmem:[#allocation5 + $0x268] sm:$0xff] }
 0x31b   : > { %7446 = vmatprep.subr.mxu1 %v8191_v0  ;;  %7140 = vmatpush1.msk.msra.mxu0 %vm940_vm3, %v3589_v28  ;;  %v4007_v28 = vld [vmem:[#allocation5 + $0x260] sm:$0xff] }
 0x31c   : > { %3664 = vmatprep.mubr.f32.mxu0 %v8191_v0  ;;  %7444 = vmatmul.mubr.msk.f32.vlgmr.msra.gmra.mxu1 %vm936_vm4, %v3582_v26  ;;  %v3749_v31 = vpop.permute.xlu1 %3748 }
 0x31d   : > { %7447 = vmatpush3.msk.msra.mxu1 %vm940_vm3, %v3751_v30  ;;  %7141 = vmatmul.mubr.msk.f32.vlgmr.msra.gmra.mxu0 %vm936_vm4, %v3582_v26  ;;  %v3753_v32 = vsel %vm2239_vm11, %v3749_v31, %v3751_v30  ;;  %v3982_v26 = vld [vmem:[#allocation5 + $0x198] sm:$0xff]  ;;  %v3981_v30 = vld [vmem:[#allocation5 + $0x190] sm:$0xff] }
 0x31e   : > { %7144 = vmatprep.subr.msk.mxu0 %vm940_vm3, %v3753_v32  ;;  %7448 = vmatprep.mubr.msk.f32.mxu1 %vm8195_vm1, %v8191_v0  ;;  %v3980_v32 = vld [vmem:[#allocation5 + $0x188] sm:$0xff] }
 0x31f   : > { %3827 = vmatprep.mubr.f32.mxu0 %v8191_v0  ;;  %7149 = vmatprep.subr.msk.mxu1 %vm940_vm3, %v4012_v16 }
 0x320   : > { %7449 = vmatmul.mubr.msk.f32.vlgmr.msra.gmra.mxu1 %vm936_vm4, %v3745_v33  ;;  %v3747_v34 = vpop.permute.xlu1 %3746 }
 0x321   : > { %v3752_v37 = vsel %vm2239_vm11, %v3747_v34, %v3749_v31  ;;  %4157 = vmatprep.mubr.f32.mxu1 %v8191_v0  ;;  %v3952_v0 = vld [vmem:[#allocation5 + $0xa8] sm:$0xff]  ;;  %7150 = vmatpush1.msk.msra.mxu1 %vm940_vm3, %v4011_v18  ;;  %v4006_v31 = vld [vmem:[#allocation5 + $0x258] sm:$0xff]  ;;  %v3979_v34 = vld [vmem:[#allocation5 + $0x180] sm:$0xff]  ;;  %vm5663_vm11 = vcmask 72704  }
 0x322   : > { %7145 = vmatpush1.msk.msra.mxu0 %vm940_vm3, %v3752_v37  ;;  %4109 = vmatprep.subr.mxu1 %v4010_v20  ;;  %v3978_v37 = vld [vmem:[#allocation5 + $0x178] sm:$0xff] }
 0x323   : > { %7146 = vmatmul.mubr.msk.f32.vlgmr.msra.gmra.mxu0 %vm936_vm4, %v3745_v33  ;;  %4022 = vmatprep.subr.mxu0 %v3962_v36  ;;  %v4005_v33 = vld [vmem:[#allocation5 + $0x250] sm:$0xff]  ;;  %v4004_v36 = vld [vmem:[#allocation5 + $0x248] sm:$0xff] }
 0x324   : > { %4023 = vmatpush1.msra.mxu0 %v3961_v38  ;;  %4110 = vmatpush1.msra.mxu1 %v4009_v22  ;;  %v4003_v38 = vld [vmem:[#allocation5 + $0x240] sm:$0xff] }
 0x325   : > { %4024 = vmatprep.subr.mxu0 %v3960_v39  ;;  %4111 = vmatprep.subr.mxu1 %v4008_v24  ;;  %v3977_v39 = vld [vmem:[#allocation5 + $0x170] sm:$0xff] }
 0x326   : > { %4025 = vmatpush1.msra.mxu0 %v3959_v40  ;;  %4112 = vmatpush1.msra.mxu1 %v4007_v28  ;;  %v4002_v40 = vld [vmem:[#allocation5 + $0x238] sm:$0xff] }
 0x327   : > { %4026 = vmatprep.subr.mxu0 %v3958_v41  ;;  %4113 = vmatprep.subr.mxu1 %v4006_v31  ;;  %v3976_v41 = vld [vmem:[#allocation5 + $0x168] sm:$0xff] }
 0x328   : > { %4027 = vmatpush1.msra.mxu0 %v3957_v42  ;;  %4114 = vmatpush1.msra.mxu1 %v4005_v33  ;;  %v4001_v42 = vld [vmem:[#allocation5 + $0x230] sm:$0xff] }
 0x329   : > { %4028 = vmatprep.subr.mxu0 %v3956_v43  ;;  %4115 = vmatprep.subr.mxu1 %v4004_v36  ;;  %v3975_v43 = vld [vmem:[#allocation5 + $0x160] sm:$0xff] }
 0x32a   : > { %4029 = vmatpush1.msra.mxu0 %v3955_v44  ;;  %4116 = vmatpush1.msra.mxu1 %v4003_v38  ;;  %v4000_v44 = vld [vmem:[#allocation5 + $0x228] sm:$0xff] }
 0x32b   : > { %4030 = vmatprep.subr.mxu0 %v3954_v45  ;;  %4117 = vmatprep.subr.mxu1 %v4002_v40  ;;  %v3974_v45 = vld [vmem:[#allocation5 + $0x158] sm:$0xff] }
 0x32c   : > { %4031 = vmatpush1.msra.mxu0 %v3953_v46  ;;  %4118 = vmatpush1.msra.mxu1 %v4001_v42  ;;  %v3999_v46 = vld [vmem:[#allocation5 + $0x220] sm:$0xff] }
 0x32d   : > { %4032 = vmatprep.subr.mxu0 %v3952_v0  ;;  %4119 = vmatprep.subr.mxu1 %v4000_v44  ;;  %v3973_v0 = vld [vmem:[#allocation5 + $0x150] sm:$0xff] }
 0x32e   : > { %4033 = vmatpush1.msra.mxu0 %v3951_v47  ;;  %4120 = vmatpush1.msra.mxu1 %v3999_v46  ;;  %v3998_v47 = vld [vmem:[#allocation5 + $0x218] sm:$0xff] }
 0x32f   : > { %4034 = vmatprep.subr.mxu0 %v3950_v48  ;;  %4121 = vmatprep.subr.mxu1 %v3998_v47  ;;  %v3972_v48 = vld [vmem:[#allocation5 + $0x148] sm:$0xff] }
 0x330   : > { %4035 = vmatpush1.msra.mxu0 %v3949_v49  ;;  %v3997_v49 = vld [vmem:[#allocation5 + $0x210] sm:$0xff] }
 0x331   : > { %4036 = vmatprep.subr.mxu0 %v3948_v50  ;;  %4122 = vmatpush1.msra.mxu1 %v3997_v49  ;;  %v3971_v50 = vld [vmem:[#allocation5 + $0x140] sm:$0xff] }
 0x332   : > { %4037 = vmatpush1.msra.mxu0 %v3947_v51  ;;  %v3996_v51 = vld [vmem:[#allocation5 + $0x208] sm:$0xff] }
 0x333   : > { %4038 = vmatprep.subr.mxu0 %v3946_v52  ;;  %4123 = vmatprep.subr.mxu1 %v3996_v51  ;;  %v3970_v52 = vld [vmem:[#allocation5 + $0x138] sm:$0xff] }
 0x334   : > { %4039 = vmatpush1.msra.mxu0 %v3945_v53  ;;  %v3995_v53 = vld [vmem:[#allocation5 + $0x200] sm:$0xff] }
 0x335   : > { %4040 = vmatprep.subr.mxu0 %v3944_v54  ;;  %v3969_v54 = vld [vmem:[#allocation5 + $0x130] sm:$0xff]  ;;  %4124 = vmatpush1.msra.mxu1 %v3995_v53 }
 0x336   : > { %4041 = vmatpush1.msra.mxu0 %v3943_v55  ;;  %v8914_v55 = vld [vmem:[#allocation2] sm:$0xff] }
 0x337   : > { %4042 = vmatprep.subr.mxu0 %v3942_v56  ;;  %v3968_v56 = vld [vmem:[#allocation5 + $0x128] sm:$0xff]  ;;  %5020 = vrot.lane.b32.xlu0 %v8914_v55, %s8204_s5 }
 0x338   : > { %4043 = vmatpush1.msra.mxu0 %v3941_v57  ;;  %v3967_v57 = vld [vmem:[#allocation5 + $0x120] sm:$0xff] }
 0x339   : > { %4044 = vmatprep.subr.mxu0 %v3940_v58  ;;  %v3966_v58 = vld [vmem:[#allocation5 + $0x118] sm:$0xff] }
 0x33a   : > { %4045 = vmatpush1.msra.mxu0 %v3939_v59  ;;  %v3965_v59 = vld [vmem:[#allocation5 + $0x110] sm:$0xff] }
 0x33b   : > { %4046 = vmatprep.subr.mxu0 %v3938_v60  ;;  %v3964_v60 = vld [vmem:[#allocation5 + $0x108] sm:$0xff] }
 0x33c   : > { %4047 = vmatpush1.msra.mxu0 %v3937_v61  ;;  %v3963_v61 = vld [vmem:[#allocation5 + $0x100] sm:$0xff] }
 0x33d   : > { %4048 = vmatprep.subr.mxu0 %v3936_v62 }
 0x33e   : > { %4049 = vmatpush1.msra.mxu0 %v3935_v63 }
 0x33f   : > { %4050 = vmatprep.subr.mxu0 %v3934_v3 }
 0x340   : > { %4051 = vmatpush1.msra.mxu0 %v3933_v5 }
 0x341   : > { %4052 = vmatprep.subr.mxu0 %v3932_v6 }
 0x342   : > { %4053 = vmatpush1.msra.mxu0 %v3931_v7 }
 0x343   : > { %4054 = vmatprep.subr.mxu0 %v3994_v8 }
 0x344   : > { %4055 = vmatpush2.msra.mxu0 %v3993_v9 }
 0x345   : > { %4056 = vmatprep.subr.mxu0 %v3992_v10 }
 0x346   : > { %4057 = vmatpush2.msra.mxu0 %v3991_v11 }
 0x347   : > { %4058 = vmatprep.subr.mxu0 %v3990_v12 }
 0x348   : > { %4059 = vmatpush2.msra.mxu0 %v3989_v13 }
 0x349   : > { %4060 = vmatprep.subr.mxu0 %v3988_v14 }
 0x34a   : > { %4061 = vmatpush2.msra.mxu0 %v3987_v15 }
 0x34b   : > { %4062 = vmatprep.subr.mxu0 %v3986_v17 }
 0x34c   : > { %4063 = vmatpush2.msra.mxu0 %v3985_v19 }
 0x34d   : > { %4064 = vmatprep.subr.mxu0 %v3984_v21 }
 0x34e   : > { %4065 = vmatpush2.msra.mxu0 %v3983_v23 }
 0x34f   : > { %4066 = vmatprep.subr.mxu0 %v3982_v26 }
 0x350   : > { %4067 = vmatpush2.msra.mxu0 %v3981_v30 }
 0x351   : > { %4068 = vmatprep.subr.mxu0 %v3980_v32 }
 0x352   : > { %4069 = vmatpush2.msra.mxu0 %v3979_v34 }
 0x353   : > { %4070 = vmatprep.subr.mxu0 %v3978_v37 }
 0x354   : > { %4071 = vmatpush2.msra.mxu0 %v3977_v39 }
 0x355   : > { %4072 = vmatprep.subr.mxu0 %v3976_v41 }
 0x356   : > { %4073 = vmatpush2.msra.mxu0 %v3975_v43 }
 0x357   : > { %4074 = vmatprep.subr.mxu0 %v3974_v45 }
 0x358   : > { %4075 = vmatpush2.msra.mxu0 %v3973_v0 }
 0x359   : > { %4076 = vmatprep.subr.mxu0 %v3972_v48 }
 0x35a   : > { %4077 = vmatpush2.msra.mxu0 %v3971_v50 }
 0x35b   : > { %4078 = vmatprep.subr.mxu0 %v3970_v52 }
 0x35c   : > { %4079 = vmatpush2.msra.mxu0 %v3969_v54 }
 0x35d   : > { %4080 = vmatprep.subr.mxu0 %v3968_v56 }
 0x35e   : > { %4081 = vmatpush2.msra.mxu0 %v3967_v57 }
 0x35f   : > { %4082 = vmatprep.subr.mxu0 %v3966_v58  ;;  %v3911_v58 = vpop.permute.xlu0 %3910 }
 0x360   : > { %4083 = vmatpush2.msra.mxu0 %v3965_v59 }
 0x361   : > { %4084 = vmatprep.subr.mxu0 %v3964_v60 }
 0x362   : > { %4085 = vmatpush2.msra.mxu0 %v3963_v61 }
 0x3bf   : > { %v2603_v62 = vpop.f32.mrf.mxu1 }
 0x3c0   : > { %v2532_v63 = vpop.f32.mrf.mxu0 }
 0x3c1   : > { %v7410_v3 = vpop.f32.mrf.mxu1 }
 0x3c2   : > { %v2534_v5 = vpop.f32.mrf.mxu0 }
 0x3c3   : > { %v2764_v6 = vpop.f32.mrf.mxu1 }
 0x3c4   : > { %v2693_v7 = vpop.f32.mrf.mxu0  ;;  %v2765_v18 = vadd.f32 %v2764_v6, %v2603_v62 }
 0x3c5   : > { %v7415_v8 = vpop.f32.mrf.mxu1  ;;  %v2694_v28 = vadd.f32 %v2693_v7, %v2532_v63 }
 0x3c6   : > { %v2695_v9 = vpop.f32.mrf.mxu0 }
 0x3c7   : > { %v2927_v10 = vpop.f32.mrf.mxu1  ;;  %v2696_v33 = vadd.f32 %v2695_v9, %v2534_v5 }
 0x3c8   : > { %v2856_v11 = vpop.f32.mrf.mxu0  ;;  %v2933_v22 = vadd.f32 %v2927_v10, %v2765_v18 }
 0x3c9   : > { %v7420_v12 = vpop.f32.mrf.mxu1  ;;  %v2931_v34 = vadd.f32 %v2856_v11, %v2694_v28 }
 0x3ca   : > { %v2858_v13 = vpop.f32.mrf.mxu0 }
 0x3cb   : > { %v3093_v14 = vpop.f32.mrf.mxu1  ;;  %v2932_v39 = vadd.f32 %v2858_v13, %v2696_v33  ;;  %v4251_v33 = vld [vmem:[#allocation19] sm:$0xff] }
 0x3cc   : > { %v3022_v15 = vpop.f32.mrf.mxu0  ;;  %v3099_v31 = vadd.f32 %v3093_v14, %v2933_v22 }
 0x3cd   : > { %v7425_v16 = vpop.f32.mrf.mxu1  ;;  %v3097_v40 = vadd.f32 %v3022_v15, %v2931_v34  ;;  %v4252_v34 = vld [vmem:[#allocation19 + $0x8] sm:$0xff] }
 0x3ce   : > { %v3024_v17 = vpop.f32.mrf.mxu0 }
 0x3cf   : > { %v3098_v44 = vadd.f32 %v3024_v17, %v2932_v39 }
 0x3d0   : > { %v3248_v19 = vpop.f32.mrf.mxu1 }
 0x3d1   : > { %v3177_v20 = vpop.f32.mrf.mxu0  ;;  %v3254_v37 = vadd.f32 %v3248_v19, %v3099_v31 }
 0x3d2   : > { %v7430_v21 = vpop.f32.mrf.mxu1  ;;  %v3252_v45 = vadd.f32 %v3177_v20, %v3097_v40 }
 0x3d3   : > { %v3179_v23 = vpop.f32.mrf.mxu0  ;;  %v4253_v21 = vld [vmem:[#allocation20] sm:$0xff] }
 0x3d4   : > { %v3411_v24 = vpop.f32.mrf.mxu1  ;;  %v3253_v48 = vadd.f32 %v3179_v23, %v3098_v44 }
 0x3d5   : > { %v3340_v26 = vpop.f32.mrf.mxu0  ;;  %v3417_v42 = vadd.f32 %v3411_v24, %v3254_v37  ;;  %v4164_v24 = vld [vmem:[#allocation16] sm:$0xf] }
 0x3d6   : > { %v7435_v30 = vpop.f32.mrf.mxu1  ;;  %v3415_v49 = vadd.f32 %v3340_v26, %v3252_v45 }
 0x3d7   : > { %v3342_v32 = vpop.f32.mrf.mxu0 }
 0x3d8   : > { %v3574_v36 = vpop.f32.mrf.mxu1  ;;  %v3416_v52 = vadd.f32 %v3342_v32, %v3253_v48 }
 0x3d9   : > { %v3503_v38 = vpop.f32.mrf.mxu0  ;;  %v3580_v0 = vadd.f32 %v3574_v36, %v3417_v42 }
 0x3da   : > { %v7440_v41 = vpop.f32.mrf.mxu1  ;;  %v3578_v53 = vadd.f32 %v3503_v38, %v3415_v49 }
 0x3db   : > { %v3505_v43 = vpop.f32.mrf.mxu0  ;;  %v4263_v41 = vpop.permute.xlu0 %4262 }
 0x3dc   : > { %v3737_v46 = vpop.f32.mrf.mxu1  ;;  %v3579_v59 = vadd.f32 %v3505_v43, %v3416_v52 }
 0x3dd   : > { %v3666_v47 = vpop.f32.mrf.mxu0  ;;  %v3743_v51 = vadd.f32 %v3737_v46, %v3580_v0  ;;  %v5339_v46 = vld [vmem:[#allocation22] sm:$0xff]  ;;  %v5340_v0 = vld [vmem:[#allocation22 + $0x8] sm:$0xff] }
 0x3de   : > { %v7445_v50 = vpop.f32.mrf.mxu1  ;;  %v3741_v60 = vadd.f32 %v3666_v47, %v3578_v53 }
 0x3df   : > { %v3668_v56 = vpop.f32.mrf.mxu0  ;;  %v4384_v47 = vpop.permute.xlu0 %4383 }
 0x3e0   : > { %v3900_v54 = vpop.f32.mrf.mxu1  ;;  %v3742_v3 = vadd.f32 %v3668_v56, %v3579_v59 }
 0x3e1   : > { %v3906_v57 = vadd.f32 %v3900_v54, %v3743_v51 }
 0x3e2   : > { %v7450_v61 = vpop.f32.mrf.mxu1 }
 0x3e3   : > { %v3915_v62 = vadd.f32 %v3911_v58, %v3906_v57  ;;  %v3829_v63 = vpop.f32.mrf.mxu0  ;;  %v4488_v49 = vpop.permute.xlu0 %4487 }
 0x3e4   : > { %v3904_v5 = vadd.f32 %v3829_v63, %v3741_v60 }
 0x3e5   : > { %vm3918_vm0 = vcmp.ge.f32.partialorder %v3915_v62, 0.0  ;;  %v3921_v6 = vmul.f32 0.05, %v3915_v62  ;;  %v3831_v7 = vpop.f32.mrf.mxu0 }
 0x3e6   : > { %v3913_v8 = vadd.f32 %v3911_v58, %v3904_v5  ;;  %v3905_v9 = vadd.f32 %v3831_v7, %v3742_v3 }
 0x3e7   : > { %v3924_v10 = vsel %vm3918_vm0, %v3915_v62, %v3921_v6  ;;  %v4594_v51 = vpop.permute.xlu0 %4593 }
 0x3e8   : > { %v3927_v11 = vadd.f32 %v3924_v10, %v8554_v2  ;;  %vm3916_vm1 = vcmp.ge.f32.partialorder %v3913_v8, 0.0  ;;  %v3919_v12 = vmul.f32 0.05, %v3913_v8  ;;  %v3914_v13 = vadd.f32 %v3911_v58, %v3905_v9 }
 0x3ea   : > { %v3930_v14 = vadd.f32 %v3927_v11, %v8732_v25  ;;  %v3922_v15 = vsel %vm3916_vm1, %v3913_v8, %v3919_v12  ;;  %vm3917_vm2 = vcmp.ge.f32.partialorder %v3914_v13, 0.0  ;;  %v3920_v16 = vmul.f32 0.05, %v3914_v13  ;;  %v4165_v25 = vld [vmem:[#allocation17] sm:$0xf] }
 0x3eb   : > { %v3925_v17 = vadd.f32 %v3922_v15, %v8552_v1  ;;  %4168 = vperm.xlu1 %7727, %v4165_v25   ;;  %v9035_v53 = vpop.permute.xlu0 %4704 }
 0x3ec   : > { %7151 = vmatmul.mubr.msk.f32.vlgmr.msra.gmra.mxu1 %vm896_vm15, %v3930_v14  ;;  %v3923_v18 = vsel %vm3917_vm2, %v3914_v13, %v3920_v16  ;;  %v7159_v13 = vld [vmem:[%s9470_s14 + $0x10] sm:$0xff] }
 0x3ed   : > { %v3926_v19 = vadd.f32 %v3923_v18, %v8561_v4  ;;  %4244 = vmatprep.mubr.f32.mxu1 %v8914_v55  ;;  %v3928_v2 = vadd.f32 %v3925_v17, %v8734_v27  ;;  %v7160_v17 = vld [vmem:[%s9470_s14 + $0x18] sm:$0xff] }
 0x3ef   : > { %v3929_v20 = vadd.f32 %v3926_v19, %v8739_v29  ;;  %4257 = vperm.xlu1 %7727, %v4253_v21   ;;  %v9039_v56 = vpop.permute.xlu0 %4904  ;;  %v4366_v21 = vld [vmem:[%s9470_s14] sm:$0xff] }
 0x3f1   : > { %4086 = vmatprep.mubr.f32.mxu0 %v3929_v20 }
 0x3f2   : > { %4087 = vmatmul.mubr.f32.vlgmr.msra.gmra.mxu0 %v3928_v2 }
 0x3f3   : > { %4990 = vmatprep.mubr.f32.mxu0 %v8914_v55  ;;  %4377 = vrot.lane.b32.xlu1 %v8914_v55, %s8202_s22  ;;  %v9043_v57 = vpop.permute.xlu0 %5020 }
 0x3f7   : > { %4481 = vrot.lane.b32.xlu1 %v8914_v55, %s8194_s27 }
 0x3fb   : > { %4587 = vrot.lane.b32.xlu1 %v8914_v55, %s8203_s28 }
 0x3ff   : > { %4698 = vrot.lane.b32.xlu1 %v8914_v55, %s8196_s24 }
 0x403   : > { %4910 = vrot.lane.b32.xlu1 %v8914_v55, %s8197_s3 }
 0x466   : > { %v4169_v28 = vpop.permute.xlu1 %4168 }
 0x46a   : > { %v4258_v36 = vpop.permute.xlu1 %4257 }
 0x46e   : > { %v4378_v48 = vpop.permute.xlu1 %4377 }
 0x472   : > { %v4482_v50 = vpop.permute.xlu1 %4481 }
 0x476   : > { %v9033_v52 = vpop.permute.xlu1 %4587 }
 0x47a   : > { %v9037_v54 = vpop.permute.xlu1 %4698 }
 0x4ac   : > { %v4159_v1 = vpop.f32.mrf.mxu1 }
 0x4ae   : > { %v4161_v27 = vpop.f32.mrf.mxu1 }
 0x4b2   : > { %v4088_v4 = vpop.f32.mrf.mxu0 }
 0x4b3   : > { %v4160_v23 = vadd.f32 %v4159_v1, %v4088_v4 }
 0x4b4   : > { %v4090_v29 = vpop.f32.mrf.mxu0 }
 0x4b5   : > { %v4162_v22 = vadd.f32 %v4161_v27, %v4090_v29  ;;  %v4367_v29 = vld [vmem:[%s9470_s14 + $0x8] sm:$0xff] }
 0x4b7   : > { %7152 = vmatprep.subr.msk.mxu1 %vm940_vm3, %v4162_v22 }
 0x4b8   : > { %7153 = vmatpush1.msk.msra.mxu1 %vm940_vm3, %v4160_v23 }
 0x4b9   : > { %7154 = vmatmul.mubr.msk.f32.vlgmr.msra.gmra.mxu1 %vm936_vm4, %v4164_v24 }
 0x4ba   : > { %4341 = vmatprep.mubr.f32.mxu1 %v8914_v55 }
 0x579   : > { %v4246_v26 = vpop.f32.mrf.mxu1 }
 0x57a   : > { %v8941_v32 = vadd.f32 %v4246_v26, %v4169_v28 }
 0x57b   : > { %v4248_v30 = vpop.f32.mrf.mxu1 }
 0x57c   : > { %v8939_v31 = vadd.f32 %v4248_v30, %v4169_v28  ;;  %v7165_v30 = vld [vmem:[%s9470_s14 + $0x20] sm:$0xff] }
 0x57e   : > { %7155 = vmatprep.subr.msk.mxu1 %vm940_vm3, %v8939_v31 }
 0x57f   : > { %7156 = vmatpush1.msk.msra.mxu1 %vm940_vm3, %v8941_v32  ;;  %vm4389_vm3 = vcmask 130048  }
 0x580   : > { %7157 = vmatmul.mubr.msk.f32.vlgmr.msra.gmra.mxu1 %vm936_vm4, %v4251_v33 }
 0x581   : > { %4347 = vmatprep.mubr.f32.mxu1 %v8914_v55 }
 0x584   : > { %7158 = vmatmul.mubr.msk.f32.gmra.mxu1 %vm936_vm4, %v4252_v34 }
 0x585   : > { %4468 = vmatprep.mubr.f32.mxu1 %v8914_v55 }
 0x640   : > { %v4343_v37 = vpop.f32.mrf.mxu1 }
 0x641   : > { %v8953_v38 = vadd.f32 %v4343_v37, %v4258_v36  ;;  %v7166_v37 = vld [vmem:[%s9470_s14 + $0x28] sm:$0xff] }
 0x642   : > { %v4345_v39 = vpop.f32.mrf.mxu1 }
 0x643   : > { %4354 = vst [vmem:[#allocation2 + $0x8] sm:$0xff] %v8953_v38  ;;  %v8956_v40 = vadd.f32 %v4345_v39, %v4258_v36  ;;  %4379 = vrot.lane.b32.xlu1 %v8953_v38, %s8202_s22 }
 0x644   : > { %v4349_v42 = vpop.f32.mrf.mxu1 }
 0x645   : > { %4355 = vst [vmem:[#allocation2 + $0x10] sm:$0xff] %v8956_v40  ;;  %v8961_v43 = vadd.f32 %v4349_v42, %v4263_v41  ;;  %4381 = vrot.lane.b32.xlu0 %v8956_v40, %s8202_s22 }
 0x646   : > { %v4351_v44 = vpop.f32.mrf.mxu1 }
 0x647   : > { %4356 = vst [vmem:[#allocation2 + $0x30] sm:$0xff] %v8961_v43  ;;  %v8966_v45 = vadd.f32 %v4351_v44, %v4263_v41  ;;  %4483 = vrot.lane.b32.xlu1 %v8953_v38, %s8194_s27 }
 0x649   : > { %4357 = vst [vmem:[#allocation2 + $0x38] sm:$0xff] %v8966_v45  ;;  %4485 = vrot.lane.b32.xlu0 %v8956_v40, %s8194_s27 }
 0x64b   : > { %4589 = vrot.lane.b32.xlu1 %v8953_v38, %s8203_s28 }
 0x64d   : > { %4591 = vrot.lane.b32.xlu0 %v8956_v40, %s8203_s28 }
 0x64f   : > { %4700 = vrot.lane.b32.xlu1 %v8953_v38, %s8196_s24 }
 0x651   : > { %4702 = vrot.lane.b32.xlu0 %v8956_v40, %s8196_s24 }
 0x653   : > { %4902 = vrot.lane.b32.xlu1 %v8956_v40, %s8197_s3 }
 0x655   : > { %4385 = vrot.lane.b32.xlu0 %v8961_v43, %s8202_s22 }
 0x657   : > { %4387 = vrot.lane.b32.xlu1 %v8966_v45, %s8202_s22  ;;  %s9521_s22 = sld [smem:[#allocation38_spill]] }
 0x659   : > { %4489 = vrot.lane.b32.xlu0 %v8961_v43, %s8194_s27 }
 0x65b   : > { %4900 = vrot.lane.b32.xlu1 %v8953_v38, %s8197_s3 }
 0x65d   : > { %4595 = vrot.lane.b32.xlu0 %v8961_v43, %s8203_s28 }
 0x65f   : > { %4491 = vrot.lane.b32.xlu1 %v8966_v45, %s8194_s27  ;;  %s8218_s27 = smov 4  }
 0x661   : > { %4706 = vrot.lane.b32.xlu0 %v8961_v43, %s8196_s24 }
 0x663   : > { %5012 = vrot.lane.b32.xlu1 %v8956_v40, %s8204_s5 }
 0x665   : > { %4906 = vrot.lane.b32.xlu0 %v8961_v43, %s8197_s3 }
 0x667   : > { %4597 = vrot.lane.b32.xlu1 %v8966_v45, %s8203_s28  ;;  %s8209_s28 = smov 123  }
 0x669   : > { %5016 = vrot.lane.b32.xlu0 %v8961_v43, %s8204_s5 }
 0x66b   : > { %5010 = vrot.lane.b32.xlu1 %v8953_v38, %s8204_s5 }
 0x66d   : > { %5014 = vrot.lane.b32.xlu0 %v8804_v35, %s8204_s5 }
 0x66f   : > { %4708 = vrot.lane.b32.xlu1 %v8966_v45, %s8196_s24 }
 0x671   : > { %5127 = vrot.lane.b32.xlu0 %v8961_v43, %s8205_s4 }
 0x673   : > { %5131 = vrot.lane.b32.xlu1 %v8914_v55, %s8205_s4 }
 0x675   : > { %5125 = vrot.lane.b32.xlu0 %v8804_v35, %s8205_s4 }
 0x677   : > { %5123 = vrot.lane.b32.xlu1 %v8956_v40, %s8205_s4 }
 0x679   : > { %5242 = vrot.lane.b32.xlu0 %v8914_v55, %s8198_s20 }
 0x67b   : > { %5121 = vrot.lane.b32.xlu1 %v8953_v38, %s8205_s4 }
 0x67d   : > { %4908 = vrot.lane.b32.xlu0 %v8966_v45, %s8197_s3 }
 0x67f   : > { %5018 = vrot.lane.b32.xlu1 %v8966_v45, %s8204_s5  ;;  %s8210_s5 = smov 122  }
 0x681   : > { %5238 = vrot.lane.b32.xlu0 %v8961_v43, %s8198_s20 }
 0x683   : > { %5234 = vrot.lane.b32.xlu1 %v8956_v40, %s8198_s20 }
 0x685   : > { %5129 = vrot.lane.b32.xlu0 %v8966_v45, %s8205_s4  ;;  %s8211_s4 = smov 121  }
 0x687   : > { %5240 = vrot.lane.b32.xlu1 %v8966_v45, %s8198_s20 }
 0x689   : > { %5236 = vrot.lane.b32.xlu0 %v8804_v35, %s8198_s20  ;;  %v9041_v35 = vpop.permute.xlu1 %4910 }
 0x68b   : > { %5232 = vrot.lane.b32.xlu1 %v8953_v38, %s8198_s20  ;;  %s8206_s20 = smov 126  }
 0x68d   : > { %5343 = vperm.xlu0 %7726, %v5339_v46  }
 0x68f   : > { %5348 = vperm.xlu1 %7727, %v5340_v0   ;;  %v7169_v0 = vld [vmem:[%s9470_s14 + $0x30] sm:$0xff] }
 0x6b5   : > { %v4380_v58 = vpop.permute.xlu1 %4379 }
 0x6b6   : > { %v4390_v14 = vsel %vm4389_vm3, %v4378_v48, %v4380_v58 }
 0x6b7   : > { %v4382_v59 = vpop.permute.xlu0 %4381 }
 0x6b8   : > { %v4391_v12 = vsel %vm4389_vm3, %v4380_v58, %v4382_v59  ;;  %v7174_v59 = vld [vmem:[%s9470_s14 + $0x48] sm:$0xff] }
 0x6b9   : > { %v4484_v60 = vpop.permute.xlu1 %4483 }
 0x6ba   : > { %v4493_v1 = vsel %vm1260_vm6, %v4482_v50, %v4484_v60  ;;  %v7170_v50 = vld [vmem:[%s9470_s14 + $0x38] sm:$0xff] }
 0x6bb   : > { %v4486_v61 = vpop.permute.xlu0 %4485 }
 0x6bc   : > { %v4494_v25 = vsel %vm1260_vm6, %v4484_v60, %v4486_v61 }
 0x6bd   : > { %v4590_v62 = vpop.permute.xlu1 %4589 }
 0x6be   : > { %v4600_v33 = vsel %vm4599_vm5, %v9033_v52, %v4590_v62 }
 0x6bf   : > { %v4592_v63 = vpop.permute.xlu0 %4591 }
 0x6c0   : > { %v4601_v28 = vsel %vm4599_vm5, %v4590_v62, %v4592_v63 }
 0x6c1   : > { %v9045_v3 = vpop.permute.xlu1 %4700 }
 0x6c3   : > { %v9047_v5 = vpop.permute.xlu0 %4702 }
 0x6c4   : > { %v4711_v46 = vsel %vm1427_vm7, %v9045_v3, %v9047_v5 }
 0x6c5   : > { %v9049_v6 = vpop.permute.xlu1 %4902 }
 0x6c6   : > { %v4913_v62 = vsel %vm1747_vm8, %v9049_v6, %v9039_v56 }
 0x6c7   : > { %v4386_v7 = vpop.permute.xlu0 %4385 }
 0x6c8   : > { %v4392_v10 = vsel %vm4389_vm3, %v4384_v47, %v4386_v7  ;;  %v4710_v47 = vsel %vm1427_vm7, %v9037_v54, %v9045_v3 }
 0x6c9   : > { %v4388_v8 = vpop.permute.xlu1 %4387 }
 0x6ca   : > { %v4393_v9 = vsel %vm4389_vm3, %v4386_v7, %v4388_v8  ;;  %v7181_v7 = vld [vmem:[%s9470_s14 + $0x60] sm:$0xff]  ;;  %v7178_v8 = vld [vmem:[%s9470_s14 + $0x58] sm:$0xff] }
 0x6cb   : > { %v4490_v11 = vpop.permute.xlu0 %4489  ;;  %4432 = vmatprep.subr.mxu1 %v4393_v9 }
 0x6cc   : > { %4433 = vmatpush1.msra.mxu1 %v4392_v10  ;;  %v4495_v20 = vsel %vm1260_vm6, %v4488_v49, %v4490_v11 }
 0x6cd   : > { %4434 = vmatprep.subr.mxu1 %v4391_v12  ;;  %v9058_v15 = vpop.permute.xlu1 %4900 }
 0x6ce   : > { %4435 = vmatpush1.msra.mxu1 %v4390_v14  ;;  %v4912_v3 = vsel %vm1747_vm8, %v9058_v15, %v9049_v6 }
 0x6cf   : > { %v4596_v16 = vpop.permute.xlu0 %4595  ;;  %7161 = vmatmul.mubr.msk.f32.vlgmr.msra.gmra.mxu1 %vm4389_vm3, %v7159_v13  ;;  %v7182_v13 = vld [vmem:[%s9470_s14 + $0x68] sm:$0xff] }
 0x6d0   : > { %4474 = vmatprep.mubr.f32.mxu1 %v8914_v55  ;;  %v4602_v24 = vsel %vm4599_vm5, %v4594_v51, %v4596_v16 }
 0x6d1   : > { %v4492_v18 = vpop.permute.xlu1 %4491 }
 0x6d2   : > { %v4496_v19 = vsel %vm1260_vm6, %v4490_v11, %v4492_v18  ;;  %vm5022_vm6 = vcmask 924672  }
 0x6d3   : > { %v4707_v2 = vpop.permute.xlu0 %4706  ;;  %7162 = vmatmul.mubr.msk.f32.gmra.mxu1 %vm4389_vm3, %v7160_v17  ;;  %4535 = vmatprep.subr.mxu1 %v4496_v19  ;;  %v7185_v19 = vld [vmem:[%s9470_s14 + $0x70] sm:$0xff] }
 0x6d4   : > { %4536 = vmatpush1.msra.mxu1 %v4495_v20  ;;  %4571 = vmatprep.mubr.f32.mxu1 %v8914_v55  ;;  %v4712_v42 = vsel %vm1427_vm7, %v9035_v53, %v4707_v2 }
 0x6d5   : > { %4537 = vmatprep.subr.mxu1 %v4494_v25  ;;  %v9074_v4 = vpop.permute.xlu1 %5012  ;;  %v7189_v25 = vld [vmem:[%s9470_s14 + $0x80] sm:$0xff] }
 0x6d6   : > { %4538 = vmatpush1.msra.mxu1 %v4493_v1  ;;  %v7186_v1 = vld [vmem:[%s9470_s14 + $0x78] sm:$0xff] }
 0x6d7   : > { %v4907_v27 = vpop.permute.xlu0 %4906  ;;  %7163 = vmatmul.mubr.msk.f32.vlgmr.msra.gmra.mxu1 %vm4389_vm3, %v4366_v21 }
 0x6d8   : > { %4577 = vmatprep.mubr.f32.mxu1 %v8914_v55 }
 0x6d9   : > { %v4598_v22 = vpop.permute.xlu1 %4597 }
 0x6da   : > { %v4603_v23 = vsel %vm4599_vm5, %v4596_v16, %v4598_v22  ;;  %v5369_v22 = vld [vmem:[%s9521_s22 + $0x70] sm:$0xff] }
 0x6db   : > { %v5017_v26 = vpop.permute.xlu0 %5016  ;;  %7164 = vmatmul.mubr.msk.f32.gmra.mxu1 %vm4389_vm3, %v4367_v29  ;;  %4642 = vmatprep.subr.mxu1 %v4603_v23  ;;  %v5370_v29 = vld [vmem:[%s9521_s22 + $0x78] sm:$0xff]  ;;  %v5384_v23 = vld [vmem:[%s9521_s22 + $0xe8] sm:$0xff] }
 0x6dc   : > { %4643 = vmatpush1.msra.mxu1 %v4602_v24  ;;  %4678 = vmatprep.mubr.f32.mxu1 %v8914_v55  ;;  %v5368_v24 = vld [vmem:[%s9521_s22 + $0x68] sm:$0xff] }
 0x6dd   : > { %4644 = vmatprep.subr.mxu1 %v4601_v28  ;;  %v5011_v34 = vpop.permute.xlu1 %5010  ;;  %v5367_v28 = vld [vmem:[%s9521_s22 + $0x60] sm:$0xff] }
 0x6de   : > { %4645 = vmatpush1.msra.mxu1 %v4600_v33  ;;  %v5023_v6 = vsel %vm5022_vm6, %v5011_v34, %v9074_v4  ;;  %v5366_v33 = vld [vmem:[%s9521_s22 + $0x58] sm:$0xff]  ;;  %v5381_v34 = vld [vmem:[%s9521_s22 + $0xd0] sm:$0xff] }
 0x6df   : > { %v5015_v36 = vpop.permute.xlu0 %5014  ;;  %7167 = vmatmul.mubr.msk.f32.vlgmr.msra.gmra.mxu1 %vm4389_vm3, %v7165_v30  ;;  %v5382_v30 = vld [vmem:[%s9521_s22 + $0xd8] sm:$0xff] }
 0x6e0   : > { %4684 = vmatprep.mubr.f32.mxu1 %v8914_v55  ;;  %v5024_v56 = vsel %vm5022_vm6, %v9074_v4, %v5015_v36  ;;  %v7190_v4 = vld [vmem:[%s9470_s14 + $0x88] sm:$0xff]  ;;  %v5365_v36 = vld [vmem:[%s9521_s22 + $0x50] sm:$0xff] }
 0x6e1   : > { %v4709_v39 = vpop.permute.xlu1 %4708 }
 0x6e2   : > { %v4713_v41 = vsel %vm1427_vm7, %v4707_v2, %v4709_v39  ;;  %v5364_v39 = vld [vmem:[%s9521_s22 + $0x48] sm:$0xff] }
 0x6e3   : > { %v5128_v44 = vpop.permute.xlu0 %5127  ;;  %7168 = vmatmul.mubr.msk.f32.gmra.mxu1 %vm4389_vm3, %v7166_v37  ;;  %4752 = vmatprep.subr.mxu1 %v4713_v41  ;;  %v5380_v37 = vld [vmem:[%s9521_s22 + $0xc8] sm:$0xff]  ;;  %v5379_v41 = vld [vmem:[%s9521_s22 + $0xc0] sm:$0xff] }
 0x6e4   : > { %4753 = vmatpush1.msra.mxu1 %v4712_v42  ;;  %4788 = vmatprep.mubr.f32.mxu1 %v8914_v55  ;;  %v5363_v42 = vld [vmem:[%s9521_s22 + $0x40] sm:$0xff] }
 0x6e5   : > { %4754 = vmatprep.subr.mxu1 %v4711_v46  ;;  %v5132_v48 = vpop.permute.xlu1 %5131  ;;  %v5362_v46 = vld [vmem:[%s9521_s22 + $0x38] sm:$0xff] }
 0x6e6   : > { %4755 = vmatpush1.msra.mxu1 %v4710_v47  ;;  %v5361_v47 = vld [vmem:[%s9521_s22 + $0x30] sm:$0xff] }
 0x6e7   : > { %v5126_v49 = vpop.permute.xlu0 %5125  ;;  %7171 = vmatmul.mubr.msk.f32.vlgmr.msra.gmra.mxu1 %vm4389_vm3, %v7169_v0  ;;  %4842 = vmatprep.subr.mxu1 %v8966_v45  ;;  %v7173_v45 = vld [vmem:[%s9470_s14 + $0x40] sm:$0xff]  ;;  %v5377_v0 = vld [vmem:[%s9521_s22 + $0xb0] sm:$0xff] }
 0x6e8   : > { %4843 = vmatpush1.msra.mxu1 %v8961_v43  ;;  %4794 = vmatprep.mubr.f32.mxu1 %v8914_v55 }
 0x6e9   : > { %4844 = vmatprep.subr.mxu1 %v8956_v40  ;;  %v5124_v51 = vpop.permute.xlu1 %5123 }
 0x6ea   : > { %4845 = vmatpush1.msra.mxu1 %v8953_v38 }
 0x6eb   : > { %v5243_v52 = vpop.permute.xlu0 %5242  ;;  %7172 = vmatmul.mubr.msk.f32.gmra.mxu1 %vm4389_vm3, %v7170_v50  ;;  %v5375_v50 = vld [vmem:[%s9521_s22 + $0xa0] sm:$0xff] }
 0x6ec   : > { %4878 = vmatprep.mubr.f32.mxu1 %v8914_v55 }
 0x6ed   : > { %v5122_v53 = vpop.permute.xlu1 %5121 }
 0x6ef   : > { %v4909_v54 = vpop.permute.xlu0 %4908  ;;  %7175 = vmatmul.mubr.msk.f32.vlgmr.msra.gmra.mxu1 %vm4389_vm3, %v7173_v45  ;;  %v5358_v45 = vld [vmem:[%s9521_s22 + $0x18] sm:$0xff] }
 0x6f0   : > { %v4914_v58 = vsel %vm1747_vm8, %v4907_v27, %v4909_v54  ;;  %v4915_v40 = vsel %vm1747_vm8, %v4909_v54, %v9041_v35  ;;  %4884 = vmatprep.mubr.f32.mxu1 %v8914_v55  ;;  %v7177_v35 = vld [vmem:[%s9470_s14 + $0x50] sm:$0xff]  ;;  %vm5133_vm8 = vcmask 916480   ;;  %v5386_v27 = vld [vmem:[%s9521_s22 + $0xf8] sm:$0xff] }
 0x6f1   : > { %4954 = vmatprep.subr.mxu0 %v4915_v40  ;;  %v5019_v60 = vpop.permute.xlu1 %5018  ;;  %v5135_v15 = vsel %vm5133_vm8, %v5124_v51, %v5126_v49  ;;  %v5134_v17 = vsel %vm5133_vm8, %v5122_v53, %v5124_v51  ;;  %v5360_v49 = vld [vmem:[%s9521_s22 + $0x28] sm:$0xff]  ;;  %v5359_v51 = vld [vmem:[%s9521_s22 + $0x20] sm:$0xff]  ;;  %v5373_v53 = vld [vmem:[%s9521_s22 + $0x90] sm:$0xff] }
 0x6f2   : > { %v5025_v61 = vsel %vm5022_vm6, %v5017_v26, %v5019_v60  ;;  %4955 = vmatpush1.msra.mxu0 %v4914_v58  ;;  %v5026_v63 = vsel %vm5022_vm6, %v5019_v60, %v9043_v57  ;;  %v5383_v26 = vld [vmem:[%s9521_s22 + $0xe0] sm:$0xff]  ;;  %v5357_v54 = vld [vmem:[%s9521_s22 + $0x10] sm:$0xff]  ;;  %v5372_v58 = vld [vmem:[%s9521_s22 + $0x88] sm:$0xff] }
 0x6f3   : > { %v5239_v5 = vpop.permute.xlu0 %5238  ;;  %7176 = vmatmul.mubr.msk.f32.gmra.mxu1 %vm4389_vm3, %v7174_v59  ;;  %4956 = vmatprep.subr.mxu0 %v4913_v62  ;;  %v5356_v40 = vld [vmem:[%s9521_s22 + $0x8] sm:$0xff]  ;;  %v5371_v59 = vld [vmem:[%s9521_s22 + $0x80] sm:$0xff] }
 0x6f4   : > { %5065 = vmatprep.subr.mxu1 %v5026_v63  ;;  %4957 = vmatpush1.msra.mxu0 %v4912_v3  ;;  %v5355_v60 = vld [vmem:[%s9521_s22] sm:$0xff] }
 0x6f5   : > { %5066 = vmatpush1.msra.mxu1 %v5025_v61  ;;  %7179 = vmatmul.mubr.msk.f32.vlgmr.msra.gmra.mxu0 %vm4389_vm3, %v7177_v35  ;;  %v5235_v57 = vpop.permute.xlu1 %5234 }
 0x6f6   : > { %5067 = vmatprep.subr.mxu1 %v5024_v56  ;;  %5101 = vmatprep.mubr.f32.mxu1 %v8914_v55 }
 0x6f7   : > { %5068 = vmatpush1.msra.mxu1 %v5023_v6  ;;  %v5130_v9 = vpop.permute.xlu0 %5129  ;;  %4996 = vmatprep.mubr.f32.mxu0 %v8914_v55 }
 0x6f8   : > { %v5136_v10 = vsel %vm5133_vm8, %v5128_v44, %v5130_v9  ;;  %7183 = vmatmul.mubr.msk.f32.vlgmr.msra.gmra.mxu1 %vm4389_vm3, %v7181_v7  ;;  %v5137_v11 = vsel %vm5133_vm8, %v5130_v9, %v5132_v48  ;;  %v5378_v44 = vld [vmem:[%s9521_s22 + $0xb8] sm:$0xff]  ;;  %v5376_v48 = vld [vmem:[%s9521_s22 + $0xa8] sm:$0xff] }
 0x6f9   : > { %7180 = vmatmul.mubr.msk.f32.gmra.mxu0 %vm4389_vm3, %v7178_v8  ;;  %5176 = vmatprep.subr.mxu0 %v5137_v11  ;;  %v5241_v12 = vpop.permute.xlu1 %5240 }
 0x6fa   : > { %v5246_v14 = vsel %vm1911_vm9, %v5239_v5, %v5241_v12  ;;  %5107 = vmatprep.mubr.f32.mxu1 %v8914_v55  ;;  %5177 = vmatpush1.msra.mxu0 %v5136_v10  ;;  %v5247_v16 = vsel %vm1911_vm9, %v5241_v12, %v5243_v52  ;;  %v5374_v52 = vld [vmem:[%s9521_s22 + $0x98] sm:$0xff] }
 0x6fb   : > { %v5237_v18 = vpop.permute.xlu0 %5236  ;;  %5178 = vmatprep.subr.mxu0 %v5135_v15  ;;  %5286 = vmatprep.subr.mxu1 %v5247_v16 }
 0x6fc   : > { %7184 = vmatmul.mubr.msk.f32.gmra.mxu1 %vm4389_vm3, %v7182_v13  ;;  %5179 = vmatpush1.msra.mxu0 %v5134_v17  ;;  %v5245_v20 = vsel %vm1911_vm9, %v5235_v57, %v5237_v18 }
 0x6fd   : > { %5212 = vmatprep.mubr.f32.mxu0 %v8914_v55  ;;  %5287 = vmatpush1.msra.mxu1 %v5246_v14  ;;  %v5233_v2 = vpop.permute.xlu1 %5232 }
 0x6fe   : > { %7187 = vmatmul.mubr.msk.f32.vlgmr.msra.gmra.mxu0 %vm4389_vm3, %v7185_v19  ;;  %5288 = vmatprep.subr.mxu1 %v5245_v20  ;;  %v5244_v21 = vsel %vm1911_vm9, %v5233_v2, %v5235_v57  ;;  %vm5462_vm9 = vcmask 400384  }
 0x6ff   : > { %5289 = vmatpush1.msra.mxu1 %v5244_v21  ;;  %5322 = vmatprep.mubr.f32.mxu1 %v8914_v55 }
 0x700   : > { %5218 = vmatprep.mubr.f32.mxu0 %v8914_v55  ;;  %7191 = vmatmul.mubr.msk.f32.vlgmr.msra.gmra.mxu1 %vm4389_vm3, %v7189_v25 }
 0x701   : > { %5328 = vmatprep.mubr.f32.mxu1 %v8914_v55  ;;  %7278 = vmatprep.subr.mxu0 %v5386_v27  ;;  %v5385_v55 = vld [vmem:[%s9521_s22 + $0xf0] sm:$0xff] }
 0x702   : > { %7188 = vmatmul.mubr.msk.f32.gmra.mxu0 %vm4389_vm3, %v7186_v1 }
 0x703   : > { %7279 = vmatpush3.msra.mxu0 %v5370_v29 }
 0x704   : > { %7192 = vmatmul.mubr.msk.f32.gmra.mxu1 %vm4389_vm3, %v7190_v4  ;;  %7280 = vmatprep.subr.mxu0 %v5385_v55 }
 0x705   : > { %7281 = vmatpush3.msra.mxu0 %v5369_v22 }
 0x706   : > { %7282 = vmatprep.subr.mxu0 %v5384_v23 }
 0x707   : > { %7283 = vmatpush3.msra.mxu0 %v5368_v24 }
 0x708   : > { %7284 = vmatprep.subr.mxu0 %v5383_v26 }
 0x709   : > { %7285 = vmatpush3.msra.mxu0 %v5367_v28 }
 0x70a   : > { %7286 = vmatprep.subr.mxu0 %v5382_v30 }
 0x70b   : > { %7287 = vmatpush3.msra.mxu0 %v5366_v33 }
 0x70c   : > { %7288 = vmatprep.subr.mxu0 %v5381_v34 }
 0x70d   : > { %7289 = vmatpush3.msra.mxu0 %v5365_v36 }
 0x70e   : > { %7290 = vmatprep.subr.mxu0 %v5380_v37 }
 0x70f   : > { %7291 = vmatpush3.msra.mxu0 %v5364_v39 }
 0x710   : > { %7292 = vmatprep.subr.mxu0 %v5379_v41 }
 0x711   : > { %7293 = vmatpush3.msra.mxu0 %v5363_v42 }
 0x712   : > { %7294 = vmatprep.subr.mxu0 %v5378_v44 }
 0x713   : > { %7295 = vmatpush3.msra.mxu0 %v5362_v46 }
 0x714   : > { %7296 = vmatprep.subr.mxu0 %v5377_v0 }
 0x715   : > { %7297 = vmatpush3.msra.mxu0 %v5361_v47 }
 0x716   : > { %7298 = vmatprep.subr.mxu0 %v5376_v48 }
 0x717   : > { %7299 = vmatpush3.msra.mxu0 %v5360_v49 }
 0x718   : > { %7300 = vmatprep.subr.mxu0 %v5375_v50 }
 0x719   : > { %7301 = vmatpush3.msra.mxu0 %v5359_v51 }
 0x71a   : > { %7302 = vmatprep.subr.mxu0 %v5374_v52 }
 0x71b   : > { %7303 = vmatpush3.msra.mxu0 %v5358_v45 }
 0x71c   : > { %7304 = vmatprep.subr.mxu0 %v5373_v53 }
 0x71d   : > { %7305 = vmatpush3.msra.mxu0 %v5357_v54 }
 0x71e   : > { %7306 = vmatprep.subr.mxu0 %v5372_v58 }
 0x71f   : > { %7307 = vmatpush3.msra.mxu0 %v5356_v40 }
 0x720   : > { %7308 = vmatprep.subr.mxu0 %v5371_v59 }
 0x721   : > { %7309 = vmatpush3.msra.mxu0 %v5355_v60  ;;  %v5344_v60 = vpop.permute.xlu0 %5343 }
 0x78f   : > { %v4470_v61 = vpop.f32.mrf.mxu1 }
 0x791   : > { %v4472_v62 = vpop.f32.mrf.mxu1 }
 0x793   : > { %v4476_v63 = vpop.f32.mrf.mxu1 }
 0x795   : > { %v4478_v35 = vpop.f32.mrf.mxu1 }
 0x797   : > { %v4573_v3 = vpop.f32.mrf.mxu1 }
 0x798   : > { %v4574_v15 = vadd.f32 %v4573_v3, %v4470_v61 }
 0x799   : > { %v4575_v5 = vpop.f32.mrf.mxu1 }
 0x79a   : > { %v4576_v17 = vadd.f32 %v4575_v5, %v4472_v62 }
 0x79b   : > { %v4579_v56 = vpop.f32.mrf.mxu1 }
 0x79c   : > { %v4580_v20 = vadd.f32 %v4579_v56, %v4476_v63 }
 0x79d   : > { %v4581_v57 = vpop.f32.mrf.mxu1 }
 0x79e   : > { %v4582_v4 = vadd.f32 %v4581_v57, %v4478_v35 }
 0x79f   : > { %v4680_v7 = vpop.f32.mrf.mxu1 }
 0x7a0   : > { %v4691_v18 = vadd.f32 %v4680_v7, %v4574_v15 }
 0x7a1   : > { %v4682_v6 = vpop.f32.mrf.mxu1 }
 0x7a2   : > { %v4692_v2 = vadd.f32 %v4682_v6, %v4576_v17 }
 0x7a3   : > { %v4686_v8 = vpop.f32.mrf.mxu1 }
 0x7a4   : > { %v4693_v27 = vadd.f32 %v4686_v8, %v4580_v20 }
 0x7a5   : > { %v4688_v9 = vpop.f32.mrf.mxu1 }
 0x7a6   : > { %v4694_v24 = vadd.f32 %v4688_v9, %v4582_v4  ;;  %v5349_v9 = vpop.permute.xlu1 %5348 }
 0x7a7   : > { %v4790_v10 = vpop.f32.mrf.mxu1 }
 0x7a8   : > { %v4801_v25 = vadd.f32 %v4790_v10, %v4691_v18 }
 0x7a9   : > { %v4792_v11 = vpop.f32.mrf.mxu1 }
 0x7aa   : > { %v4802_v29 = vadd.f32 %v4792_v11, %v4692_v2 }
 0x7ab   : > { %v4796_v12 = vpop.f32.mrf.mxu1 }
 0x7ac   : > { %v4803_v26 = vadd.f32 %v4796_v12, %v4693_v27 }
 0x7ad   : > { %v4798_v13 = vpop.f32.mrf.mxu1 }
 0x7ae   : > { %v4804_v36 = vadd.f32 %v4798_v13, %v4694_v24 }
 0x7af   : > { %v4880_v14 = vpop.f32.mrf.mxu1 }
 0x7b0   : > { %v4891_v55 = vadd.f32 %v4880_v14, %v4801_v25 }
 0x7b1   : > { %v4882_v16 = vpop.f32.mrf.mxu1 }
 0x7b2   : > { %v4892_v28 = vadd.f32 %v4882_v16, %v4802_v29 }
 0x7b3   : > { %v4886_v19 = vpop.f32.mrf.mxu1 }
 0x7b4   : > { %v4893_v37 = vadd.f32 %v4886_v19, %v4803_v26 }
 0x7b5   : > { %v4888_v21 = vpop.f32.mrf.mxu1  ;;  %v4992_v1 = vpop.f32.mrf.mxu0 }
 0x7b6   : > { %v5003_v30 = vadd.f32 %v4992_v1, %v4891_v55  ;;  %v4894_v44 = vadd.f32 %v4888_v21, %v4804_v36 }
 0x7b7   : > { %v4994_v22 = vpop.f32.mrf.mxu0 }
 0x7b8   : > { %v5103_v23 = vpop.f32.mrf.mxu1  ;;  %v5004_v39 = vadd.f32 %v4994_v22, %v4892_v28 }
 0x7b9   : > { %v4998_v33 = vpop.f32.mrf.mxu0  ;;  %v5114_v46 = vadd.f32 %v5103_v23, %v5003_v30 }
 0x7ba   : > { %v5105_v34 = vpop.f32.mrf.mxu1  ;;  %v5005_v0 = vadd.f32 %v4998_v33, %v4893_v37 }
 0x7bb   : > { %v5000_v41 = vpop.f32.mrf.mxu0  ;;  %v5115_v49 = vadd.f32 %v5105_v34, %v5004_v39 }
 0x7bc   : > { %v5109_v42 = vpop.f32.mrf.mxu1  ;;  %v5006_v50 = vadd.f32 %v5000_v41, %v4894_v44 }
 0x7bd   : > { %v5116_v53 = vadd.f32 %v5109_v42, %v5005_v0 }
 0x7be   : > { %v5111_v47 = vpop.f32.mrf.mxu1  ;;  %v5214_v48 = vpop.f32.mrf.mxu0 }
 0x7bf   : > { %v5225_v51 = vadd.f32 %v5214_v48, %v5114_v46  ;;  %v5117_v61 = vadd.f32 %v5111_v47, %v5006_v50  ;;  %v5577_v47 = vld [vmem:[#allocation7 + $0x30] sm:$0x1]  ;;  %v5576_v48 = vld [vmem:[#allocation7 + $0x28] sm:$0xff]  ;;  %v5575_v50 = vld [vmem:[#allocation7 + $0x20] sm:$0xff] }
 0x7c0   : > { %v5216_v52 = vpop.f32.mrf.mxu0  ;;  %v5324_v45 = vpop.f32.mrf.mxu1  ;;  %7451 = vmatprep.subr.msk.mxu1 %vm5584_vm10, %v5577_v47 }
 0x7c1   : > { %v5226_v54 = vadd.f32 %v5216_v52, %v5115_v49  ;;  %v5335_v58 = vadd.f32 %v5324_v45, %v5225_v51  ;;  %7452 = vmatpush3.msk.msra.mxu1 %vm5584_vm10, %v5577_v47  ;;  %v5574_v51 = vld [vmem:[#allocation7 + $0x18] sm:$0xff]  ;;  %v5573_v52 = vld [vmem:[#allocation7 + $0x10] sm:$0xff]  ;;  %v5572_v45 = vld [vmem:[#allocation7 + $0x8] sm:$0xff] }
 0x7c2   : > { %v5220_v40 = vpop.f32.mrf.mxu0  ;;  %v5326_v59 = vpop.f32.mrf.mxu1  ;;  %7453 = vmatprep.subr.mxu1 %v5576_v48 }
 0x7c3   : > { %v5227_v62 = vadd.f32 %v5220_v40, %v5116_v53  ;;  %v5336_v63 = vadd.f32 %v5326_v59, %v5226_v54  ;;  %v5351_v57 = vadd.f32 %v5344_v60, %v5335_v58  ;;  %7454 = vmatpush3.msra.mxu1 %v5576_v48  ;;  %v5571_v53 = vld [vmem:[#allocation7] sm:$0xff] }
 0x7c4   : > { %v5222_v35 = vpop.f32.mrf.mxu0  ;;  %v5330_v3 = vpop.f32.mrf.mxu1  ;;  %7455 = vmatprep.subr.mxu1 %v5575_v50  ;;  %v9305_v54 = vld [vmem:[#allocation2] sm:$0xff] }
 0x7c5   : > { %v5352_v5 = vadd.f32 %v5344_v60, %v5336_v63  ;;  %v5228_v56 = vadd.f32 %v5222_v35, %v5117_v61  ;;  %v5337_v7 = vadd.f32 %v5330_v3, %v5227_v62  ;;  %7456 = vmatpush3.msra.mxu1 %v5575_v50  ;;  %v7197_v50 = vld [vmem:[%s9472_s16 + $0x18] sm:$0xff] }
 0x7c6   : > { %v5332_v6 = vpop.f32.mrf.mxu1  ;;  %7457 = vmatprep.subr.mxu1 %v5574_v51 }
 0x7c7   : > { %v5338_v8 = vadd.f32 %v5332_v6, %v5228_v56  ;;  %5451 = vmatprep.mubr.f32.mxu0 %v5352_v5  ;;  %v5353_v11 = vadd.f32 %v5349_v9, %v5337_v7  ;;  %7458 = vmatpush3.msra.mxu1 %v5574_v51  ;;  %v5670_v51 = vld [vmem:[%s9472_s16] sm:$0xff] }
 0x7c8   : > { %5452 = vmatmul.mubr.f32.vlgmr.msra.gmra.mxu0 %v5351_v57  ;;  %7459 = vmatprep.subr.mxu1 %v5573_v52 }
 0x7c9   : > { %v5354_v10 = vadd.f32 %v5349_v9, %v5338_v8  ;;  %7460 = vmatpush3.msra.mxu1 %v5573_v52 }
 0x7ca   : > { %7461 = vmatprep.subr.mxu1 %v5572_v45 }
 0x7cb   : > { %5456 = vmatprep.mubr.f32.mxu0 %v5354_v10  ;;  %7462 = vmatpush3.msra.mxu1 %v5572_v45 }
 0x7cc   : > { %5457 = vmatmul.mubr.f32.gmra.mxu0 %v5353_v11  ;;  %7463 = vmatprep.subr.mxu1 %v5571_v53 }
 0x7cd   : > { %7464 = vmatpush3.msra.mxu1 %v5571_v53 }
 0x888   : > { %v7310_v12 = vpop.f32.mrf.mxu0 }
 0x88a   : > { %v7311_v13 = vpop.f32.mrf.mxu0 }
 0x88b   : > { %v7312_v14 = vadd.f32 %v7311_v13, %v7310_v12 }
 0x88c   : > { %v7313_v15 = vpop.f32.mrf.mxu0 }
 0x88d   : > { %5463 = vst.msk [vmem:[#allocation2 + $0x8] sm:$0xff] %vm5462_vm9, %v7312_v14 }
 0x88e   : > { %v7314_v16 = vpop.f32.mrf.mxu0 }
 0x88f   : > { %v7315_v17 = vadd.f32 %v7314_v16, %v7313_v15 }
 0x891   : > { %5464 = vst.msk [vmem:[#allocation2 + $0x30] sm:$0xff] %vm5462_vm9, %v7315_v17 }
 0x894   : > { %v5465_v18 = vld [vmem:[#allocation2 + $0x8] sm:$0xff] }
 0x895   : > { %5469 = vrot.lane.b32.xlu0 %v5465_v18, %s8197_s3 }
 0x898   : > { %v5466_v19 = vld [vmem:[#allocation2 + $0x30] sm:$0xff] }
 0x899   : > { %5477 = vrot.lane.b32.xlu0 %v5465_v18, %s8206_s20  ;;  %5471 = vrot.lane.b32.xlu1 %v5466_v19, %s8197_s3 }
 0x89d   : > { %5485 = vrot.lane.b32.xlu0 %v5465_v18, %s8207_s29  ;;  %5479 = vrot.lane.b32.xlu1 %v5466_v19, %s8206_s20 }
 0x8a1   : > { %5493 = vrot.lane.b32.xlu0 %v5465_v18, %s8208_s0  ;;  %5487 = vrot.lane.b32.xlu1 %v5466_v19, %s8207_s29 }
 0x8a5   : > { %5501 = vrot.lane.b32.xlu0 %v5465_v18, %s8209_s28  ;;  %5495 = vrot.lane.b32.xlu1 %v5466_v19, %s8208_s0 }
 0x8a9   : > { %5509 = vrot.lane.b32.xlu0 %v5465_v18, %s8210_s5  ;;  %5503 = vrot.lane.b32.xlu1 %v5466_v19, %s8209_s28  ;;  %s8219_s28 = smov 2  }
 0x8ad   : > { %5511 = vrot.lane.b32.xlu1 %v5466_v19, %s8210_s5  ;;  %v7210_v19 = vld [vmem:[%s9472_s16 + $0x40] sm:$0xff] }
 0x8ae   : > { %7500 = vmatprep.mubr.msk.f32.mxu0 %vm4389_vm3, %v7210_v19  ;;  %v6535_v19 = vld [vmem:[#allocation25] sm:$0xff] }
 0x907   : > { %v5470_v20 = vpop.permute.xlu0 %5469 }
 0x908   : > { %v5475_v4 = vmax.f32 %v7312_v14, %v5470_v20 }
 0x90b   : > { %v5478_v2 = vpop.permute.xlu0 %5477  ;;  %v5472_v25 = vpop.permute.xlu1 %5471 }
 0x90c   : > { %v5483_v55 = vmax.f32 %v5475_v4, %v5478_v2  ;;  %v5476_v22 = vmax.f32 %v7315_v17, %v5472_v25  ;;  %v6517_v4 = vld [vmem:[#allocation23] sm:$0xff] }
 0x90f   : > { %v5486_v21 = vpop.permute.xlu0 %5485  ;;  %v5480_v1 = vpop.permute.xlu1 %5479 }
 0x910   : > { %v5491_v23 = vmax.f32 %v5483_v55, %v5486_v21  ;;  %v5484_v28 = vmax.f32 %v5476_v22, %v5480_v1  ;;  %v7211_v21 = vld [vmem:[%s9472_s16 + $0x48] sm:$0xff]  ;;  %v7196_v1 = vld [vmem:[%s9472_s16 + $0x10] sm:$0xff]  ;;  %v7218_v55 = vld [vmem:[%s9472_s16 + $0x60] sm:$0xff] }
 0x911   : > { %v6518_v22 = vld [vmem:[#allocation23 + $0x8] sm:$0xff] }
 0x913   : > { %v5494_v27 = vpop.permute.xlu0 %5493  ;;  %v5488_v29 = vpop.permute.xlu1 %5487 }
 0x914   : > { %v5499_v30 = vmax.f32 %v5491_v23, %v5494_v27  ;;  %v5492_v33 = vmax.f32 %v5484_v28, %v5488_v29  ;;  %v6538_v27 = vld [vmem:[%s9475_s19 + $0x8] sm:$0xff]  ;;  %v6722_v29 = vld [vmem:[%s9477_s21] sm:$0xf] }
 0x915   : > { %v6537_v23 = vld [vmem:[%s9475_s19] sm:$0xff] }
 0x917   : > { %v5502_v24 = vpop.permute.xlu0 %5501  ;;  %v5496_v26 = vpop.permute.xlu1 %5495 }
 0x918   : > { %v5507_v34 = vmax.f32 %v5499_v30, %v5502_v24  ;;  %v5500_v39 = vmax.f32 %v5492_v33, %v5496_v26 }
 0x91b   : > { %v5510_v36 = vpop.permute.xlu0 %5509  ;;  %v5504_v37 = vpop.permute.xlu1 %5503 }
 0x91c   : > { %v9295_v41 = vmax.f32 %v5507_v34, %v5510_v36  ;;  %v5508_v42 = vmax.f32 %v5500_v39, %v5504_v37 }
 0x91e   : > { %5517 = vst.msk [vmem:[#allocation2 + $0x8] sm:$0xff] %vm5462_vm9, %v9295_v41 }
 0x91f   : > { %v5512_v44 = vpop.permute.xlu1 %5511 }
 0x920   : > { %v9299_v46 = vmax.f32 %v5508_v42, %v5512_v44 }
 0x922   : > { %5518 = vst.msk [vmem:[#allocation2 + $0x30] sm:$0xff] %vm5462_vm9, %v9299_v46 }
 0x925   : > { %v5519_v0 = vld [vmem:[#allocation2 + $0x8] sm:$0xff] }
 0x926   : > { %5523 = vrot.lane.b32.xlu0 %v5519_v0, %s8211_s4 }
 0x929   : > { %v5520_v49 = vld [vmem:[#allocation2 + $0x30] sm:$0xff] }
 0x92a   : > { %5531 = vrot.lane.b32.xlu0 %v5519_v0, %s8212_s1  ;;  %5525 = vrot.lane.b32.xlu1 %v5520_v49, %s8211_s4 }
 0x92e   : > { %5539 = vrot.lane.b32.xlu0 %v5519_v0, %s8213_s26  ;;  %5533 = vrot.lane.b32.xlu1 %v5520_v49, %s8212_s1 }
 0x932   : > { %5547 = vrot.lane.b32.xlu0 %v5519_v0, %s8214_s23  ;;  %5541 = vrot.lane.b32.xlu1 %v5520_v49, %s8213_s26 }
 0x936   : > { %5555 = vrot.lane.b32.xlu0 %v5519_v0, %s8215_s6  ;;  %5549 = vrot.lane.b32.xlu1 %v5520_v49, %s8214_s23 }
 0x93a   : > { %5563 = vrot.lane.b32.xlu0 %v5519_v0, %s8216_s2  ;;  %5557 = vrot.lane.b32.xlu1 %v5520_v49, %s8215_s6 }
 0x93e   : > { %5565 = vrot.lane.b32.xlu1 %v5520_v49, %s8216_s2  ;;  %5683 = vrot.lane.b32.xlu0 %v9305_v54, %s8217_s25 }
 0x942   : > { %5679 = vrot.lane.b32.xlu0 %v9305_v54, %s8217_s25 }
 0x946   : > { %5777 = vrot.lane.b32.xlu0 %v9305_v54, %s8218_s27 }
 0x94a   : > { %5773 = vrot.lane.b32.xlu0 %v9305_v54, %s8218_s27 }
 0x94e   : > { %5873 = vrot.lane.b32.xlu0 %v9305_v54, %s8219_s28 }
 0x952   : > { %5869 = vrot.lane.b32.xlu0 %v9305_v54, %s8219_s28 }
 0x956   : > { %5972 = vrot.lane.b32.xlu0 %v9305_v54, %s8196_s24 }
 0x95a   : > { %5968 = vrot.lane.b32.xlu0 %v9305_v54, %s8196_s24 }
 0x998   : > { %v5524_v58 = vpop.permute.xlu0 %5523 }
 0x999   : > { %v5529_v62 = vmax.f32 %v9295_v41, %v5524_v58  ;;  %v5671_v58 = vld [vmem:[%s9472_s16 + $0x8] sm:$0xff] }
 0x99c   : > { %v5532_v40 = vpop.permute.xlu0 %5531  ;;  %v5526_v59 = vpop.permute.xlu1 %5525 }
 0x99d   : > { %v5537_v3 = vmax.f32 %v5529_v62, %v5532_v40  ;;  %v5530_v5 = vmax.f32 %v9299_v46, %v5526_v59  ;;  %v7202_v40 = vld [vmem:[%s9472_s16 + $0x20] sm:$0xff]  ;;  %v7203_v62 = vld [vmem:[%s9472_s16 + $0x28] sm:$0xff] }
 0x9a0   : > { %v5540_v60 = vpop.permute.xlu0 %5539  ;;  %v5534_v61 = vpop.permute.xlu1 %5533 }
 0x9a1   : > { %v5545_v56 = vmax.f32 %v5537_v3, %v5540_v60  ;;  %v5538_v6 = vmax.f32 %v5530_v5, %v5534_v61 }
 0x9a4   : > { %v5548_v63 = vpop.permute.xlu0 %5547  ;;  %v5542_v35 = vpop.permute.xlu1 %5541 }
 0x9a5   : > { %v5553_v8 = vmax.f32 %v5545_v56, %v5548_v63  ;;  %v5546_v9 = vmax.f32 %v5538_v6, %v5542_v35  ;;  %v7206_v63 = vld [vmem:[%s9472_s16 + $0x30] sm:$0xff]  ;;  %v7207_v56 = vld [vmem:[%s9472_s16 + $0x38] sm:$0xff] }
 0x9a8   : > { %v5556_v57 = vpop.permute.xlu0 %5555  ;;  %v5550_v7 = vpop.permute.xlu1 %5549 }
 0x9a9   : > { %v5561_v10 = vmax.f32 %v5553_v8, %v5556_v57  ;;  %v5554_v13 = vmax.f32 %v5546_v9, %v5550_v7  ;;  %v7214_v57 = vld [vmem:[%s9472_s16 + $0x50] sm:$0xff]  ;;  %v7215_v8 = vld [vmem:[%s9472_s16 + $0x58] sm:$0xff] }
 0x9aa   : > { %v7222_v9 = vld [vmem:[%s9472_s16 + $0x70] sm:$0xff] }
 0x9ac   : > { %v5564_v11 = vpop.permute.xlu0 %5563  ;;  %v5558_v12 = vpop.permute.xlu1 %5557 }
 0x9ad   : > { %v5569_v14 = vmax.f32 %v5561_v10, %v5564_v11  ;;  %v5562_v15 = vmax.f32 %v5554_v13, %v5558_v12  ;;  %v7219_v11 = vld [vmem:[%s9472_s16 + $0x68] sm:$0xff]  ;;  %v7226_v12 = vld [vmem:[%s9472_s16 + $0x80] sm:$0xff] }
 0x9af   : > { %7465 = vmatprep.mubr.msk.f32.mxu1 %vm5462_vm9, %v5569_v14 }
 0x9b0   : > { %v5566_v16 = vpop.permute.xlu1 %5565  ;;  %v5684_v24 = vpop.permute.xlu0 %5683 }
 0x9b1   : > { %v5570_v17 = vmax.f32 %v5562_v15, %v5566_v16  ;;  %v7223_v15 = vld [vmem:[%s9472_s16 + $0x78] sm:$0xff] }
 0x9b2   : > { %v7738_v16 = vld [vmem:[#allocation2 + $0x38] sm:$0xff] }
 0x9b3   : > { %7466 = vmatmul.mubr.msk.f32.vlgmr.msra.gmra.mxu1 %vm5462_vm9, %v5570_v17 }
 0x9b4   : > { %7472 = vmatprep.mubr.msk.f32.mxu1 %vm4389_vm3, %v7196_v1  ;;  %v5680_v26 = vpop.permute.xlu0 %5679 }
 0x9b8   : > { %v5778_v28 = vpop.permute.xlu0 %5777 }
 0x9bc   : > { %v5774_v30 = vpop.permute.xlu0 %5773 }
 0x9c0   : > { %v5874_v33 = vpop.permute.xlu0 %5873 }
 0x9c4   : > { %v5870_v34 = vpop.permute.xlu0 %5869 }
 0x9c8   : > { %v5973_v36 = vpop.permute.xlu0 %5972 }
 0x9cc   : > { %v5969_v37 = vpop.permute.xlu0 %5968 }
 0xa73   : > { %v7467_v18 = vpop.f32.mrf.mxu1 }
 0xa74   : > { %5665 = vst.msk [vmem:[#allocation2 + $0x30] sm:$0xff] %vm5663_vm11, %v7467_v18  ;;  %v7227_v18 = vld [vmem:[%s9472_s16 + $0x88] sm:$0xff] }
 0xa75   : > { %v5654_v20 = vpop.f32.mrf.mxu1 }
 0xa76   : > { %5664 = vst.msk [vmem:[#allocation2 + $0x8] sm:$0xff] %vm5663_vm11, %v5654_v20  ;;  %v7739_v20 = vld [vmem:[#allocation2 + $0x10] sm:$0xff] }
 0xa7b   : > { %v5669_v2 = vld [vmem:[#allocation2 + $0x30] sm:$0xff] }
 0xa7c   : > { %6154 = vrot.lane.b32.xlu0 %v5669_v2, %s8197_s3  ;;  %5685 = vrot.lane.b32.xlu1 %v5669_v2, %s8217_s25 }
 0xa7d   : > { %7496 = vmatprep.subr.mxu0 %v5669_v2  ;;  %v5667_v25 = vld [vmem:[#allocation2 + $0x8] sm:$0xff] }
 0xa7e   : > { %7497 = vmatpush3.msra.mxu0 %v5669_v2 }
 0xa7f   : > { %7498 = vmatprep.subr.mxu0 %v5667_v25 }
 0xa80   : > { %7499 = vmatpush3.msra.mxu0 %v5667_v25  ;;  %6246 = vrot.lane.b32.xlu0 %v5669_v2, %s8206_s20 }
 0xa81   : > { %5779 = vrot.lane.b32.xlu1 %v5669_v2, %s8218_s27  ;;  %7501 = vmatmul.mubr.msk.f32.vlgmr.msra.gmra.mxu0 %vm4389_vm3, %v7211_v21  ;;  %v6531_v21 = vld [vmem:[#allocation8] sm:$0xff] }
 0xa82   : > { %7514 = vmatprep.mubr.msk.f32.mxu0 %vm4389_vm3, %v7218_v55 }
 0xa84   : > { %6338 = vrot.lane.b32.xlu0 %v5669_v2, %s8207_s29 }
 0xa85   : > { %5875 = vrot.lane.b32.xlu1 %v5669_v2, %s8219_s28 }
 0xa88   : > { %6430 = vrot.lane.b32.xlu0 %v5669_v2, %s8208_s0 }
 0xa89   : > { %5974 = vrot.lane.b32.xlu1 %v5669_v2, %s8196_s24  ;;  %v6534_v2 = vld [vmem:[#allocation8 + $0x18] sm:$0x1] }
 0xa8c   : > { %6521 = vperm.xlu0 %7726, %v6517_v4  }
 0xa8d   : > { %5681 = vrot.lane.b32.xlu1 %v5667_v25, %s8217_s25 }
 0xa90   : > { %6546 = vperm.xlu0 %7726, %v6538_v27  }
 0xa91   : > { %5775 = vrot.lane.b32.xlu1 %v5667_v25, %s8218_s27 }
 0xa94   : > { %6725 = vperm.xlu0 %7726, %v6722_v29  }
 0xa95   : > { %5871 = vrot.lane.b32.xlu1 %v5667_v25, %s8219_s28 }
 0xa99   : > { %5970 = vrot.lane.b32.xlu1 %v5667_v25, %s8196_s24  ;;  %s9522_s24 = sld [smem:[#allocation42_spill]] }
 0xa9d   : > { %6152 = vrot.lane.b32.xlu1 %v5667_v25, %s8197_s3  ;;  %s7241_s3 = sshll.u32 %s9526_s30, 3 }
 0xaa1   : > { %6244 = vrot.lane.b32.xlu1 %v5667_v25, %s8206_s20 }
 0xaa5   : > { %6336 = vrot.lane.b32.xlu1 %v5667_v25, %s8207_s29 }
 0xaa9   : > { %6428 = vrot.lane.b32.xlu1 %v5667_v25, %s8208_s0  ;;  %v6533_v25 = vld [vmem:[#allocation8 + $0x10] sm:$0x1]  ;;  %s9523_s0 = sld [smem:[#allocation43_spill]] }
 0xaad   : > { %6526 = vperm.xlu1 %7727, %v6518_v22  }
 0xaaf   : > { %s891_s28 = scalar_lea.vmem %s9523_s0, %s7241_s3 }
 0xab1   : > { %6541 = vperm.xlu1 %7727, %v6537_v23  }
 0xaee   : > { %v6155_v39 = vpop.permute.xlu0 %6154  ;;  %v5686_v41 = vpop.permute.xlu1 %5685 }
 0xaef   : > { %v5689_v42 = vsel %vm5687_vm12, %v5684_v24, %v5686_v41 }
 0xaf0   : > { %7468 = vmatprep.subr.mxu1 %v5689_v42 }
 0xaf1   : > { %7469 = vmatpush3.msra.mxu1 %v5689_v42 }
 0xaf2   : > { %v6247_v44 = vpop.permute.xlu0 %6246 }
 0xaf3   : > { %v5780_v46 = vpop.permute.xlu1 %5779  ;;  %7510 = vmatprep.subr.mxu0 %v6247_v44 }
 0xaf4   : > { %7511 = vmatpush3.msra.mxu0 %v6247_v44  ;;  %v5782_v52 = vsel %vm936_vm4, %v5778_v28, %v5780_v46 }
 0xaf6   : > { %v6339_v7 = vpop.permute.xlu0 %6338 }
 0xaf7   : > { %v5876_v0 = vpop.permute.xlu1 %5875 }
 0xaf8   : > { %v5879_v59 = vsel %vm5877_vm13, %v5874_v33, %v5876_v0 }
 0xafa   : > { %v6431_v13 = vpop.permute.xlu0 %6430 }
 0xafb   : > { %v5975_v47 = vpop.permute.xlu1 %5974 }
 0xafc   : > { %v5977_v35 = vsel %vm1427_vm7, %v5973_v36, %v5975_v47 }
 0xaff   : > { %v5682_v48 = vpop.permute.xlu1 %5681 }
 0xb00   : > { %v5688_v49 = vsel %vm5687_vm12, %v5680_v26, %v5682_v48 }
 0xb01   : > { %7470 = vmatprep.subr.mxu1 %v5688_v49 }
 0xb02   : > { %7471 = vmatpush3.msra.mxu1 %v5688_v49 }
 0xb03   : > { %7473 = vmatmul.mubr.msk.f32.vlgmr.msra.gmra.mxu1 %vm4389_vm3, %v7197_v50  ;;  %7475 = vmatprep.subr.mxu1 %v5782_v52  ;;  %v5776_v45 = vpop.permute.xlu1 %5775 }
 0xb04   : > { %7476 = vmatpush3.msra.mxu1 %v5782_v52  ;;  %v5781_v53 = vsel %vm936_vm4, %v5774_v30, %v5776_v45  ;;  %7479 = vmatprep.mubr.msk.f32.mxu1 %vm4389_vm3, %v5670_v51 }
 0xb05   : > { %7477 = vmatprep.subr.mxu1 %v5781_v53 }
 0xb06   : > { %7478 = vmatpush3.msra.mxu1 %v5781_v53 }
 0xb07   : > { %7480 = vmatmul.mubr.msk.f32.vlgmr.msra.gmra.mxu1 %vm4389_vm3, %v5671_v58  ;;  %7482 = vmatprep.subr.mxu1 %v5879_v59  ;;  %v5872_v60 = vpop.permute.xlu1 %5871 }
 0xb08   : > { %7483 = vmatpush3.msra.mxu1 %v5879_v59  ;;  %v5878_v61 = vsel %vm5877_vm13, %v5870_v34, %v5872_v60  ;;  %7486 = vmatprep.mubr.msk.f32.mxu1 %vm4389_vm3, %v7202_v40 }
 0xb09   : > { %7484 = vmatprep.subr.mxu1 %v5878_v61 }
 0xb0a   : > { %7485 = vmatpush3.msra.mxu1 %v5878_v61  ;;  %v6522_v61 = vpop.permute.xlu0 %6521 }
 0xb0b   : > { %7487 = vmatmul.mubr.msk.f32.vlgmr.msra.gmra.mxu1 %vm4389_vm3, %v7203_v62  ;;  %7489 = vmatprep.subr.mxu1 %v5977_v35  ;;  %v5971_v3 = vpop.permute.xlu1 %5970 }
 0xb0c   : > { %7490 = vmatpush3.msra.mxu1 %v5977_v35  ;;  %v5976_v5 = vsel %vm1427_vm7, %v5969_v37, %v5971_v3  ;;  %7493 = vmatprep.mubr.msk.f32.mxu1 %vm4389_vm3, %v7206_v63 }
 0xb0d   : > { %7491 = vmatprep.subr.mxu1 %v5976_v5 }
 0xb0e   : > { %7492 = vmatpush3.msra.mxu1 %v5976_v5 }
 0xb0f   : > { %7494 = vmatmul.mubr.msk.f32.vlgmr.msra.gmra.mxu1 %vm4389_vm3, %v7207_v56  ;;  %7503 = vmatprep.subr.mxu1 %v6155_v39  ;;  %v6153_v6 = vpop.permute.xlu1 %6152 }
 0xb10   : > { %7504 = vmatpush3.msra.mxu1 %v6155_v39  ;;  %7507 = vmatprep.mubr.msk.f32.mxu1 %vm4389_vm3, %v7214_v57 }
 0xb11   : > { %7505 = vmatprep.subr.mxu1 %v6153_v6 }
 0xb12   : > { %7506 = vmatpush3.msra.mxu1 %v6153_v6 }
 0xb13   : > { %7508 = vmatmul.mubr.msk.f32.vlgmr.msra.gmra.mxu1 %vm4389_vm3, %v7215_v8  ;;  %7517 = vmatprep.subr.mxu1 %v6339_v7  ;;  %v6245_v10 = vpop.permute.xlu1 %6244 }
 0xb14   : > { %7512 = vmatprep.subr.mxu0 %v6245_v10  ;;  %7518 = vmatpush3.msra.mxu1 %v6339_v7 }
 0xb15   : > { %7513 = vmatpush3.msra.mxu0 %v6245_v10  ;;  %7521 = vmatprep.mubr.msk.f32.mxu1 %vm4389_vm3, %v7222_v9  ;;  %v6547_v9 = vpop.permute.xlu0 %6546 }
 0xb16   : > { %7515 = vmatmul.mubr.msk.f32.vlgmr.msra.gmra.mxu0 %vm4389_vm3, %v7219_v11  ;;  %7524 = vmatprep.subr.mxu0 %v6431_v13 }
 0xb17   : > { %v6337_v14 = vpop.permute.xlu1 %6336  ;;  %7525 = vmatpush3.msra.mxu0 %v6431_v13  ;;  %7528 = vmatprep.mubr.msk.f32.mxu0 %vm4389_vm3, %v7226_v12 }
 0xb18   : > { %7519 = vmatprep.subr.mxu1 %v6337_v14 }
 0xb19   : > { %7520 = vmatpush3.msra.mxu1 %v6337_v14 }
 0xb1a   : > { %7522 = vmatmul.mubr.msk.f32.vlgmr.msra.gmra.mxu1 %vm4389_vm3, %v7223_v15  ;;  %6583 = vmatprep.subr.mxu1 %v7738_v16 }
 0xb1b   : > { %6584 = vmatpush1.msra.mxu1 %v8961_v43  ;;  %v6429_v17 = vpop.permute.xlu1 %6428  ;;  %6619 = vmatprep.mubr.f32.mxu1 %v9305_v54  ;;  %v6536_v43 = vld [vmem:[#allocation25 + $0x8] sm:$0xff] }
 0xb1c   : > { %7526 = vmatprep.subr.mxu0 %v6429_v17  ;;  %6585 = vmatprep.subr.mxu1 %v7739_v20  ;;  %v6632_v20 = vld [vmem:[%s9522_s24] sm:$0xf] }
 0xb1d   : > { %7527 = vmatpush3.msra.mxu0 %v6429_v17  ;;  %6586 = vmatpush1.msra.mxu1 %v8953_v38  ;;  %v6532_v38 = vld [vmem:[#allocation8 + $0x8] sm:$0xff] }
 0xb1e   : > { %7529 = vmatmul.mubr.msk.f32.vlgmr.msra.gmra.mxu0 %vm4389_vm3, %v7227_v18  ;;  %7230 = vmatmul.mubr.msk.f32.vlgmr.msra.gmra.mxu1 %vm4389_vm3, %v6535_v19 }
 0xb1f   : > { %6625 = vmatprep.mubr.f32.mxu1 %v9305_v54  ;;  %6709 = vmatprep.mubr.f32.mxu0 %v9305_v54 }
 0xb20   : > { %7232 = vmatprep.subr.msk.mxu0 %vm5584_vm10, %v6534_v2 }
 0xb21   : > { %7233 = vmatpush1.msk.msra.mxu0 %vm5584_vm10, %v6533_v25 }
 0xb22   : > { %7231 = vmatmul.mubr.msk.f32.gmra.mxu1 %vm4389_vm3, %v6536_v43  ;;  %6675 = vmatprep.subr.mxu0 %v6532_v38  ;;  %v6726_v43 = vpop.permute.xlu0 %6725 }
 0xb23   : > { %6795 = vmatprep.mubr.f32.mxu1 %v9305_v54  ;;  %6676 = vmatpush1.msra.mxu0 %v6531_v21 }
 0xb28   : > { %v6527_v35 = vpop.permute.xlu1 %6526 }
 0xb2c   : > { %v6542_v12 = vpop.permute.xlu1 %6541 }
 0xb41   : > { %v7502_v26 = vpop.f32.mrf.mxu0 }
 0xb43   : > { %v6138_v37 = vpop.f32.mrf.mxu0 }
 0xbc3   : > { %v7474_v1 = vpop.f32.mrf.mxu1 }
 0xbc5   : > { %v5764_v4 = vpop.f32.mrf.mxu1 }
 0xbc7   : > { %v7481_v27 = vpop.f32.mrf.mxu1 }
 0xbc8   : > { %v5863_v22 = vadd.f32 %v7481_v27, %v7474_v1 }
 0xbc9   : > { %v5857_v29 = vpop.f32.mrf.mxu1 }
 0xbca   : > { %v5858_v24 = vadd.f32 %v5857_v29, %v5764_v4 }
 0xbcb   : > { %v7488_v55 = vpop.f32.mrf.mxu1 }
 0xbcc   : > { %v5964_v33 = vadd.f32 %v7488_v55, %v5863_v22 }
 0xbcd   : > { %v5954_v23 = vpop.f32.mrf.mxu1 }
 0xbce   : > { %v5963_v30 = vadd.f32 %v5954_v23, %v5858_v24 }
 0xbcf   : > { %v7495_v28 = vpop.f32.mrf.mxu1 }
 0xbd0   : > { %v6062_v39 = vadd.f32 %v7495_v28, %v5964_v33 }
 0xbd1   : > { %v6052_v34 = vpop.f32.mrf.mxu1 }
 0xbd2   : > { %v6061_v36 = vadd.f32 %v6052_v34, %v5963_v30  ;;  %v6148_v0 = vadd.f32 %v7502_v26, %v6062_v39 }
 0xbd3   : > { %v7509_v41 = vpop.f32.mrf.mxu1 }
 0xbd4   : > { %v6147_v42 = vadd.f32 %v6138_v37, %v6061_v36  ;;  %v6240_v50 = vadd.f32 %v7509_v41, %v6148_v0 }
 0xbd5   : > { %v6230_v44 = vpop.f32.mrf.mxu1 }
 0xbd6   : > { %v7516_v46 = vpop.f32.mrf.mxu0  ;;  %v6239_v47 = vadd.f32 %v6230_v44, %v6147_v42 }
 0xbd7   : > { %v6332_v53 = vadd.f32 %v7516_v46, %v6240_v50 }
 0xbd8   : > { %v6322_v48 = vpop.f32.mrf.mxu0 }
 0xbd9   : > { %v6331_v52 = vadd.f32 %v6322_v48, %v6239_v47 }
 0xbda   : > { %v7523_v49 = vpop.f32.mrf.mxu1 }
 0xbdb   : > { %v6424_v59 = vadd.f32 %v7523_v49, %v6332_v53 }
 0xbdc   : > { %v6414_v51 = vpop.f32.mrf.mxu1 }
 0xbdd   : > { %v6423_v58 = vadd.f32 %v6414_v51, %v6331_v52 }
 0xbde   : > { %v7530_v45 = vpop.f32.mrf.mxu0  ;;  %v6621_v5 = vpop.f32.mrf.mxu1 }
 0xbdf   : > { %v6516_v62 = vadd.f32 %v7530_v45, %v6424_v59  ;;  %v6622_v17 = vadd.f32 %v6621_v5, %v6542_v12 }
 0xbe0   : > { %v6506_v40 = vpop.f32.mrf.mxu0  ;;  %v6623_v56 = vpop.f32.mrf.mxu1 }
 0xbe1   : > { %v6515_v60 = vadd.f32 %v6506_v40, %v6423_v58  ;;  %v6530_v3 = vadd.f32 %v6527_v35, %v6516_v62  ;;  %v6624_v15 = vadd.f32 %v6623_v56, %v6542_v12 }
 0xbe2   : > { %v6627_v57 = vpop.f32.mrf.mxu1 }
 0xbe3   : > { %v6529_v63 = vadd.f32 %v6522_v61, %v6515_v60  ;;  %v6628_v13 = vadd.f32 %v6627_v57, %v6547_v9 }
 0xbe4   : > { %v6629_v6 = vpop.f32.mrf.mxu1 }
 0xbe5   : > { %7234 = vmatmul.mubr.msk.f32.vlgmr.msra.gmra.mxu0 %vm5663_vm11, %v6529_v63  ;;  %v6630_v11 = vadd.f32 %v6629_v6, %v6547_v9 }
 0xbe6   : > { %6715 = vmatprep.mubr.f32.mxu0 %v9305_v54 }
 0xbe9   : > { %7235 = vmatmul.mubr.msk.f32.gmra.mxu0 %vm5663_vm11, %v6530_v3 }
 0xca5   : > { %v6711_v7 = vpop.f32.mrf.mxu0 }
 0xca6   : > { %v6712_v19 = vadd.f32 %v6711_v7, %v6622_v17 }
 0xca7   : > { %v6713_v8 = vpop.f32.mrf.mxu0 }
 0xca8   : > { %v6714_v54 = vadd.f32 %v6713_v8, %v6624_v15 }
 0xca9   : > { %v6717_v10 = vpop.f32.mrf.mxu0 }
 0xcaa   : > { %v6718_v18 = vadd.f32 %v6717_v10, %v6628_v13 }
 0xcab   : > { %v6719_v14 = vpop.f32.mrf.mxu0 }
 0xcac   : > { %v6720_v16 = vadd.f32 %v6719_v14, %v6630_v11 }
 0xcae   : > { %6759 = vmatprep.subr.mxu1 %v6720_v16 }
 0xcaf   : > { %6760 = vmatpush1.msra.mxu1 %v6718_v18 }
 0xcb0   : > { %6761 = vmatprep.subr.mxu1 %v6714_v54 }
 0xcb1   : > { %6762 = vmatpush1.msra.mxu1 %v6712_v19 }
 0xcb2   : > { %7236 = vmatmul.mubr.msk.f32.vlgmr.msra.gmra.mxu1 %vm4389_vm3, %v6632_v20 }
 0xd72   : > { %v6797_v2 = vpop.f32.mrf.mxu1 }
 0xd73   : > { %v6798_v25 = vadd.f32 %v6797_v2, %v6726_v43 }
 0xd74   : > { %v6799_v38 = vpop.f32.mrf.mxu1 }
 0xd75   : > { %v7237_v21 = vmul.f32 -1.442695, %v6798_v25  ;;  %v6800_v1 = vadd.f32 %v6799_v38, %v6726_v43 }
 0xd77   : > { %7728 = vpow2.f32 %v7237_v21  ;;  %v7238_v4 = vmul.f32 -1.442695, %v6800_v1 }
 0xd79   : > { %7730 = vpow2.f32 %v7238_v4 }
 0xd84   : > { %v7729_v27 = vpop.eup %7728 }
 0xd85   : > { %v6808_v29 = vadd.f32 1.0, %v7729_v27 }
 0xd86   : > { %v7731_v55 = vpop.eup %7730 }
 0xd87   : > { %7732 = vrcp.f32 %v6808_v29  ;;  %v6809_v22 = vadd.f32 1.0, %v7731_v55 }
 0xd89   : > { %7734 = vrcp.f32 %v6809_v22 }
 0xd94   : > { %v7733_v23 = vpop.eup %7732 }
 0xd95   : > { %v6814_v26 = vmul.f32 %v7733_v23, %v8941_v32 }
 0xd96   : > { %v7735_v24 = vpop.eup %7734 }
 0xd97   : > { %v6815_v28 = vmul.f32 %v7735_v24, %v8939_v31 }
 0xd99   : > { %v6818_v30 = vcombine.low %v6814_v26, %v6815_v28 }
 0xd9b   : > { %6820 = vst [vmem:[%s891_s28] sm:$0xff] %v6818_v30 }
 0xd9c PF: > { %s9524_s6 = sld [smem:[#allocation34_spill]] }
 0xda2   : > { %s40_s3 = sadd.s32 1, %s9524_s6  }
 0xda3   : > { %p37_p1 = scmp.ge.s32.totalorder %s40_s3, 4  }
 0xda5   :  { %39 = sbr.rel (!%p37_p1) target bundleno = 18 (0x12), region = 231 }
 0xdaa   :  { %6842 = vsyncpa [#allocation4], 1 }
 0xdab   :  { %6844 = vsyncpa [#allocation4 + $0x1], 1 }
 0xdac   :  { %6845 = vsyncpa [#allocation6], 1 }
 0xdad   :  { %6846 = vsyncpa [#allocation9], 1 }
 0xdae   :  { %6847 = vsyncpa [#allocation12], 1 }
 0xdaf   :  { %6848 = vsyncpa [#allocation15], 1 }
 0xdb0   :  { %6849 = vsyncpa [#allocation18], 1 }
 0xdb1   :  { %6850 = vsyncpa [#allocation21], 1 }
 0xdb2   :  { %6851 = vsyncpa [#allocation24], 1 }

</bundles_post_ra>
